<compile_context>
chip_gen: v7x
topology: tpu7x:2x2x1
jax: 0.10.0
libtpu: 0.0.40
codegen_flags: <defaults>
</compile_context>

<pallas_src>
import jax
import jax.numpy as jnp
from jax import lax
from jax.experimental import pallas as pl
from jax.experimental.pallas import tpu as pltpu

EPS = 1e-5  # nn.InstanceNorm2d default


def _fused_resblock_kernel(x_ref, w1_ref, w2_ref, o_ref, pad_ref, taps_ref):
    """x_ref:    (1, H, W, C)     input block (f32)
       w*_ref:   (3, 3C, C)       bf16 conv weights, (kh, kw*Cin, Cout)
       o_ref:    (1, H, W, C)     output block (f32)
       pad_ref:  (H+2, W+2, C)    f32 VMEM scratch, reused for both reflect-pads
       taps_ref: (H, W, 3C)       bf16 VMEM staging tile for the per-dh taps."""
    _, H, W, C = x_ref.shape
    HW = H * W

    def reflect_pad_into_scratch(img):
        # img: (H, W, C) f32 value -> reflection-padded copy written into pad_ref.
        pad_ref[1:H + 1, 1:W + 1, :] = img
        pad_ref[0:1, 1:W + 1, :] = img[1:2]                   # top row    <- row 1
        pad_ref[H + 1:H + 2, 1:W + 1, :] = img[H - 2:H - 1]   # bottom row <- row H-2
        # Columns reflected from the row-padded buffer so the corner pixels
        # come out exactly like nn.ReflectionPad2d(1).
        pad_ref[:, 0:1, :] = pad_ref[:, 2:3, :]               # left col   <- col 1
        pad_ref[:, W + 1:W + 2, :] = pad_ref[:, W - 1:W, :]   # right col  <- col W-2

    def conv3x3(w_ref):
        # Valid 3x3 conv over the padded scratch as 3 MXU dots of K = 3C:
        # per kernel row dh, pack the 3 dw-shifted taps along channels (bf16)
        # and do (HW, 3C) x (3C, C) with f32 accumulation.
        acc = jnp.zeros((HW, C), jnp.float32)
        for dh in range(3):
            for dw in range(3):
                taps_ref[:, :, dw * C:(dw + 1) * C] = (
                    pad_ref[dh:dh + H, dw:dw + W, :].astype(jnp.bfloat16))
            acc = acc + jnp.dot(taps_ref[...].reshape(HW, 3 * C), w_ref[dh],
                                preferred_element_type=jnp.float32)
        # Conv bias intentionally omitted: a per-channel constant is exactly
        # cancelled by the affine=False InstanceNorm mean subtraction below.
        return acc

    def instance_norm(acc):
        # One-pass per-channel stats over the spatial axis (biased variance),
        # computed on the f32 accumulator and clamped for safety.
        mean = jnp.mean(acc, axis=0, keepdims=True)
        mean_sq = jnp.mean(acc * acc, axis=0, keepdims=True)
        var = jnp.maximum(mean_sq - mean * mean, 0.0)
        return (acc - mean) * lax.rsqrt(var + EPS)

    x = x_ref[0]                                                          # (H, W, C)

    # --- block 1: reflect-pad -> conv -> InstanceNorm -> ReLU (y1 stays in VMEM) ---
    reflect_pad_into_scratch(x)
    y1 = jnp.maximum(instance_norm(conv3x3(w1_ref)), 0.0)                 # (HW, C)

    # --- block 2: reflect-pad -> conv -> InstanceNorm -> residual add ---
    reflect_pad_into_scratch(y1.reshape(H, W, C))
    y2 = instance_norm(conv3x3(w2_ref))                                   # (HW, C)

    o_ref[0] = x + y2.reshape(H, W, C)


def resnet_block_forward_nhwc(x_nhwc, w1, b1, w2, b2):
    """x_nhwc: (N, H, W, C).  w*: (3, 3, C, C) in (kh, kw, Cin, Cout).  b*: (C,).

    NOTE: the NHWC f32 input buffer is donated to the output via
    input_output_aliases; the NCHW wrapper below always feeds an intermediate.
    b1/b2 are accepted for API parity but are mathematically dead (cancelled by
    the affine=False InstanceNorm) and are not passed to the kernel."""
    del b1, b2
    N, H, W, C = x_nhwc.shape
    x = x_nhwc.astype(jnp.float32)
    # (kh, kw, Cin, Cout) -> (kh, kw*Cin, Cout), bf16 for the MXU. Row order of
    # the flattened (kw, Cin) axis matches the dw-major channel packing of the
    # in-kernel tap staging tile.
    w1r = w1.reshape(3, 3 * C, C).astype(jnp.bfloat16)
    w2r = w2.reshape(3, 3 * C, C).astype(jnp.bfloat16)

    return pl.pallas_call(
        _fused_resblock_kernel,
        out_shape=jax.ShapeDtypeStruct((N, H, W, C), jnp.float32),
        grid=(N,),
        in_specs=[
            pl.BlockSpec((1, H, W, C), lambda n: (n, 0, 0, 0)),
            pl.BlockSpec((3, 3 * C, C), lambda n: (0, 0, 0)),
            pl.BlockSpec((3, 3 * C, C), lambda n: (0, 0, 0)),
        ],
        out_specs=pl.BlockSpec((1, H, W, C), lambda n: (n, 0, 0, 0)),
        scratch_shapes=[
            pltpu.VMEM((H + 2, W + 2, C), jnp.float32),    # reflect-pad buffer
            pltpu.VMEM((H, W, 3 * C), jnp.bfloat16),       # per-dh tap staging
        ],
        input_output_aliases={0: 0},   # residual input buffer reused as output
        compiler_params=pltpu.CompilerParams(
            dimension_semantics=("parallel",),
            # 48 MiB fits v7x's 64 MiB physical VMEM with headroom and is ample
            # for v5e/v6e (128 MiB physical).
            vmem_limit_bytes=48 * 1024 * 1024),
    )(x, w1r, w2r)


def resnet_block_forward(x_nchw, w1, b1, w2, b2):
    """NCHW wrapper matching the PyTorch module interface.  For production use,
    call resnet_block_forward_nhwc directly to avoid the two full-tensor
    transposes (pure layout glue outside the kernel)."""
    x = jnp.transpose(x_nchw, (0, 2, 3, 1))          # NHWC
    out = resnet_block_forward_nhwc(x, w1, b1, w2, b2)
    return jnp.transpose(out, (0, 3, 1, 2))          # back to NCHW


def _reference(x_nchw, w1, b1, w2, b2, conv_dtype=jnp.float32):
    """Pure-JAX NCHW reference.  conv_dtype=float32 reproduces the PyTorch
    forward exactly; conv_dtype=bfloat16 mimics the kernel's bf16 MXU inputs
    with f32 accumulation (for a tight numerical check)."""
    def conv3x3_reflect(x, w_khkwio, b):
        xp = jnp.pad(x, ((0, 0), (0, 0), (1, 1), (1, 1)), mode="reflect")
        w_oihw = jnp.transpose(w_khkwio, (3, 2, 0, 1))  # (Cout, Cin, kh, kw)
        y = lax.conv_general_dilated(
            xp.astype(conv_dtype), w_oihw.astype(conv_dtype),
            window_strides=(1, 1), padding="VALID",
            dimension_numbers=("NCHW", "OIHW", "NCHW"),
            preferred_element_type=jnp.float32,
            precision=lax.Precision.HIGHEST)
        return y + b[None, :, None, None]

    def inst_norm(x):
        mean = jnp.mean(x, axis=(2, 3), keepdims=True)
        var = jnp.mean((x - mean) ** 2, axis=(2, 3), keepdims=True)
        return (x - mean) * lax.rsqrt(var + EPS)

    y = jax.nn.relu(inst_norm(conv3x3_reflect(x_nchw, w1, b1)))
    y = inst_norm(conv3x3_reflect(y, w2, b2))
    return x_nchw + y


if __name__ == "__main__":
    key = jax.random.PRNGKey(0)
    N, C, H, W = 2, 4, 16, 16
    k = jax.random.split(key, 5)

    x = jax.random.normal(k[0], (N, C, H, W), jnp.float32)
    # Deterministic synthetic Conv2d parameters, stored as (kh, kw, Cin, Cout).
    w1 = jax.random.normal(k[1], (3, 3, C, C), jnp.float32) * 0.2
    b1 = jax.random.normal(k[2], (C,), jnp.float32) * 0.1
    w2 = jax.random.normal(k[3], (3, 3, C, C), jnp.float32) * 0.2
    b2 = jax.random.normal(k[4], (C,), jnp.float32) * 0.1

    out = jax.jit(resnet_block_forward)(x, w1, b1, w2, b2)
    out = jax.block_until_ready(out)
    assert out.shape == x.shape and out.dtype == jnp.float32

    # Tight check vs. a reference that uses the same bf16 MXU inputs.
    ref_bf16 = _reference(x, w1, b1, w2, b2, conv_dtype=jnp.bfloat16)
    err_bf16 = float(jnp.max(jnp.abs(out - ref_bf16)))
    assert err_bf16 < 1e-2, f"mismatch vs bf16-matched reference, max abs err = {err_bf16}"

    # Loose sanity check vs. the exact f32 PyTorch-equivalent forward (the gap
    # is the expected bf16 MXU-input rounding, amplified by two InstanceNorms).
    ref_f32 = _reference(x, w1, b1, w2, b2, conv_dtype=jnp.float32)
    err_f32 = float(jnp.max(jnp.abs(out - ref_f32)))
    assert err_f32 < 2e-1, f"mismatch vs f32 reference, max abs err = {err_f32}"

    print("KERNEL_OK")
</pallas_src>

<mosaic_0001>
module attributes {stable_mosaic.version = 11 : i64} {
  func.func @_fused_resblock_kernel(%arg0: i32, %arg1: memref<1x16x16x4xf32, #tpu.memory_space<vmem>>, %arg2: memref<3x12x4xbf16, #tpu.memory_space<vmem>>, %arg3: memref<3x12x4xbf16, #tpu.memory_space<vmem>>, %arg4: memref<1x16x16x4xf32, #tpu.memory_space<vmem>>, %arg5: memref<18x18x4xf32, #tpu.memory_space<vmem>>, %arg6: memref<16x16x12xbf16, #tpu.memory_space<vmem>>) attributes {dimension_semantics = [#tpu.dimension_semantics<parallel>], iteration_bounds = array<i64: 2>, scalar_prefetch = 0 : i64, scratch_operands = 2 : i64, tpu.core_type = #tpu.core_type<tc>, window_params = [{transform_indices = @transform_0, window_bounds = array<i64: 1, 16, 16, 4>}, {pipeline_mode = #tpu.pipeline_mode<synchronous>, transform_indices = @transform_1, window_bounds = array<i64: 3, 12, 4>}, {pipeline_mode = #tpu.pipeline_mode<synchronous>, transform_indices = @transform_2, window_bounds = array<i64: 3, 12, 4>}, {transform_indices = @transform_3, window_bounds = array<i64: 1, 16, 16, 4>}]} {
    %c0 = arith.constant 0 : index
    %c0_0 = arith.constant 0 : index
    %c0_1 = arith.constant 0 : index
    %c0_2 = arith.constant 0 : index
    %0 = vector.load %arg1[%c0, %c0_0, %c0_1, %c0_2] : memref<1x16x16x4xf32, #tpu.memory_space<vmem>>, vector<1x16x16x4xf32>
    %1 = vector.shape_cast %0 : vector<1x16x16x4xf32> to vector<16x16x4xf32>
    %c1 = arith.constant 1 : index
    %c1_3 = arith.constant 1 : index
    %c0_4 = arith.constant 0 : index
    %2 = vector.load %arg5[%c1, %c1_3, %c0_4] : memref<18x18x4xf32, #tpu.memory_space<vmem>>, vector<16x16x4xf32>
    tpu.vector_store %arg5[%c1, %c1_3, %c0_4], %1 {strides = array<i32>} : memref<18x18x4xf32, #tpu.memory_space<vmem>>, vector<16x16x4xf32>,
    %3 = vector.extract_strided_slice %1 {offsets = [1, 0, 0], sizes = [1, 16, 4], strides = [1, 1, 1]} : vector<16x16x4xf32> to vector<1x16x4xf32>
    %c0_5 = arith.constant 0 : index
    %c1_6 = arith.constant 1 : index
    %c0_7 = arith.constant 0 : index
    %4 = vector.load %arg5[%c0_5, %c1_6, %c0_7] : memref<18x18x4xf32, #tpu.memory_space<vmem>>, vector<1x16x4xf32>
    tpu.vector_store %arg5[%c0_5, %c1_6, %c0_7], %3 {strides = array<i32>} : memref<18x18x4xf32, #tpu.memory_space<vmem>>, vector<1x16x4xf32>,
    %5 = vector.extract_strided_slice %1 {offsets = [14, 0, 0], sizes = [1, 16, 4], strides = [1, 1, 1]} : vector<16x16x4xf32> to vector<1x16x4xf32>
    %c17 = arith.constant 17 : index
    %c1_8 = arith.constant 1 : index
    %c0_9 = arith.constant 0 : index
    %6 = vector.load %arg5[%c17, %c1_8, %c0_9] : memref<18x18x4xf32, #tpu.memory_space<vmem>>, vector<1x16x4xf32>
    tpu.vector_store %arg5[%c17, %c1_8, %c0_9], %5 {strides = array<i32>} : memref<18x18x4xf32, #tpu.memory_space<vmem>>, vector<1x16x4xf32>,
    %c0_10 = arith.constant 0 : index
    %c2 = arith.constant 2 : index
    %c0_11 = arith.constant 0 : index
    %7 = vector.load %arg5[%c0_10, %c2, %c0_11] : memref<18x18x4xf32, #tpu.memory_space<vmem>>, vector<18x1x4xf32>
    %c0_12 = arith.constant 0 : index
    %c0_13 = arith.constant 0 : index
    %c0_14 = arith.constant 0 : index
    %8 = vector.load %arg5[%c0_12, %c0_13, %c0_14] : memref<18x18x4xf32, #tpu.memory_space<vmem>>, vector<18x1x4xf32>
    tpu.vector_store %arg5[%c0_12, %c0_13, %c0_14], %7 {strides = array<i32>} : memref<18x18x4xf32, #tpu.memory_space<vmem>>, vector<18x1x4xf32>,
    %c0_15 = arith.constant 0 : index
    %c15 = arith.constant 15 : index
    %c0_16 = arith.constant 0 : index
    %9 = vector.load %arg5[%c0_15, %c15, %c0_16] : memref<18x18x4xf32, #tpu.memory_space<vmem>>, vector<18x1x4xf32>
    %c0_17 = arith.constant 0 : index
    %c17_18 = arith.constant 17 : index
    %c0_19 = arith.constant 0 : index
    %10 = vector.load %arg5[%c0_17, %c17_18, %c0_19] : memref<18x18x4xf32, #tpu.memory_space<vmem>>, vector<18x1x4xf32>
    tpu.vector_store %arg5[%c0_17, %c17_18, %c0_19], %9 {strides = array<i32>} : memref<18x18x4xf32, #tpu.memory_space<vmem>>, vector<18x1x4xf32>,
    %cst = arith.constant 0.000000e+00 : f32
    %11 = vector.broadcast %cst : f32 to vector<256x4xf32>
    %c0_20 = arith.constant 0 : index
    %c0_21 = arith.constant 0 : index
    %c0_22 = arith.constant 0 : index
    %12 = vector.load %arg5[%c0_20, %c0_21, %c0_22] : memref<18x18x4xf32, #tpu.memory_space<vmem>>, vector<16x16x4xf32>
    %13 = arith.truncf %12 : vector<16x16x4xf32> to vector<16x16x4xbf16>
    %c0_23 = arith.constant 0 : index
    %c0_24 = arith.constant 0 : index
    %c0_25 = arith.constant 0 : index
    %14 = vector.load %arg6[%c0_23, %c0_24, %c0_25] : memref<16x16x12xbf16, #tpu.memory_space<vmem>>, vector<16x16x4xbf16>
    tpu.vector_store %arg6[%c0_23, %c0_24, %c0_25], %13 {strides = array<i32>} : memref<16x16x12xbf16, #tpu.memory_space<vmem>>, vector<16x16x4xbf16>,
    %c0_26 = arith.constant 0 : index
    %c1_27 = arith.constant 1 : index
    %c0_28 = arith.constant 0 : index
    %15 = vector.load %arg5[%c0_26, %c1_27, %c0_28] : memref<18x18x4xf32, #tpu.memory_space<vmem>>, vector<16x16x4xf32>
    %16 = arith.truncf %15 : vector<16x16x4xf32> to vector<16x16x4xbf16>
    %c0_29 = arith.constant 0 : index
    %c0_30 = arith.constant 0 : index
    %c4 = arith.constant 4 : index
    %17 = vector.load %arg6[%c0_29, %c0_30, %c4] : memref<16x16x12xbf16, #tpu.memory_space<vmem>>, vector<16x16x4xbf16>
    tpu.vector_store %arg6[%c0_29, %c0_30, %c4], %16 {strides = array<i32>} : memref<16x16x12xbf16, #tpu.memory_space<vmem>>, vector<16x16x4xbf16>,
    %c0_31 = arith.constant 0 : index
    %c2_32 = arith.constant 2 : index
    %c0_33 = arith.constant 0 : index
    %18 = vector.load %arg5[%c0_31, %c2_32, %c0_33] : memref<18x18x4xf32, #tpu.memory_space<vmem>>, vector<16x16x4xf32>
    %19 = arith.truncf %18 : vector<16x16x4xf32> to vector<16x16x4xbf16>
    %c0_34 = arith.constant 0 : index
    %c0_35 = arith.constant 0 : index
    %c8 = arith.constant 8 : index
    %20 = vector.load %arg6[%c0_34, %c0_35, %c8] : memref<16x16x12xbf16, #tpu.memory_space<vmem>>, vector<16x16x4xbf16>
    tpu.vector_store %arg6[%c0_34, %c0_35, %c8], %19 {strides = array<i32>} : memref<16x16x12xbf16, #tpu.memory_space<vmem>>, vector<16x16x4xbf16>,
    %c0_36 = arith.constant 0 : index
    %c0_37 = arith.constant 0 : index
    %c0_38 = arith.constant 0 : index
    %21 = vector.load %arg6[%c0_36, %c0_37, %c0_38] : memref<16x16x12xbf16, #tpu.memory_space<vmem>>, vector<16x16x12xbf16>
    %22 = vector.shape_cast %21 : vector<16x16x12xbf16> to vector<256x12xbf16>
    %c0_39 = arith.constant 0 : index
    %c0_40 = arith.constant 0 : index
    %c0_41 = arith.constant 0 : index
    %23 = vector.load %arg2[%c0_39, %c0_40, %c0_41] : memref<3x12x4xbf16, #tpu.memory_space<vmem>>, vector<1x12x4xbf16>
    %24 = vector.shape_cast %23 : vector<1x12x4xbf16> to vector<12x4xbf16>
    %cst_42 = arith.constant dense<0.000000e+00> : vector<256x4xf32>
    %25 = tpu.matmul %22, %24, %cst_42 {dimension_numbers = #tpu.dot_dimension_numbers<[1], [0], [0], [1], [0, 0, 1, 1], [], []>} : vector<256x12xbf16>, vector<12x4xbf16>, vector<256x4xf32> -> vector<256x4xf32>
    %26 = arith.addf %11, %25 : vector<256x4xf32>
    %c1_43 = arith.constant 1 : index
    %c0_44 = arith.constant 0 : index
    %c0_45 = arith.constant 0 : index
    %27 = vector.load %arg5[%c1_43, %c0_44, %c0_45] : memref<18x18x4xf32, #tpu.memory_space<vmem>>, vector<16x16x4xf32>
    %28 = arith.truncf %27 : vector<16x16x4xf32> to vector<16x16x4xbf16>
    %c0_46 = arith.constant 0 : index
    %c0_47 = arith.constant 0 : index
    %c0_48 = arith.constant 0 : index
    %29 = vector.load %arg6[%c0_46, %c0_47, %c0_48] : memref<16x16x12xbf16, #tpu.memory_space<vmem>>, vector<16x16x4xbf16>
    tpu.vector_store %arg6[%c0_46, %c0_47, %c0_48], %28 {strides = array<i32>} : memref<16x16x12xbf16, #tpu.memory_space<vmem>>, vector<16x16x4xbf16>,
    %c1_49 = arith.constant 1 : index
    %c1_50 = arith.constant 1 : index
    %c0_51 = arith.constant 0 : index
    %30 = vector.load %arg5[%c1_49, %c1_50, %c0_51] : memref<18x18x4xf32, #tpu.memory_space<vmem>>, vector<16x16x4xf32>
    %31 = arith.truncf %30 : vector<16x16x4xf32> to vector<16x16x4xbf16>
    %c0_52 = arith.constant 0 : index
    %c0_53 = arith.constant 0 : index
    %c4_54 = arith.constant 4 : index
    %32 = vector.load %arg6[%c0_52, %c0_53, %c4_54] : memref<16x16x12xbf16, #tpu.memory_space<vmem>>, vector<16x16x4xbf16>
    tpu.vector_store %arg6[%c0_52, %c0_53, %c4_54], %31 {strides = array<i32>} : memref<16x16x12xbf16, #tpu.memory_space<vmem>>, vector<16x16x4xbf16>,
    %c1_55 = arith.constant 1 : index
    %c2_56 = arith.constant 2 : index
    %c0_57 = arith.constant 0 : index
    %33 = vector.load %arg5[%c1_55, %c2_56, %c0_57] : memref<18x18x4xf32, #tpu.memory_space<vmem>>, vector<16x16x4xf32>
    %34 = arith.truncf %33 : vector<16x16x4xf32> to vector<16x16x4xbf16>
    %c0_58 = arith.constant 0 : index
    %c0_59 = arith.constant 0 : index
    %c8_60 = arith.constant 8 : index
    %35 = vector.load %arg6[%c0_58, %c0_59, %c8_60] : memref<16x16x12xbf16, #tpu.memory_space<vmem>>, vector<16x16x4xbf16>
    tpu.vector_store %arg6[%c0_58, %c0_59, %c8_60], %34 {strides = array<i32>} : memref<16x16x12xbf16, #tpu.memory_space<vmem>>, vector<16x16x4xbf16>,
    %c0_61 = arith.constant 0 : index
    %c0_62 = arith.constant 0 : index
    %c0_63 = arith.constant 0 : index
    %36 = vector.load %arg6[%c0_61, %c0_62, %c0_63] : memref<16x16x12xbf16, #tpu.memory_space<vmem>>, vector<16x16x12xbf16>
    %37 = vector.shape_cast %36 : vector<16x16x12xbf16> to vector<256x12xbf16>
    %c1_64 = arith.constant 1 : index
    %c0_65 = arith.constant 0 : index
    %c0_66 = arith.constant 0 : index
    %38 = vector.load %arg2[%c1_64, %c0_65, %c0_66] : memref<3x12x4xbf16, #tpu.memory_space<vmem>>, vector<1x12x4xbf16>
    %39 = vector.shape_cast %38 : vector<1x12x4xbf16> to vector<12x4xbf16>
    %cst_67 = arith.constant dense<0.000000e+00> : vector<256x4xf32>
    %40 = tpu.matmul %37, %39, %cst_67 {dimension_numbers = #tpu.dot_dimension_numbers<[1], [0], [0], [1], [0, 0, 1, 1], [], []>} : vector<256x12xbf16>, vector<12x4xbf16>, vector<256x4xf32> -> vector<256x4xf32>
    %41 = arith.addf %26, %40 : vector<256x4xf32>
    %c2_68 = arith.constant 2 : index
    %c0_69 = arith.constant 0 : index
    %c0_70 = arith.constant 0 : index
    %42 = vector.load %arg5[%c2_68, %c0_69, %c0_70] : memref<18x18x4xf32, #tpu.memory_space<vmem>>, vector<16x16x4xf32>
    %43 = arith.truncf %42 : vector<16x16x4xf32> to vector<16x16x4xbf16>
    %c0_71 = arith.constant 0 : index
    %c0_72 = arith.constant 0 : index
    %c0_73 = arith.constant 0 : index
    %44 = vector.load %arg6[%c0_71, %c0_72, %c0_73] : memref<16x16x12xbf16, #tpu.memory_space<vmem>>, vector<16x16x4xbf16>
    tpu.vector_store %arg6[%c0_71, %c0_72, %c0_73], %43 {strides = array<i32>} : memref<16x16x12xbf16, #tpu.memory_space<vmem>>, vector<16x16x4xbf16>,
    %c2_74 = arith.constant 2 : index
    %c1_75 = arith.constant 1 : index
    %c0_76 = arith.constant 0 : index
    %45 = vector.load %arg5[%c2_74, %c1_75, %c0_76] : memref<18x18x4xf32, #tpu.memory_space<vmem>>, vector<16x16x4xf32>
    %46 = arith.truncf %45 : vector<16x16x4xf32> to vector<16x16x4xbf16>
    %c0_77 = arith.constant 0 : index
    %c0_78 = arith.constant 0 : index
    %c4_79 = arith.constant 4 : index
    %47 = vector.load %arg6[%c0_77, %c0_78, %c4_79] : memref<16x16x12xbf16, #tpu.memory_space<vmem>>, vector<16x16x4xbf16>
    tpu.vector_store %arg6[%c0_77, %c0_78, %c4_79], %46 {strides = array<i32>} : memref<16x16x12xbf16, #tpu.memory_space<vmem>>, vector<16x16x4xbf16>,
    %c2_80 = arith.constant 2 : index
    %c2_81 = arith.constant 2 : index
    %c0_82 = arith.constant 0 : index
    %48 = vector.load %arg5[%c2_80, %c2_81, %c0_82] : memref<18x18x4xf32, #tpu.memory_space<vmem>>, vector<16x16x4xf32>
    %49 = arith.truncf %48 : vector<16x16x4xf32> to vector<16x16x4xbf16>
    %c0_83 = arith.constant 0 : index
    %c0_84 = arith.constant 0 : index
    %c8_85 = arith.constant 8 : index
    %50 = vector.load %arg6[%c0_83, %c0_84, %c8_85] : memref<16x16x12xbf16, #tpu.memory_space<vmem>>, vector<16x16x4xbf16>
    tpu.vector_store %arg6[%c0_83, %c0_84, %c8_85], %49 {strides = array<i32>} : memref<16x16x12xbf16, #tpu.memory_space<vmem>>, vector<16x16x4xbf16>,
    %c0_86 = arith.constant 0 : index
    %c0_87 = arith.constant 0 : index
    %c0_88 = arith.constant 0 : index
    %51 = vector.load %arg6[%c0_86, %c0_87, %c0_88] : memref<16x16x12xbf16, #tpu.memory_space<vmem>>, vector<16x16x12xbf16>
    %52 = vector.shape_cast %51 : vector<16x16x12xbf16> to vector<256x12xbf16>
    %c2_89 = arith.constant 2 : index
    %c0_90 = arith.constant 0 : index
    %c0_91 = arith.constant 0 : index
    %53 = vector.load %arg2[%c2_89, %c0_90, %c0_91] : memref<3x12x4xbf16, #tpu.memory_space<vmem>>, vector<1x12x4xbf16>
    %54 = vector.shape_cast %53 : vector<1x12x4xbf16> to vector<12x4xbf16>
    %cst_92 = arith.constant dense<0.000000e+00> : vector<256x4xf32>
    %55 = tpu.matmul %52, %54, %cst_92 {dimension_numbers = #tpu.dot_dimension_numbers<[1], [0], [0], [1], [0, 0, 1, 1], [], []>} : vector<256x12xbf16>, vector<12x4xbf16>, vector<256x4xf32> -> vector<256x4xf32>
    %56 = arith.addf %41, %55 : vector<256x4xf32>
    %cst_93 = arith.constant dense<0.000000e+00> : vector<4xf32>
    %57 = vector.multi_reduction <add>, %56, %cst_93 [0] : vector<256x4xf32> to vector<4xf32>
    %58 = vector.shape_cast %57 : vector<4xf32> to vector<1x4xf32>
    %cst_94 = arith.constant 2.560000e+02 : f32
    %59 = vector.broadcast %cst_94 : f32 to vector<1x4xf32>
    %60 = arith.divf %58, %59 : vector<1x4xf32>
    %61 = arith.mulf %56, %56 : vector<256x4xf32>
    %cst_95 = arith.constant dense<0.000000e+00> : vector<4xf32>
    %62 = vector.multi_reduction <add>, %61, %cst_95 [0] : vector<256x4xf32> to vector<4xf32>
    %63 = vector.shape_cast %62 : vector<4xf32> to vector<1x4xf32>
    %cst_96 = arith.constant 2.560000e+02 : f32
    %64 = vector.broadcast %cst_96 : f32 to vector<1x4xf32>
    %65 = arith.divf %63, %64 : vector<1x4xf32>
    %66 = arith.mulf %60, %60 : vector<1x4xf32>
    %67 = arith.subf %65, %66 : vector<1x4xf32>
    %cst_97 = arith.constant 0.000000e+00 : f32
    %68 = vector.broadcast %cst_97 : f32 to vector<1x4xf32>
    %69 = arith.maximumf %67, %68 : vector<1x4xf32>
    %70 = vector.broadcast %60 : vector<1x4xf32> to vector<256x4xf32>
    %71 = arith.subf %56, %70 : vector<256x4xf32>
    %cst_98 = arith.constant 9.99999974E-6 : f32
    %72 = vector.broadcast %cst_98 : f32 to vector<1x4xf32>
    %73 = arith.addf %69, %72 : vector<1x4xf32>
    %74 = math.rsqrt %73 : vector<1x4xf32>
    %75 = vector.broadcast %74 : vector<1x4xf32> to vector<256x4xf32>
    %76 = arith.mulf %71, %75 : vector<256x4xf32>
    %cst_99 = arith.constant 0.000000e+00 : f32
    %77 = vector.broadcast %cst_99 : f32 to vector<256x4xf32>
    %78 = arith.maximumf %76, %77 : vector<256x4xf32>
    %79 = vector.shape_cast %78 : vector<256x4xf32> to vector<16x16x4xf32>
    %c1_100 = arith.constant 1 : index
    %c1_101 = arith.constant 1 : index
    %c0_102 = arith.constant 0 : index
    %80 = vector.load %arg5[%c1_100, %c1_101, %c0_102] : memref<18x18x4xf32, #tpu.memory_space<vmem>>, vector<16x16x4xf32>
    tpu.vector_store %arg5[%c1_100, %c1_101, %c0_102], %79 {strides = array<i32>} : memref<18x18x4xf32, #tpu.memory_space<vmem>>, vector<16x16x4xf32>,
    %81 = vector.extract_strided_slice %79 {offsets = [1, 0, 0], sizes = [1, 16, 4], strides = [1, 1, 1]} : vector<16x16x4xf32> to vector<1x16x4xf32>
    %c0_103 = arith.constant 0 : index
    %c1_104 = arith.constant 1 : index
    %c0_105 = arith.constant 0 : index
    %82 = vector.load %arg5[%c0_103, %c1_104, %c0_105] : memref<18x18x4xf32, #tpu.memory_space<vmem>>, vector<1x16x4xf32>
    tpu.vector_store %arg5[%c0_103, %c1_104, %c0_105], %81 {strides = array<i32>} : memref<18x18x4xf32, #tpu.memory_space<vmem>>, vector<1x16x4xf32>,
    %83 = vector.extract_strided_slice %79 {offsets = [14, 0, 0], sizes = [1, 16, 4], strides = [1, 1, 1]} : vector<16x16x4xf32> to vector<1x16x4xf32>
    %c17_106 = arith.constant 17 : index
    %c1_107 = arith.constant 1 : index
    %c0_108 = arith.constant 0 : index
    %84 = vector.load %arg5[%c17_106, %c1_107, %c0_108] : memref<18x18x4xf32, #tpu.memory_space<vmem>>, vector<1x16x4xf32>
    tpu.vector_store %arg5[%c17_106, %c1_107, %c0_108], %83 {strides = array<i32>} : memref<18x18x4xf32, #tpu.memory_space<vmem>>, vector<1x16x4xf32>,
    %c0_109 = arith.constant 0 : index
    %c2_110 = arith.constant 2 : index
    %c0_111 = arith.constant 0 : index
    %85 = vector.load %arg5[%c0_109, %c2_110, %c0_111] : memref<18x18x4xf32, #tpu.memory_space<vmem>>, vector<18x1x4xf32>
    %c0_112 = arith.constant 0 : index
    %c0_113 = arith.constant 0 : index
    %c0_114 = arith.constant 0 : index
    %86 = vector.load %arg5[%c0_112, %c0_113, %c0_114] : memref<18x18x4xf32, #tpu.memory_space<vmem>>, vector<18x1x4xf32>
    tpu.vector_store %arg5[%c0_112, %c0_113, %c0_114], %85 {strides = array<i32>} : memref<18x18x4xf32, #tpu.memory_space<vmem>>, vector<18x1x4xf32>,
    %c0_115 = arith.constant 0 : index
    %c15_116 = arith.constant 15 : index
    %c0_117 = arith.constant 0 : index
    %87 = vector.load %arg5[%c0_115, %c15_116, %c0_117] : memref<18x18x4xf32, #tpu.memory_space<vmem>>, vector<18x1x4xf32>
    %c0_118 = arith.constant 0 : index
    %c17_119 = arith.constant 17 : index
    %c0_120 = arith.constant 0 : index
    %88 = vector.load %arg5[%c0_118, %c17_119, %c0_120] : memref<18x18x4xf32, #tpu.memory_space<vmem>>, vector<18x1x4xf32>
    tpu.vector_store %arg5[%c0_118, %c17_119, %c0_120], %87 {strides = array<i32>} : memref<18x18x4xf32, #tpu.memory_space<vmem>>, vector<18x1x4xf32>,
    %cst_121 = arith.constant 0.000000e+00 : f32
    %89 = vector.broadcast %cst_121 : f32 to vector<256x4xf32>
    %c0_122 = arith.constant 0 : index
    %c0_123 = arith.constant 0 : index
    %c0_124 = arith.constant 0 : index
    %90 = vector.load %arg5[%c0_122, %c0_123, %c0_124] : memref<18x18x4xf32, #tpu.memory_space<vmem>>, vector<16x16x4xf32>
    %91 = arith.truncf %90 : vector<16x16x4xf32> to vector<16x16x4xbf16>
    %c0_125 = arith.constant 0 : index
    %c0_126 = arith.constant 0 : index
    %c0_127 = arith.constant 0 : index
    %92 = vector.load %arg6[%c0_125, %c0_126, %c0_127] : memref<16x16x12xbf16, #tpu.memory_space<vmem>>, vector<16x16x4xbf16>
    tpu.vector_store %arg6[%c0_125, %c0_126, %c0_127], %91 {strides = array<i32>} : memref<16x16x12xbf16, #tpu.memory_space<vmem>>, vector<16x16x4xbf16>,
    %c0_128 = arith.constant 0 : index
    %c1_129 = arith.constant 1 : index
    %c0_130 = arith.constant 0 : index
    %93 = vector.load %arg5[%c0_128, %c1_129, %c0_130] : memref<18x18x4xf32, #tpu.memory_space<vmem>>, vector<16x16x4xf32>
    %94 = arith.truncf %93 : vector<16x16x4xf32> to vector<16x16x4xbf16>
    %c0_131 = arith.constant 0 : index
    %c0_132 = arith.constant 0 : index
    %c4_133 = arith.constant 4 : index
    %95 = vector.load %arg6[%c0_131, %c0_132, %c4_133] : memref<16x16x12xbf16, #tpu.memory_space<vmem>>, vector<16x16x4xbf16>
    tpu.vector_store %arg6[%c0_131, %c0_132, %c4_133], %94 {strides = array<i32>} : memref<16x16x12xbf16, #tpu.memory_space<vmem>>, vector<16x16x4xbf16>,
    %c0_134 = arith.constant 0 : index
    %c2_135 = arith.constant 2 : index
    %c0_136 = arith.constant 0 : index
    %96 = vector.load %arg5[%c0_134, %c2_135, %c0_136] : memref<18x18x4xf32, #tpu.memory_space<vmem>>, vector<16x16x4xf32>
    %97 = arith.truncf %96 : vector<16x16x4xf32> to vector<16x16x4xbf16>
    %c0_137 = arith.constant 0 : index
    %c0_138 = arith.constant 0 : index
    %c8_139 = arith.constant 8 : index
    %98 = vector.load %arg6[%c0_137, %c0_138, %c8_139] : memref<16x16x12xbf16, #tpu.memory_space<vmem>>, vector<16x16x4xbf16>
    tpu.vector_store %arg6[%c0_137, %c0_138, %c8_139], %97 {strides = array<i32>} : memref<16x16x12xbf16, #tpu.memory_space<vmem>>, vector<16x16x4xbf16>,
    %c0_140 = arith.constant 0 : index
    %c0_141 = arith.constant 0 : index
    %c0_142 = arith.constant 0 : index
    %99 = vector.load %arg6[%c0_140, %c0_141, %c0_142] : memref<16x16x12xbf16, #tpu.memory_space<vmem>>, vector<16x16x12xbf16>
    %100 = vector.shape_cast %99 : vector<16x16x12xbf16> to vector<256x12xbf16>
    %c0_143 = arith.constant 0 : index
    %c0_144 = arith.constant 0 : index
    %c0_145 = arith.constant 0 : index
    %101 = vector.load %arg3[%c0_143, %c0_144, %c0_145] : memref<3x12x4xbf16, #tpu.memory_space<vmem>>, vector<1x12x4xbf16>
    %102 = vector.shape_cast %101 : vector<1x12x4xbf16> to vector<12x4xbf16>
    %cst_146 = arith.constant dense<0.000000e+00> : vector<256x4xf32>
    %103 = tpu.matmul %100, %102, %cst_146 {dimension_numbers = #tpu.dot_dimension_numbers<[1], [0], [0], [1], [0, 0, 1, 1], [], []>} : vector<256x12xbf16>, vector<12x4xbf16>, vector<256x4xf32> -> vector<256x4xf32>
    %104 = arith.addf %89, %103 : vector<256x4xf32>
    %c1_147 = arith.constant 1 : index
    %c0_148 = arith.constant 0 : index
    %c0_149 = arith.constant 0 : index
    %105 = vector.load %arg5[%c1_147, %c0_148, %c0_149] : memref<18x18x4xf32, #tpu.memory_space<vmem>>, vector<16x16x4xf32>
    %106 = arith.truncf %105 : vector<16x16x4xf32> to vector<16x16x4xbf16>
    %c0_150 = arith.constant 0 : index
    %c0_151 = arith.constant 0 : index
    %c0_152 = arith.constant 0 : index
    %107 = vector.load %arg6[%c0_150, %c0_151, %c0_152] : memref<16x16x12xbf16, #tpu.memory_space<vmem>>, vector<16x16x4xbf16>
    tpu.vector_store %arg6[%c0_150, %c0_151, %c0_152], %106 {strides = array<i32>} : memref<16x16x12xbf16, #tpu.memory_space<vmem>>, vector<16x16x4xbf16>,
    %c1_153 = arith.constant 1 : index
    %c1_154 = arith.constant 1 : index
    %c0_155 = arith.constant 0 : index
    %108 = vector.load %arg5[%c1_153, %c1_154, %c0_155] : memref<18x18x4xf32, #tpu.memory_space<vmem>>, vector<16x16x4xf32>
    %109 = arith.truncf %108 : vector<16x16x4xf32> to vector<16x16x4xbf16>
    %c0_156 = arith.constant 0 : index
    %c0_157 = arith.constant 0 : index
    %c4_158 = arith.constant 4 : index
    %110 = vector.load %arg6[%c0_156, %c0_157, %c4_158] : memref<16x16x12xbf16, #tpu.memory_space<vmem>>, vector<16x16x4xbf16>
    tpu.vector_store %arg6[%c0_156, %c0_157, %c4_158], %109 {strides = array<i32>} : memref<16x16x12xbf16, #tpu.memory_space<vmem>>, vector<16x16x4xbf16>,
    %c1_159 = arith.constant 1 : index
    %c2_160 = arith.constant 2 : index
    %c0_161 = arith.constant 0 : index
    %111 = vector.load %arg5[%c1_159, %c2_160, %c0_161] : memref<18x18x4xf32, #tpu.memory_space<vmem>>, vector<16x16x4xf32>
    %112 = arith.truncf %111 : vector<16x16x4xf32> to vector<16x16x4xbf16>
    %c0_162 = arith.constant 0 : index
    %c0_163 = arith.constant 0 : index
    %c8_164 = arith.constant 8 : index
    %113 = vector.load %arg6[%c0_162, %c0_163, %c8_164] : memref<16x16x12xbf16, #tpu.memory_space<vmem>>, vector<16x16x4xbf16>
    tpu.vector_store %arg6[%c0_162, %c0_163, %c8_164], %112 {strides = array<i32>} : memref<16x16x12xbf16, #tpu.memory_space<vmem>>, vector<16x16x4xbf16>,
    %c0_165 = arith.constant 0 : index
    %c0_166 = arith.constant 0 : index
    %c0_167 = arith.constant 0 : index
    %114 = vector.load %arg6[%c0_165, %c0_166, %c0_167] : memref<16x16x12xbf16, #tpu.memory_space<vmem>>, vector<16x16x12xbf16>
    %115 = vector.shape_cast %114 : vector<16x16x12xbf16> to vector<256x12xbf16>
    %c1_168 = arith.constant 1 : index
    %c0_169 = arith.constant 0 : index
    %c0_170 = arith.constant 0 : index
    %116 = vector.load %arg3[%c1_168, %c0_169, %c0_170] : memref<3x12x4xbf16, #tpu.memory_space<vmem>>, vector<1x12x4xbf16>
    %117 = vector.shape_cast %116 : vector<1x12x4xbf16> to vector<12x4xbf16>
    %cst_171 = arith.constant dense<0.000000e+00> : vector<256x4xf32>
    %118 = tpu.matmul %115, %117, %cst_171 {dimension_numbers = #tpu.dot_dimension_numbers<[1], [0], [0], [1], [0, 0, 1, 1], [], []>} : vector<256x12xbf16>, vector<12x4xbf16>, vector<256x4xf32> -> vector<256x4xf32>
    %119 = arith.addf %104, %118 : vector<256x4xf32>
    %c2_172 = arith.constant 2 : index
    %c0_173 = arith.constant 0 : index
    %c0_174 = arith.constant 0 : index
    %120 = vector.load %arg5[%c2_172, %c0_173, %c0_174] : memref<18x18x4xf32, #tpu.memory_space<vmem>>, vector<16x16x4xf32>
    %121 = arith.truncf %120 : vector<16x16x4xf32> to vector<16x16x4xbf16>
    %c0_175 = arith.constant 0 : index
    %c0_176 = arith.constant 0 : index
    %c0_177 = arith.constant 0 : index
    %122 = vector.load %arg6[%c0_175, %c0_176, %c0_177] : memref<16x16x12xbf16, #tpu.memory_space<vmem>>, vector<16x16x4xbf16>
    tpu.vector_store %arg6[%c0_175, %c0_176, %c0_177], %121 {strides = array<i32>} : memref<16x16x12xbf16, #tpu.memory_space<vmem>>, vector<16x16x4xbf16>,
    %c2_178 = arith.constant 2 : index
    %c1_179 = arith.constant 1 : index
    %c0_180 = arith.constant 0 : index
    %123 = vector.load %arg5[%c2_178, %c1_179, %c0_180] : memref<18x18x4xf32, #tpu.memory_space<vmem>>, vector<16x16x4xf32>
    %124 = arith.truncf %123 : vector<16x16x4xf32> to vector<16x16x4xbf16>
    %c0_181 = arith.constant 0 : index
    %c0_182 = arith.constant 0 : index
    %c4_183 = arith.constant 4 : index
    %125 = vector.load %arg6[%c0_181, %c0_182, %c4_183] : memref<16x16x12xbf16, #tpu.memory_space<vmem>>, vector<16x16x4xbf16>
    tpu.vector_store %arg6[%c0_181, %c0_182, %c4_183], %124 {strides = array<i32>} : memref<16x16x12xbf16, #tpu.memory_space<vmem>>, vector<16x16x4xbf16>,
    %c2_184 = arith.constant 2 : index
    %c2_185 = arith.constant 2 : index
    %c0_186 = arith.constant 0 : index
    %126 = vector.load %arg5[%c2_184, %c2_185, %c0_186] : memref<18x18x4xf32, #tpu.memory_space<vmem>>, vector<16x16x4xf32>
    %127 = arith.truncf %126 : vector<16x16x4xf32> to vector<16x16x4xbf16>
    %c0_187 = arith.constant 0 : index
    %c0_188 = arith.constant 0 : index
    %c8_189 = arith.constant 8 : index
    %128 = vector.load %arg6[%c0_187, %c0_188, %c8_189] : memref<16x16x12xbf16, #tpu.memory_space<vmem>>, vector<16x16x4xbf16>
    tpu.vector_store %arg6[%c0_187, %c0_188, %c8_189], %127 {strides = array<i32>} : memref<16x16x12xbf16, #tpu.memory_space<vmem>>, vector<16x16x4xbf16>,
    %c0_190 = arith.constant 0 : index
    %c0_191 = arith.constant 0 : index
    %c0_192 = arith.constant 0 : index
    %129 = vector.load %arg6[%c0_190, %c0_191, %c0_192] : memref<16x16x12xbf16, #tpu.memory_space<vmem>>, vector<16x16x12xbf16>
    %130 = vector.shape_cast %129 : vector<16x16x12xbf16> to vector<256x12xbf16>
    %c2_193 = arith.constant 2 : index
    %c0_194 = arith.constant 0 : index
    %c0_195 = arith.constant 0 : index
    %131 = vector.load %arg3[%c2_193, %c0_194, %c0_195] : memref<3x12x4xbf16, #tpu.memory_space<vmem>>, vector<1x12x4xbf16>
    %132 = vector.shape_cast %131 : vector<1x12x4xbf16> to vector<12x4xbf16>
    %cst_196 = arith.constant dense<0.000000e+00> : vector<256x4xf32>
    %133 = tpu.matmul %130, %132, %cst_196 {dimension_numbers = #tpu.dot_dimension_numbers<[1], [0], [0], [1], [0, 0, 1, 1], [], []>} : vector<256x12xbf16>, vector<12x4xbf16>, vector<256x4xf32> -> vector<256x4xf32>
    %134 = arith.addf %119, %133 : vector<256x4xf32>
    %cst_197 = arith.constant dense<0.000000e+00> : vector<4xf32>
    %135 = vector.multi_reduction <add>, %134, %cst_197 [0] : vector<256x4xf32> to vector<4xf32>
    %136 = vector.shape_cast %135 : vector<4xf32> to vector<1x4xf32>
    %cst_198 = arith.constant 2.560000e+02 : f32
    %137 = vector.broadcast %cst_198 : f32 to vector<1x4xf32>
    %138 = arith.divf %136, %137 : vector<1x4xf32>
    %139 = arith.mulf %134, %134 : vector<256x4xf32>
    %cst_199 = arith.constant dense<0.000000e+00> : vector<4xf32>
    %140 = vector.multi_reduction <add>, %139, %cst_199 [0] : vector<256x4xf32> to vector<4xf32>
    %141 = vector.shape_cast %140 : vector<4xf32> to vector<1x4xf32>
    %cst_200 = arith.constant 2.560000e+02 : f32
    %142 = vector.broadcast %cst_200 : f32 to vector<1x4xf32>
    %143 = arith.divf %141, %142 : vector<1x4xf32>
    %144 = arith.mulf %138, %138 : vector<1x4xf32>
    %145 = arith.subf %143, %144 : vector<1x4xf32>
    %cst_201 = arith.constant 0.000000e+00 : f32
    %146 = vector.broadcast %cst_201 : f32 to vector<1x4xf32>
    %147 = arith.maximumf %145, %146 : vector<1x4xf32>
    %148 = vector.broadcast %138 : vector<1x4xf32> to vector<256x4xf32>
    %149 = arith.subf %134, %148 : vector<256x4xf32>
    %cst_202 = arith.constant 9.99999974E-6 : f32
    %150 = vector.broadcast %cst_202 : f32 to vector<1x4xf32>
    %151 = arith.addf %147, %150 : vector<1x4xf32>
    %152 = math.rsqrt %151 : vector<1x4xf32>
    %153 = vector.broadcast %152 : vector<1x4xf32> to vector<256x4xf32>
    %154 = arith.mulf %149, %153 : vector<256x4xf32>
    %155 = vector.shape_cast %154 : vector<256x4xf32> to vector<16x16x4xf32>
    %156 = arith.addf %1, %155 : vector<16x16x4xf32>
    %c0_203 = arith.constant 0 : index
    %c0_204 = arith.constant 0 : index
    %c0_205 = arith.constant 0 : index
    %c0_206 = arith.constant 0 : index
    %157 = vector.load %arg4[%c0_203, %c0_204, %c0_205, %c0_206] : memref<1x16x16x4xf32, #tpu.memory_space<vmem>>, vector<1x16x16x4xf32>
    %158 = vector.shape_cast %157 : vector<1x16x16x4xf32> to vector<16x16x4xf32>
    %159 = vector.shape_cast %156 : vector<16x16x4xf32> to vector<1x16x16x4xf32>
    tpu.vector_store %arg4[%c0_203, %c0_204, %c0_205, %c0_206], %159 {strides = array<i32>} : memref<1x16x16x4xf32, #tpu.memory_space<vmem>>, vector<1x16x16x4xf32>,
    return
  }
  func.func @transform_0(%arg0: i32) -> (i32, i32, i32, i32) {
    %c0_i32 = arith.constant 0 : i32
    %c0_i32_0 = arith.constant 0 : i32
    %c0_i32_1 = arith.constant 0 : i32
    %c0_i32_2 = arith.constant 0 : i32
    return %arg0, %c0_i32, %c0_i32_0, %c0_i32_1 : i32, i32, i32, i32
  }
  func.func @transform_1(%arg0: i32) -> (i32, i32, i32) {
    %c0_i32 = arith.constant 0 : i32
    %c0_i32_0 = arith.constant 0 : i32
    %c0_i32_1 = arith.constant 0 : i32
    %c0_i32_2 = arith.constant 0 : i32
    return %c0_i32, %c0_i32_0, %c0_i32_1 : i32, i32, i32
  }
  func.func @transform_2(%arg0: i32) -> (i32, i32, i32) {
    %c0_i32 = arith.constant 0 : i32
    %c0_i32_0 = arith.constant 0 : i32
    %c0_i32_1 = arith.constant 0 : i32
    %c0_i32_2 = arith.constant 0 : i32
    return %c0_i32, %c0_i32_0, %c0_i32_1 : i32, i32, i32
  }
  func.func @transform_3(%arg0: i32) -> (i32, i32, i32, i32) {
    %c0_i32 = arith.constant 0 : i32
    %c0_i32_0 = arith.constant 0 : i32
    %c0_i32_1 = arith.constant 0 : i32
    %c0_i32_2 = arith.constant 0 : i32
    return %arg0, %c0_i32, %c0_i32_0, %c0_i32_1 : i32, i32, i32, i32
  }
}

</mosaic_0001>

<bundles_post_ra>
// kernel: resnet_block_forward.1
= control target key start
LH: loop header
LB: loop body
LE: loop exit
PB: predicated region body
PF: predicated region fallthrough
CT: control target
= control target key end

     0   :  { %s5074_s12 = smov 0   ;;  %s7219_s0 = inlined_call_operand.vmem [shape: f32[2,16,16,4], index: 0, kind: input, shape index: {}, may-alias: {0,3}]   ;;  %s7220_s1 = inlined_call_operand.vmem [shape: bf16[3,12,4], index: 1, kind: input, shape index: {}]   ;;  %s7221_s2 = inlined_call_operand.vmem [shape: bf16[3,12,4], index: 2, kind: input, shape index: {}]   ;;  %s7222_s3 = inlined_call_operand.vmem [shape: f32[2,16,16,4], index: 3, kind: output, shape index: {}, may-alias: {0,3}]  }
   0x1 LB: > { %s4461_s13 = sadd.s32 4294967295, %s5050_s12   ;;  %p4465_p0 = scmp.ge.s32.totalorder %s5050_s12, 1  ;;  %s5050_s12 = sphi %s5074_s12, %s13_s12  }
   0x2   : > { %p137_p1 = scmp.lt.s32.totalorder %s5050_s12, 3 }
   0x4   : > { %p138_p2 = pnand %p4465_p0, %p137_p1 }
   0x6   : > { %141 = sbr.rel (%p138_p2) target bundleno = 1351 (0x547), region = 32 }
   0xd   : > { %p161_p3 = scmp.lt.s32.totalorder %s4461_s13, 1  ;;  %vm205_vm0 = vcmask 31744   ;;  %vm261_vm1 = vcmask 24576   ;;  %s5052_s18 = smov 4   ;;  %vm1049_vm2 = vcmask 1045504   ;;  %vm492_vm3 = vcmask 64544  }
   0xe   : > { %s5053_s19 = smov 8   ;;  %vm621_vm4 = vcmask 97344   ;;  %vm1000_vm5 = vcmask 97280  }
   0xf   : > { %s7293_s13 = smov (!%p161_p3, %s4461_s13), 1 }
  0x10   : > { %s4582_s14 = sshll.u32 %s7293_s13, 8 }
  0x11   : > { %s5090_s17 = scalar_lea.vmem %s7219_s0, %s4582_s14  ;;  %s7118_s7 = scalar_lea.vmem %s7222_s3, %s4582_s14 }
  0x12   : > { %v5093_v0 = vld [vmem:[%s5090_s17 + $0x20] sm:$0xff]  ;;  %v5096_v1 = vld [vmem:[%s5090_s17 + $0x28] sm:$0xff]  ;;  %v5099_v2 = vld [vmem:[%s5090_s17 + $0x10] sm:$0xff] }
  0x13   : > { %210 = vst.msk [vmem:[#allocation2 + $0x49] sm:$0xff] %vm205_vm0, %v5093_v0  ;;  %211 = vst.msk [vmem:[#allocation2 + $0x51] sm:$0xff] %vm205_vm0, %v5096_v1  ;;  %v5106_v3 = vld [vmem:[%s5090_s17 + $0x18] sm:$0xff]  ;;  %v5113_v4 = vld [vmem:[%s5090_s17] sm:$0xff] }
  0x14   : > { %238 = vst.msk [vmem:[#allocation2 + $0x1] sm:$0xff] %vm205_vm0, %v5099_v2  ;;  %208 = vst.msk [vmem:[#allocation2 + $0x31] sm:$0xff] %vm205_vm0, %v5099_v2  ;;  %v5116_v5 = vld [vmem:[%s5090_s17 + $0x8] sm:$0xff]  ;;  %v5127_v6 = vld [vmem:[%s5090_s17 + $0x40] sm:$0xff] }
  0x15   : > { %239 = vst.msk [vmem:[#allocation2 + $0x9] sm:$0xff] %vm205_vm0, %v5106_v3  ;;  %209 = vst.msk [vmem:[#allocation2 + $0x39] sm:$0xff] %vm205_vm0, %v5106_v3  ;;  %v5130_v7 = vld [vmem:[%s5090_s17 + $0x48] sm:$0xff]  ;;  %v5133_v8 = vld [vmem:[%s5090_s17 + $0x30] sm:$0xff] }
  0x16   : > { %206 = vst.msk [vmem:[#allocation2 + $0x19] sm:$0xff] %vm205_vm0, %v5113_v4  ;;  %207 = vst.msk [vmem:[#allocation2 + $0x21] sm:$0xff] %vm205_vm0, %v5116_v5  ;;  %v5140_v9 = vld [vmem:[%s5090_s17 + $0x38] sm:$0xff]  ;;  %v5145_v10 = vld [vmem:[%s5090_s17 + $0x50] sm:$0xff] }
  0x17   : > { %7246 = vst [vmem:[#allocation4_spill] sm:$0xff] %v5130_v7  ;;  %214 = vst.msk [vmem:[#allocation2 + $0x79] sm:$0xff] %vm205_vm0, %v5127_v6  ;;  %v5148_v11 = vld [vmem:[%s5090_s17 + $0x58] sm:$0xff]  ;;  %v5157_v12 = vld [vmem:[%s5090_s17 + $0x60] sm:$0xff] }
  0x18   : > { %215 = vst.msk [vmem:[#allocation2 + $0x81] sm:$0xff] %vm205_vm0, %v5130_v7  ;;  %212 = vst.msk [vmem:[#allocation2 + $0x61] sm:$0xff] %vm205_vm0, %v5133_v8  ;;  %v5160_v13 = vld [vmem:[%s5090_s17 + $0x68] sm:$0xff]  ;;  %v5163_v14 = vld [vmem:[%s5090_s17 + $0x70] sm:$0xff] }
  0x19   : > { %7247 = vst [vmem:[#allocation5_spill] sm:$0xff] %v5145_v10  ;;  %7248 = vst [vmem:[#allocation6_spill] sm:$0xff] %v5148_v11  ;;  %v5170_v15 = vld [vmem:[%s5090_s17 + $0x78] sm:$0xff]  ;;  %v5175_v16 = vld [vmem:[%s5090_s17 + $0x80] sm:$0xff] }
  0x1a   : > { %213 = vst.msk [vmem:[#allocation2 + $0x69] sm:$0xff] %vm205_vm0, %v5140_v9  ;;  %216 = vst.msk [vmem:[#allocation2 + $0x91] sm:$0xff] %vm205_vm0, %v5145_v10  ;;  %v5178_v17 = vld [vmem:[%s5090_s17 + $0x88] sm:$0xff]  ;;  %v5187_v18 = vld [vmem:[%s5090_s17 + $0x90] sm:$0xff] }
  0x1b   : > { %217 = vst.msk [vmem:[#allocation2 + $0x99] sm:$0xff] %vm205_vm0, %v5148_v11  ;;  %7249 = vst [vmem:[#allocation7_spill] sm:$0xff] %v5157_v12  ;;  %v5190_v19 = vld [vmem:[%s5090_s17 + $0x98] sm:$0xff]  ;;  %v5193_v20 = vld [vmem:[%s5090_s17 + $0xa0] sm:$0xff] }
  0x1c   : > { %7250 = vst [vmem:[#allocation8_spill] sm:$0xff] %v5160_v13  ;;  %7251 = vst [vmem:[#allocation9_spill] sm:$0xff] %v5163_v14  ;;  %v5200_v21 = vld [vmem:[%s5090_s17 + $0xa8] sm:$0xff]  ;;  %v5205_v22 = vld [vmem:[%s5090_s17 + $0xb0] sm:$0xff] }
  0x1d   : > { %218 = vst.msk [vmem:[#allocation2 + $0xa9] sm:$0xff] %vm205_vm0, %v5157_v12  ;;  %219 = vst.msk [vmem:[#allocation2 + $0xb1] sm:$0xff] %vm205_vm0, %v5160_v13  ;;  %v5208_v23 = vld [vmem:[%s5090_s17 + $0xb8] sm:$0xff]  ;;  %v386_v24 = vld [vmem:[#allocation2 + $0x49] sm:$0xff] }
  0x1e   : > { %7252 = vst [vmem:[#allocation10_spill] sm:$0xff] %v5170_v15  ;;  %220 = vst.msk [vmem:[#allocation2 + $0xc1] sm:$0xff] %vm205_vm0, %v5163_v14  ;;  %v387_v25 = vld [vmem:[#allocation2 + $0x51] sm:$0xff]  ;;  %v380_v26 = vld [vmem:[#allocation2 + $0x1] sm:$0xff] }
  0x1f   : > { %7253 = vst [vmem:[#allocation11_spill] sm:$0xff] %v5175_v16  ;;  %7254 = vst [vmem:[#allocation12_spill] sm:$0xff] %v5178_v17  ;;  %v5216_v27 = vpack.c.bf16 %v387_v25, %v386_v24  ;;  %v381_v28 = vld [vmem:[#allocation2 + $0x9] sm:$0xff]  ;;  %v722_v29 = vld [vmem:[#allocation2 + $0x31] sm:$0xff] }
  0x20   : > { %221 = vst.msk [vmem:[#allocation2 + $0xc9] sm:$0xff] %vm205_vm0, %v5170_v15  ;;  %222 = vst.msk [vmem:[#allocation2 + $0xd9] sm:$0xff] %vm205_vm0, %v5175_v16  ;;  %v723_v30 = vld [vmem:[#allocation2 + $0x39] sm:$0xff]  ;;  %v412_v31 = vpack.c.bf16 %v381_v28, %v380_v26  ;;  %v383_v33 = vld [vmem:[#allocation2 + $0x21] sm:$0xff] }
  0x21   : > { %223 = vst.msk [vmem:[#allocation2 + $0xe1] sm:$0xff] %vm205_vm0, %v5178_v17  ;;  %7255 = vst [vmem:[#allocation13_spill] sm:$0xff] %v5187_v18  ;;  %v382_v32 = vld [vmem:[#allocation2 + $0x19] sm:$0xff]  ;;  %450 = vrot.lane.b32.xlu1 %v5216_v27, %s5052_s18  ;;  %v753_v34 = vpack.c.bf16 %v723_v30, %v722_v29  ;;  %v280_v35 = vld [vmem:[#allocation2 + $0xf] sm:$0x1] }
  0x22   : > { %7256 = vst [vmem:[#allocation14_spill] sm:$0xff] %v5190_v19  ;;  %7257 = vst [vmem:[#allocation15_spill] sm:$0xff] %v5193_v20  ;;  %444 = vrot.lane.b32.xlu0 %v412_v31, %s5052_s18  ;;  %v413_v36 = vpack.c.bf16 %v383_v33, %v382_v32  ;;  %v390_v37 = vld [vmem:[#allocation2 + $0x79] sm:$0xff]  ;;  %v391_v38 = vld [vmem:[#allocation2 + $0x81] sm:$0xff] }
  0x23   : > { %224 = vst.msk [vmem:[#allocation2 + $0xf1] sm:$0xff] %vm205_vm0, %v5187_v18  ;;  %225 = vst.msk [vmem:[#allocation2 + $0xf9] sm:$0xff] %vm205_vm0, %v5190_v19  ;;  %v281_v39 = vld [vmem:[#allocation2 + $0x27] sm:$0x1]  ;;  %v282_v40 = vld [vmem:[#allocation2 + $0x3f] sm:$0x1]  ;;  %v5225_v43 = vpack.c.bf16 %v391_v38, %v390_v37 }
  0x24   : > { %7258 = vst [vmem:[#allocation16_spill] sm:$0xff] %v5200_v21  ;;  %226 = vst.msk [vmem:[#allocation2 + $0x109] sm:$0xff] %vm205_vm0, %v5193_v20  ;;  %v283_v41 = vld [vmem:[#allocation2 + $0x57] sm:$0x1]  ;;  %v284_v42 = vld [vmem:[#allocation2 + $0x6f] sm:$0x1] }
  0x25   : > { %7259 = vst [vmem:[#allocation17_spill] sm:$0xff] %v5205_v22  ;;  %7260 = vst [vmem:[#allocation18_spill] sm:$0xff] %v5208_v23  ;;  %786 = vrot.lane.b32.xlu1 %v753_v34, %s5052_s18  ;;  %v285_v44 = vld [vmem:[#allocation2 + $0x87] sm:$0x1]  ;;  %v286_v46 = vld [vmem:[#allocation2 + $0x9f] sm:$0x1] }
  0x26   : > { %227 = vst.msk [vmem:[#allocation2 + $0x111] sm:$0xff] %vm205_vm0, %v5200_v21  ;;  %228 = vst.msk [vmem:[#allocation2 + $0x121] sm:$0xff] %vm205_vm0, %v5205_v22  ;;  %446 = vrot.lane.b32.xlu0 %v413_v36, %s5052_s18  ;;  %v509_v45 = vld [vmem:[#allocation2 + $0x2] sm:$0xff]  ;;  %v287_v47 = vld [vmem:[#allocation2 + $0xb7] sm:$0x1] }
  0x27   : > { %229 = vst.msk [vmem:[#allocation2 + $0x129] sm:$0xff] %vm205_vm0, %v5208_v23  ;;  %v511_v50 = vld [vmem:[#allocation2 + $0x1a] sm:$0xff]  ;;  %v288_v52 = vld [vmem:[#allocation2 + $0xcf] sm:$0x1]  ;;  %v513_v61 = vld [vmem:[#allocation2 + $0x32] sm:$0xff] }
  0x28   : > { %298 = vst.msk [vmem:[#allocation2 + $0x11] sm:$0x1] %vm261_vm1, %v280_v35  ;;  %299 = vst.msk [vmem:[#allocation2 + $0x29] sm:$0x1] %vm261_vm1, %v281_v39  ;;  %v388_v53 = vld [vmem:[#allocation2 + $0x61] sm:$0xff]  ;;  %v389_v54 = vld [vmem:[#allocation2 + $0x69] sm:$0xff] }
  0x29   : > { %300 = vst.msk [vmem:[#allocation2 + $0x41] sm:$0x1] %vm261_vm1, %v282_v40  ;;  %301 = vst.msk [vmem:[#allocation2 + $0x59] sm:$0x1] %vm261_vm1, %v283_v41  ;;  %454 = vrot.lane.b32.xlu1 %v5225_v43, %s5052_s18  ;;  %v289_v55 = vld [vmem:[#allocation2 + $0xe7] sm:$0x1]  ;;  %v5240_v57 = vpack.c.bf16 %v389_v54, %v388_v53 }
  0x2a   : > { %302 = vst.msk [vmem:[#allocation2 + $0x71] sm:$0x1] %vm261_vm1, %v284_v42  ;;  %303 = vst.msk [vmem:[#allocation2 + $0x89] sm:$0x1] %vm261_vm1, %v285_v44  ;;  %448 = vrot.lane.b32.xlu0 %v753_v34, %s5052_s18  ;;  %v515_v58 = vld [vmem:[#allocation2 + $0x4a] sm:$0xff]  ;;  %v5248_v25 = vld [vmem:[%s5090_s17 + $0xc0] sm:$0xff] }
  0x2b   : > { %304 = vst.msk [vmem:[#allocation2 + $0xa1] sm:$0x1] %vm261_vm1, %v286_v46  ;;  %305 = vst.msk [vmem:[#allocation2 + $0xb9] sm:$0x1] %vm261_vm1, %v287_v47  ;;  %v290_v60 = vld [vmem:[#allocation2 + $0xff] sm:$0x1] }
  0x2c   : > { %306 = vst.msk [vmem:[#allocation2 + $0xd1] sm:$0x1] %vm261_vm1, %v288_v52  ;;  %307 = vst.msk [vmem:[#allocation2 + $0xe9] sm:$0x1] %vm261_vm1, %v289_v55  ;;  %v5251_v26 = vld [vmem:[%s5090_s17 + $0xc8] sm:$0xff]  ;;  %v5261_v30 = vld [vmem:[%s5090_s17 + $0xd0] sm:$0xff] }
  0x2d   : > { %308 = vst.msk [vmem:[#allocation2 + $0x101] sm:$0x1] %vm261_vm1, %v290_v60  ;;  %v291_v63 = vld [vmem:[#allocation2 + $0x117] sm:$0x1]  ;;  %7261 = vst [vmem:[#allocation19_spill] sm:$0xff] %v5248_v25  ;;  %v5264_v31 = vld [vmem:[%s5090_s17 + $0xd8] sm:$0xff] }
  0x2e   : > { %784 = vrot.lane.b32.xlu0 %v413_v36, %s5052_s18  ;;  %309 = vst.msk [vmem:[#allocation2 + $0x119] sm:$0x1] %vm261_vm1, %v291_v63  ;;  %7262 = vst [vmem:[#allocation20_spill] sm:$0xff] %v5251_v26  ;;  %v292_v29 = vld [vmem:[#allocation2 + $0x12f] sm:$0x1]  ;;  %v5271_v32 = vld [vmem:[%s5090_s17 + $0xe0] sm:$0xff] }
  0x2f   : > { %v510_v48 = vld [vmem:[#allocation2 + $0xa] sm:$0xff]  ;;  %v512_v51 = vld [vmem:[#allocation2 + $0x22] sm:$0xff]  ;;  %230 = vst.msk [vmem:[#allocation2 + $0x139] sm:$0xff] %vm205_vm0, %v5248_v25  ;;  %231 = vst.msk [vmem:[#allocation2 + $0x141] sm:$0xff] %vm205_vm0, %v5251_v26 }
  0x30   : > { %v541_v49 = vpack.c.bf16 %v510_v48, %v509_v45  ;;  %v542_v56 = vpack.c.bf16 %v512_v51, %v511_v50  ;;  %v516_v59 = vld [vmem:[#allocation2 + $0x52] sm:$0xff]  ;;  %v514_v62 = vld [vmem:[#allocation2 + $0x3a] sm:$0xff]  ;;  %310 = vst.msk [vmem:[#allocation2 + $0x131] sm:$0x1] %vm261_vm1, %v292_v29  ;;  %7263 = vst [vmem:[#allocation21_spill] sm:$0xff] %v5261_v30 }
  0x31   : > { %v5245_v24 = vpack.c.bf16 %v516_v59, %v515_v58  ;;  %v543_v28 = vpack.c.bf16 %v514_v62, %v513_v61  ;;  %7264 = vst [vmem:[#allocation22_spill] sm:$0xff] %v5264_v31  ;;  %232 = vst.msk [vmem:[#allocation2 + $0x151] sm:$0xff] %vm205_vm0, %v5261_v30  ;;  %v5274_v33 = vld [vmem:[%s5090_s17 + $0xe8] sm:$0xff]  ;;  %v243_v36 = vld [vmem:[#allocation2 + $0x2] sm:$0x1] }
  0x32   : > { %573 = vrot.lane.b32.xlu1 %v541_v49, %s5053_s19  ;;  %452 = vrot.lane.b32.xlu0 %v5240_v57, %s5052_s18  ;;  %233 = vst.msk [vmem:[#allocation2 + $0x159] sm:$0xff] %vm205_vm0, %v5264_v31  ;;  %7265 = vst [vmem:[#allocation23_spill] sm:$0xff] %v5271_v32  ;;  %v246_v34 = vld [vmem:[#allocation2 + $0x4a] sm:$0x1]  ;;  %v517_v35 = vld [vmem:[#allocation2 + $0x62] sm:$0xff] }
  0x33   : > { %7266 = vst [vmem:[#allocation24_spill] sm:$0xff] %v5274_v33  ;;  %234 = vst.msk [vmem:[#allocation2 + $0x169] sm:$0xff] %vm205_vm0, %v5271_v32  ;;  %v519_v37 = vld [vmem:[#allocation2 + $0x7a] sm:$0xff]  ;;  %v520_v38 = vld [vmem:[#allocation2 + $0x82] sm:$0xff] }
  0x34   : > { %235 = vst.msk [vmem:[#allocation2 + $0x171] sm:$0xff] %vm205_vm0, %v5274_v33  ;;  %241 = vst.msk [vmem:[#allocation2 + $0x199] sm:$0xff] %vm205_vm0, %v5271_v32  ;;  %v244_v39 = vld [vmem:[#allocation2 + $0x1a] sm:$0x1]  ;;  %v518_v40 = vld [vmem:[#allocation2 + $0x6a] sm:$0xff]  ;;  %v5301_v46 = vpack.c.bf16 %v520_v38, %v519_v37 }
  0x35   : > { %242 = vst.msk [vmem:[#allocation2 + $0x1a1] sm:$0xff] %vm205_vm0, %v5274_v33  ;;  %v5291_v41 = vld [vmem:[%s5090_s17 + $0xf0] sm:$0xff]  ;;  %v5294_v42 = vld [vmem:[%s5090_s17 + $0xf8] sm:$0xff]  ;;  %v545_v48 = vpack.c.bf16 %v518_v40, %v517_v35  ;;  %v317_v51 = vld [vmem:[#allocation2 + $0x8] sm:$0xff] }
  0x36   : > { %575 = vrot.lane.b32.xlu1 %v542_v56, %s5053_s19  ;;  %265 = vst.msk [vmem:[#allocation2 + $0x48] sm:$0x1] %vm261_vm1, %v246_v34  ;;  %577 = vrot.lane.b32.xlu0 %v543_v28, %s5053_s19  ;;  %262 = vst.msk [vmem:[#allocation2] sm:$0x1] %vm261_vm1, %v243_v36  ;;  %v248_v44 = vld [vmem:[#allocation2 + $0x7a] sm:$0x1] }
  0x37   : > { %263 = vst.msk [vmem:[#allocation2 + $0x18] sm:$0x1] %vm261_vm1, %v244_v39  ;;  %7267 = vst [vmem:[#allocation25_spill] sm:$0xff] %v5291_v41  ;;  %v245_v45 = vld [vmem:[#allocation2 + $0x32] sm:$0x1]  ;;  %v319_v52 = vld [vmem:[#allocation2 + $0x20] sm:$0xff] }
  0x38   : > { %7268 = vst [vmem:[#allocation26_spill] sm:$0xff] %v5294_v42  ;;  %236 = vst.msk [vmem:[#allocation2 + $0x181] sm:$0xff] %vm205_vm0, %v5291_v41  ;;  %v293_v47 = vld [vmem:[#allocation2 + $0x147] sm:$0x1]  ;;  %v323_v50 = vld [vmem:[#allocation2 + $0x50] sm:$0xff] }
  0x39   : > { %237 = vst.msk [vmem:[#allocation2 + $0x189] sm:$0xff] %vm205_vm0, %v5294_v42  ;;  %v294_v49 = vld [vmem:[#allocation2 + $0x15f] sm:$0x1]  ;;  %v327_v53 = vld [vmem:[#allocation2 + $0x80] sm:$0xff]  ;;  %v394_v35 = vld [vmem:[#allocation2 + $0xa9] sm:$0xff] }
  0x3a   : > { %579 = vrot.lane.b32.xlu1 %v5245_v24, %s5053_s19  ;;  %267 = vst.msk [vmem:[#allocation2 + $0x78] sm:$0x1] %vm261_vm1, %v248_v44  ;;  %264 = vst.msk [vmem:[#allocation2 + $0x30] sm:$0x1] %vm261_vm1, %v245_v45  ;;  %912 = vrot.lane.b32.xlu0 %v542_v56, %s5053_s19  ;;  %v321_v58 = vld [vmem:[#allocation2 + $0x38] sm:$0xff]  ;;  %v1500_v25 = vld [vmem:[#allocation2 + $0x61] sm:$0xff] }
  0x3b   : > { %311 = vst.msk [vmem:[#allocation2 + $0x149] sm:$0x1] %vm261_vm1, %v293_v47  ;;  %312 = vst.msk [vmem:[#allocation2 + $0x161] sm:$0x1] %vm261_vm1, %v294_v49  ;;  %v295_v54 = vld [vmem:[#allocation2 + $0x177] sm:$0x1] }
  0x3c   : > { %313 = vst.msk [vmem:[#allocation2 + $0x179] sm:$0x1] %vm261_vm1, %v295_v54  ;;  %v247_v61 = vld [vmem:[#allocation2 + $0x62] sm:$0x1]  ;;  %v5034_v38 = vld [vmem:[%s7220_s1 + $0x8] sm:$0x3f]  }
  0x3d   : > { %v322_v55 = vld [vmem:[#allocation2 + $0x48] sm:$0xff]  ;;  %v316_v59 = vld [vmem:[#allocation2] sm:$0xff]  ;;  %266 = vst.msk [vmem:[#allocation2 + $0x60] sm:$0x1] %vm261_vm1, %v247_v61  ;;  %v395_v39 = vld [vmem:[#allocation2 + $0xb1] sm:$0xff]  ;;  %5018 = vmatprep.subr.msk.bf16.mxu0 %vm1049_vm2, %v5034_v38  ;;  %v1051_v47 = vsel %vm1049_vm2, %v5034_v38, 0 }
  0x3e   : > { %914 = vrot.lane.b32.xlu1 %v543_v28, %s5053_s19  ;;  %581 = vrot.lane.b32.xlu0 %v545_v48, %s5053_s19  ;;  %v5312_v56 = vpack.c.bf16 %v323_v50, %v322_v55  ;;  %v318_v60 = vld [vmem:[#allocation2 + $0x18] sm:$0xff]  ;;  %v348_v62 = vpack.c.bf16 %v317_v51, %v316_v59  ;;  %v249_v40 = vld [vmem:[#allocation2 + $0x92] sm:$0x1]  ;;  %v325_v49 = vld [vmem:[#allocation2 + $0x68] sm:$0xff]  ;;  %v5344_v51 = vpack.c.bf16 %v395_v39, %v394_v35 }
  0x3f   : > { %v5314_v63 = vpack.c.bf16 %v319_v52, %v318_v60  ;;  %v392_v44 = vld [vmem:[#allocation2 + $0x91] sm:$0xff]  ;;  %v393_v45 = vld [vmem:[#allocation2 + $0x99] sm:$0xff]  ;;  %268 = vst.msk [vmem:[#allocation2 + $0x90] sm:$0x1] %vm261_vm1, %v249_v40  ;;  %4687 = vmatpush3.bf16.msra.mxu0 %v1051_v47  ;;  %v1501_v23 = vld [vmem:[#allocation2 + $0x69] sm:$0xff] }
  0x40   : > { %v296_v28 = vld [vmem:[#allocation2 + $0x18f] sm:$0x1]  ;;  %367 = vst.msk [vmem:[#allocation3 + $0x18] sm:$0xff] %vm205_vm0, %v5312_v56  ;;  %364 = vst.msk [vmem:[#allocation3] sm:$0xff] %vm205_vm0, %v348_v62  ;;  %v252_v50 = vld [vmem:[#allocation2 + $0xda] sm:$0x1]  ;;  %v418_v52 = vpack.c.bf16 %v393_v45, %v392_v44 }
  0x41   : > { %v326_v29 = vld [vmem:[#allocation2 + $0x78] sm:$0xff]  ;;  %v320_v34 = vld [vmem:[#allocation2 + $0x30] sm:$0xff]  ;;  %314 = vst.msk [vmem:[#allocation2 + $0x191] sm:$0x1] %vm261_vm1, %v296_v28  ;;  %271 = vst.msk [vmem:[#allocation2 + $0xd8] sm:$0x1] %vm261_vm1, %v252_v50 }
  0x42   : > { %583 = vrot.lane.b32.xlu1 %v5301_v46, %s5053_s19  ;;  %365 = vst.msk [vmem:[#allocation3 + $0x8] sm:$0xff] %vm205_vm0, %v5314_v63  ;;  %v5325_v36 = vpack.c.bf16 %v327_v53, %v326_v29  ;;  %v5327_v37 = vpack.c.bf16 %v321_v58, %v320_v34  ;;  %788 = vrot.lane.b32.xlu0 %v5216_v27, %s5052_s18  ;;  %v251_v27 = vld [vmem:[#allocation2 + $0xc2] sm:$0x1]  ;;  %v523_v53 = vld [vmem:[#allocation2 + $0xaa] sm:$0xff]  ;;  %v524_v54 = vld [vmem:[#allocation2 + $0xb2] sm:$0xff] }
  0x43   : > { %270 = vst.msk [vmem:[#allocation2 + $0xc0] sm:$0x1] %vm261_vm1, %v251_v27  ;;  %v521_v58 = vld [vmem:[#allocation2 + $0x92] sm:$0xff]  ;;  %v522_v59 = vld [vmem:[#allocation2 + $0x9a] sm:$0xff]  ;;  %v333_v28 = vld [vmem:[#allocation2 + $0xc8] sm:$0xff] }
  0x44   : > { %369 = vst.msk [vmem:[#allocation3 + $0x28] sm:$0xff] %vm205_vm0, %v5325_v36  ;;  %366 = vst.msk [vmem:[#allocation3 + $0x10] sm:$0xff] %vm205_vm0, %v5327_v37  ;;  %v324_v55 = vld [vmem:[#allocation2 + $0x60] sm:$0xff]  ;;  %v329_v61 = vld [vmem:[#allocation2 + $0x98] sm:$0xff] }
  0x45   : > { %v5349_v60 = vpack.c.bf16 %v325_v49, %v324_v55  ;;  %v331_v62 = vld [vmem:[#allocation2 + $0xb0] sm:$0xff]  ;;  %v335_v35 = vld [vmem:[#allocation2 + $0xe0] sm:$0xff]  ;;  %v254_v50 = vld [vmem:[#allocation2 + $0x10a] sm:$0x1] }
  0x46   : > { %790 = vrot.lane.b32.xlu1 %v5240_v57, %s5052_s18  ;;  %v250_v57 = vld [vmem:[#allocation2 + $0xaa] sm:$0x1]  ;;  %916 = vrot.lane.b32.xlu0 %v5245_v24, %s5053_s19  ;;  %v547_v24 = vpack.c.bf16 %v522_v59, %v521_v58  ;;  %v328_v29 = vld [vmem:[#allocation2 + $0x90] sm:$0xff]  ;;  %v398_v27 = vld [vmem:[#allocation2 + $0xd9] sm:$0xff]  ;;  %273 = vst.msk [vmem:[#allocation2 + $0x108] sm:$0x1] %vm261_vm1, %v254_v50 }
  0x47   : > { %269 = vst.msk [vmem:[#allocation2 + $0xa8] sm:$0x1] %vm261_vm1, %v250_v57  ;;  %v5358_v38 = vpack.c.bf16 %v329_v61, %v328_v29  ;;  %v253_v47 = vld [vmem:[#allocation2 + $0xf2] sm:$0x1]  ;;  %v399_v49 = vld [vmem:[#allocation2 + $0xe1] sm:$0xff]  ;;  %v337_v29 = vld [vmem:[#allocation2 + $0xf8] sm:$0xff] }
  0x48   : > { %368 = vst.msk [vmem:[#allocation3 + $0x20] sm:$0xff] %vm205_vm0, %v5349_v60  ;;  %v334_v44 = vld [vmem:[#allocation2 + $0xd8] sm:$0xff]  ;;  %v421_v55 = vpack.c.bf16 %v399_v49, %v398_v27  ;;  %v528_v59 = vld [vmem:[#allocation2 + $0xe2] sm:$0xff] }
  0x49   : > { %370 = vst.msk [vmem:[#allocation3 + $0x30] sm:$0xff] %vm205_vm0, %v5358_v38  ;;  %v5370_v45 = vpack.c.bf16 %v335_v35, %v334_v44  ;;  %v527_v58 = vld [vmem:[#allocation2 + $0xda] sm:$0xff]  ;;  %v525_v61 = vld [vmem:[#allocation2 + $0xc2] sm:$0xff]  ;;  %v403_v49 = vld [vmem:[#allocation2 + $0x111] sm:$0xff] }
  0x4a   : > { %918 = vrot.lane.b32.xlu1 %v545_v48, %s5053_s19  ;;  %v5353_v48 = vpack.c.bf16 %v524_v54, %v523_v53  ;;  %456 = vrot.lane.b32.xlu0 %v418_v52, %s5052_s18  ;;  %v332_v40 = vld [vmem:[#allocation2 + $0xc0] sm:$0xff]  ;;  %272 = vst.msk [vmem:[#allocation2 + $0xf0] sm:$0x1] %vm261_vm1, %v253_v47  ;;  %v397_v54 = vld [vmem:[#allocation2 + $0xc9] sm:$0xff]  ;;  %v256_v50 = vld [vmem:[#allocation2 + $0x13a] sm:$0x1] }
  0x4b   : > { %v5362_v57 = vpack.c.bf16 %v333_v28, %v332_v40  ;;  %373 = vst.msk [vmem:[#allocation3 + $0x48] sm:$0xff] %vm205_vm0, %v5370_v45  ;;  %v396_v53 = vld [vmem:[#allocation2 + $0xc1] sm:$0xff]  ;;  %v339_v40 = vld [vmem:[#allocation2 + $0x110] sm:$0xff]  ;;  %v1502_v26 = vld [vmem:[#allocation2 + $0x79] sm:$0xff] }
  0x4c   : > { %v255_v47 = vld [vmem:[#allocation2 + $0x122] sm:$0x1]  ;;  %v402_v27 = vld [vmem:[#allocation2 + $0x109] sm:$0xff]  ;;  %275 = vst.msk [vmem:[#allocation2 + $0x138] sm:$0x1] %vm261_vm1, %v256_v50  ;;  %v406_v50 = vld [vmem:[#allocation2 + $0x139] sm:$0xff] }
  0x4d   : > { %372 = vst.msk [vmem:[#allocation3 + $0x40] sm:$0xff] %vm205_vm0, %v5362_v57  ;;  %v1627_v41 = vld [vmem:[#allocation2 + $0x52] sm:$0xff]  ;;  %v1625_v31 = vld [vmem:[#allocation2 + $0x3a] sm:$0xff] }
  0x4e   : > { %458 = vrot.lane.b32.xlu1 %v5344_v51, %s5052_s18  ;;  %v330_v34 = vld [vmem:[#allocation2 + $0xa8] sm:$0xff]  ;;  %585 = vrot.lane.b32.xlu0 %v547_v24, %s5053_s19  ;;  %274 = vst.msk [vmem:[#allocation2 + $0x120] sm:$0x1] %vm261_vm1, %v255_v47  ;;  %v1624_v32 = vld [vmem:[#allocation2 + $0x32] sm:$0xff] }
  0x4f   : > { %v5360_v39 = vpack.c.bf16 %v331_v62, %v330_v34  ;;  %v550_v62 = vpack.c.bf16 %v528_v59, %v527_v58  ;;  %v532_v59 = vld [vmem:[#allocation2 + $0x112] sm:$0xff]  ;;  %v1656_v30 = vpack.c.bf16 %v1625_v31, %v1624_v32  ;;  %v1628_v32 = vld [vmem:[#allocation2 + $0x62] sm:$0xff] }
  0x51   : > { %371 = vst.msk [vmem:[#allocation3 + $0x38] sm:$0xff] %vm205_vm0, %v5360_v39  ;;  %v336_v28 = vld [vmem:[#allocation2 + $0xf0] sm:$0xff] }
  0x52   : > { %587 = vrot.lane.b32.xlu1 %v5353_v48, %s5053_s19  ;;  %792 = vrot.lane.b32.xlu0 %v5225_v43, %s5052_s18  ;;  %v526_v43 = vld [vmem:[#allocation2 + $0xca] sm:$0xff]  ;;  %v5387_v35 = vpack.c.bf16 %v337_v29, %v336_v28 }
  0x53   : > { %v549_v34 = vpack.c.bf16 %v526_v43, %v525_v61  ;;  %v529_v61 = vld [vmem:[#allocation2 + $0xf2] sm:$0xff]  ;;  %v530_v43 = vld [vmem:[#allocation2 + $0xfa] sm:$0xff] }
  0x54   : > { %374 = vst.msk [vmem:[#allocation3 + $0x50] sm:$0xff] %vm205_vm0, %v5387_v35 }
  0x55   : > { %v340_v29 = vld [vmem:[#allocation2 + $0x120] sm:$0xff] }
  0x56   : > { %794 = vrot.lane.b32.xlu1 %v418_v52, %s5052_s18  ;;  %920 = vrot.lane.b32.xlu0 %v5301_v46, %s5053_s19  ;;  %v420_v52 = vpack.c.bf16 %v397_v54, %v396_v53  ;;  %v5401_v46 = vld [vmem:[%s7220_s1] sm:$0x3f]   ;;  %v400_v53 = vld [vmem:[#allocation2 + $0xf1] sm:$0xff] }
  0x57   : > { %v401_v54 = vld [vmem:[#allocation2 + $0xf9] sm:$0xff]  ;;  %5019 = vmatprep.subr.msk.bf16.mxu0 %vm1049_vm2, %v5401_v46 }
  0x58   : > { %v422_v58 = vpack.c.bf16 %v401_v54, %v400_v53  ;;  %v407_v53 = vld [vmem:[#allocation2 + $0x141] sm:$0xff]  ;;  %v258_v54 = vld [vmem:[#allocation2 + $0x16a] sm:$0x1] }
  0x59   : > { %277 = vst.msk [vmem:[#allocation2 + $0x168] sm:$0x1] %vm261_vm1, %v258_v54 }
  0x5a   : > { %922 = vrot.lane.b32.xlu1 %v547_v24, %s5053_s19  ;;  %460 = vrot.lane.b32.xlu0 %v420_v52, %s5052_s18  ;;  %v338_v24 = vld [vmem:[#allocation2 + $0x108] sm:$0xff] }
  0x5b   : > { %v5389_v44 = vpack.c.bf16 %v339_v40, %v338_v24  ;;  %v341_v24 = vld [vmem:[#allocation2 + $0x128] sm:$0xff]  ;;  %v551_v40 = vpack.c.bf16 %v530_v43, %v529_v61  ;;  %v5429_v61 = vpack.c.bf16 %v407_v53, %v406_v50  ;;  %v347_v50 = vld [vmem:[#allocation2 + $0x170] sm:$0xff] }
  0x5c   : > { %v5414_v47 = vpack.c.bf16 %v341_v24, %v340_v29  ;;  %v536_v29 = vld [vmem:[#allocation2 + $0x142] sm:$0xff] }
  0x5d   : > { %375 = vst.msk [vmem:[#allocation3 + $0x58] sm:$0xff] %vm205_vm0, %v5389_v44  ;;  %v533_v24 = vld [vmem:[#allocation2 + $0x122] sm:$0xff] }
  0x5e   : > { %462 = vrot.lane.b32.xlu1 %v421_v55, %s5052_s18  ;;  %589 = vrot.lane.b32.xlu0 %v549_v34, %s5053_s19  ;;  %376 = vst.msk [vmem:[#allocation3 + $0x60] sm:$0xff] %vm205_vm0, %v5414_v47 }
  0x62   : > { %591 = vrot.lane.b32.xlu1 %v550_v62, %s5053_s19  ;;  %796 = vrot.lane.b32.xlu0 %v5344_v51, %s5052_s18  ;;  %v531_v51 = vld [vmem:[#allocation2 + $0x10a] sm:$0xff] }
  0x63   : > { %v552_v28 = vpack.c.bf16 %v532_v59, %v531_v51  ;;  %v404_v51 = vld [vmem:[#allocation2 + $0x121] sm:$0xff]  ;;  %v405_v59 = vld [vmem:[#allocation2 + $0x129] sm:$0xff] }
  0x64   : > { %v424_v43 = vpack.c.bf16 %v405_v59, %v404_v51  ;;  %v411_v51 = vld [vmem:[#allocation2 + $0x171] sm:$0xff]  ;;  %v259_v59 = vld [vmem:[#allocation2 + $0x182] sm:$0x1] }
  0x65   : > { %278 = vst.msk [vmem:[#allocation2 + $0x180] sm:$0x1] %vm261_vm1, %v259_v59  ;;  %v297_v59 = vld [vmem:[#allocation2 + $0x1a7] sm:$0x1] }
  0x66   : > { %798 = vrot.lane.b32.xlu1 %v420_v52, %s5052_s18  ;;  %v423_v52 = vpack.c.bf16 %v403_v49, %v402_v27  ;;  %924 = vrot.lane.b32.xlu0 %v5353_v48, %s5053_s19  ;;  %v343_v27 = vld [vmem:[#allocation2 + $0x140] sm:$0xff]  ;;  %v257_v48 = vld [vmem:[#allocation2 + $0x152] sm:$0x1]  ;;  %315 = vst.msk [vmem:[#allocation2 + $0x1a9] sm:$0x1] %vm261_vm1, %v297_v59 }
  0x67   : > { %276 = vst.msk [vmem:[#allocation2 + $0x150] sm:$0x1] %vm261_vm1, %v257_v48  ;;  %v345_v48 = vld [vmem:[#allocation2 + $0x158] sm:$0xff] }
  0x6a   : > { %926 = vrot.lane.b32.xlu1 %v549_v34, %s5053_s19  ;;  %464 = vrot.lane.b32.xlu0 %v422_v58, %s5052_s18  ;;  %v342_v34 = vld [vmem:[#allocation2 + $0x138] sm:$0xff] }
  0x6b   : > { %v5416_v49 = vpack.c.bf16 %v343_v27, %v342_v34 }
  0x6d   : > { %377 = vst.msk [vmem:[#allocation3 + $0x68] sm:$0xff] %vm205_vm0, %v5416_v49 }
  0x6e   : > { %466 = vrot.lane.b32.xlu1 %v423_v52, %s5052_s18  ;;  %593 = vrot.lane.b32.xlu0 %v551_v40, %s5053_s19  ;;  %v344_v27 = vld [vmem:[#allocation2 + $0x150] sm:$0xff] }
  0x6f   : > { %v5435_v42 = vpack.c.bf16 %v345_v48, %v344_v27  ;;  %v539_v27 = vld [vmem:[#allocation2 + $0x16a] sm:$0xff]  ;;  %v540_v48 = vld [vmem:[#allocation2 + $0x172] sm:$0xff] }
  0x71   : > { %378 = vst.msk [vmem:[#allocation3 + $0x70] sm:$0xff] %vm205_vm0, %v5435_v42 }
  0x72   : > { %595 = vrot.lane.b32.xlu1 %v552_v28, %s5053_s19  ;;  %800 = vrot.lane.b32.xlu0 %v421_v55, %s5052_s18  ;;  %v534_v55 = vld [vmem:[#allocation2 + $0x12a] sm:$0xff] }
  0x73   : > { %v553_v54 = vpack.c.bf16 %v534_v55, %v533_v24 }
  0x76   : > { %802 = vrot.lane.b32.xlu1 %v422_v58, %s5052_s18  ;;  %928 = vrot.lane.b32.xlu0 %v550_v62, %s5053_s19  ;;  %v535_v58 = vld [vmem:[#allocation2 + $0x13a] sm:$0xff]  ;;  %v410_v62 = vld [vmem:[#allocation2 + $0x169] sm:$0xff] }
  0x77   : > { %v554_v34 = vpack.c.bf16 %v536_v29, %v535_v58  ;;  %v408_v58 = vld [vmem:[#allocation2 + $0x151] sm:$0xff]  ;;  %v409_v29 = vld [vmem:[#allocation2 + $0x159] sm:$0xff]  ;;  %v5449_v24 = vpack.c.bf16 %v411_v51, %v410_v62 }
  0x78   : > { %v5452_v55 = vpack.c.bf16 %v409_v29, %v408_v58  ;;  %v878_v29 = vld [vmem:[#allocation2 + $0x182] sm:$0xff] }
  0x7a   : > { %930 = vrot.lane.b32.xlu1 %v551_v40, %s5053_s19  ;;  %468 = vrot.lane.b32.xlu0 %v424_v43, %s5052_s18  ;;  %v346_v40 = vld [vmem:[#allocation2 + $0x168] sm:$0xff] }
  0x7b   : > { %v5437_v53 = vpack.c.bf16 %v347_v50, %v346_v40  ;;  %v538_v40 = vld [vmem:[#allocation2 + $0x15a] sm:$0xff] }
  0x7d   : > { %379 = vst.msk [vmem:[#allocation3 + $0x78] sm:$0xff] %vm205_vm0, %v5437_v53 }
  0x7e   : > { %470 = vrot.lane.b32.xlu1 %v5429_v61, %s5052_s18  ;;  %597 = vrot.lane.b32.xlu0 %v553_v54, %s5053_s19 }
  0x82   : > { %599 = vrot.lane.b32.xlu1 %v554_v34, %s5053_s19  ;;  %804 = vrot.lane.b32.xlu0 %v423_v52, %s5052_s18  ;;  %v5456_v52 = vpack.c.bf16 %v540_v48, %v539_v27  ;;  %v879_v27 = vld [vmem:[#allocation2 + $0x18a] sm:$0xff] }
  0x86   : > { %806 = vrot.lane.b32.xlu1 %v424_v43, %s5052_s18  ;;  %932 = vrot.lane.b32.xlu0 %v552_v28, %s5053_s19  ;;  %v537_v43 = vld [vmem:[#allocation2 + $0x152] sm:$0xff]  ;;  %v750_v28 = vld [vmem:[#allocation2 + $0x181] sm:$0xff] }
  0x87   : > { %v5460_v50 = vpack.c.bf16 %v538_v40, %v537_v43  ;;  %v5483_v40 = vpack.c.bf16 %v879_v27, %v878_v29  ;;  %v1626_v27 = vld [vmem:[#allocation2 + $0x4a] sm:$0xff] }
  0x8a   : > { %934 = vrot.lane.b32.xlu1 %v553_v54, %s5053_s19  ;;  %472 = vrot.lane.b32.xlu0 %v5452_v55, %s5052_s18  ;;  %v751_v54 = vld [vmem:[#allocation2 + $0x189] sm:$0xff] }
  0x8b   : > { %v5474_v58 = vpack.c.bf16 %v751_v54, %v750_v28  ;;  %v1498_v28 = vld [vmem:[#allocation2 + $0x49] sm:$0xff]  ;;  %v1499_v54 = vld [vmem:[#allocation2 + $0x51] sm:$0xff] }
  0x8e   : > { %474 = vrot.lane.b32.xlu1 %v5449_v24, %s5052_s18  ;;  %601 = vrot.lane.b32.xlu0 %v5460_v50, %s5053_s19 }
  0x92   : > { %603 = vrot.lane.b32.xlu1 %v5456_v52, %s5053_s19  ;;  %808 = vrot.lane.b32.xlu0 %v5429_v61, %s5052_s18 }
  0x93   : > { %v451_v62 = vpop.permute.xlu1 %450 }
  0x94   : > { %496 = vst.msk [vmem:[#allocation3 + $0x18] sm:$0xff] %vm492_vm3, %v451_v62  ;;  %v445_v51 = vpop.permute.xlu0 %444 }
  0x95   : > { %493 = vst.msk [vmem:[#allocation3] sm:$0xff] %vm492_vm3, %v445_v51  ;;  %v1496_v51 = vld [vmem:[#allocation2 + $0x31] sm:$0xff] }
  0x96   : > { %810 = vrot.lane.b32.xlu1 %v5452_v55, %s5052_s18  ;;  %936 = vrot.lane.b32.xlu0 %v554_v34, %s5053_s19  ;;  %v1497_v34 = vld [vmem:[#allocation2 + $0x39] sm:$0xff] }
  0x97   : > { %v5478_v48 = vpop.permute.xlu1 %786  ;;  %v1528_v29 = vpack.c.bf16 %v1497_v34, %v1496_v51  ;;  %v1530_v34 = vpack.c.bf16 %v1501_v23, %v1500_v25 }
  0x98   : > { %v447_v43 = vpop.permute.xlu0 %446 }
  0x99   : > { %494 = vst.msk [vmem:[#allocation3 + $0x8] sm:$0xff] %vm492_vm3, %v447_v43  ;;  %v1529_v43 = vpack.c.bf16 %v1499_v54, %v1498_v28  ;;  %v1503_v28 = vld [vmem:[#allocation2 + $0x81] sm:$0xff] }
  0x9a   : > { %938 = vrot.lane.b32.xlu1 %v5460_v50, %s5053_s19  ;;  %812 = vrot.lane.b32.xlu0 %v5449_v24, %s5052_s18 }
  0x9b   : > { %v455_v62 = vpop.permute.xlu1 %454 }
  0x9c   : > { %498 = vst.msk [vmem:[#allocation3 + $0x28] sm:$0xff] %vm492_vm3, %v455_v62  ;;  %v449_v59 = vpop.permute.xlu0 %448 }
  0x9d   : > { %495 = vst.msk [vmem:[#allocation3 + $0x10] sm:$0xff] %vm492_vm3, %v449_v59  ;;  %v1657_v59 = vpack.c.bf16 %v1627_v41, %v1626_v27  ;;  %v1630_v41 = vld [vmem:[#allocation2 + $0x7a] sm:$0xff]  ;;  %v1629_v27 = vld [vmem:[#allocation2 + $0x6a] sm:$0xff] }
  0x9e   : > { %814 = vrot.lane.b32.xlu1 %v5474_v58, %s5052_s18  ;;  %940 = vrot.lane.b32.xlu0 %v5456_v52, %s5053_s19  ;;  %v1658_v25 = vpack.c.bf16 %v1629_v27, %v1628_v32  ;;  %v1632_v27 = vld [vmem:[#allocation2 + $0x92] sm:$0xff] }
  0xa0   : > { %v785_v62 = vpop.permute.xlu0 %784 }
  0xa2   : > { %942 = vrot.lane.b32.xlu1 %v5483_v40, %s5053_s19  ;;  %1560 = vrot.lane.b32.xlu0 %v1528_v29, %s5052_s18 }
  0xa4   : > { %v574_v33 = vpop.permute.xlu1 %573  ;;  %v453_v51 = vpop.permute.xlu0 %452 }
  0xa5   : > { %622 = vst.msk [vmem:[#allocation3] sm:$0xff] %vm621_vm4, %v574_v33  ;;  %v1531_v33 = vpack.c.bf16 %v1503_v28, %v1502_v26  ;;  %v1506_v26 = vld [vmem:[#allocation2 + $0xa9] sm:$0xff] }
  0xa6   : > { %1562 = vrot.lane.b32.xlu1 %v1529_v43, %s5052_s18  ;;  %497 = vst.msk [vmem:[#allocation3 + $0x20] sm:$0xff] %vm492_vm3, %v453_v51  ;;  %1688 = vrot.lane.b32.xlu0 %v1656_v30, %s5053_s19  ;;  %v1631_v43 = vld [vmem:[#allocation2 + $0x82] sm:$0xff]  ;;  %v1507_v30 = vld [vmem:[#allocation2 + $0xb1] sm:$0xff] }
  0xa7   : > { %v1659_v23 = vpack.c.bf16 %v1631_v43, %v1630_v41  ;;  %v1504_v51 = vld [vmem:[#allocation2 + $0x91] sm:$0xff] }
  0xa8   : > { %v576_v54 = vpop.permute.xlu1 %575  ;;  %v1635_v41 = vld [vmem:[#allocation2 + $0xb2] sm:$0xff] }
  0xa9   : > { %623 = vst.msk [vmem:[#allocation3 + $0x8] sm:$0xff] %vm621_vm4, %v576_v54  ;;  %v578_v54 = vpop.permute.xlu0 %577 }
  0xaa   : > { %1690 = vrot.lane.b32.xlu1 %v1657_v59, %s5053_s19  ;;  %624 = vst.msk [vmem:[#allocation3 + $0x10] sm:$0xff] %vm621_vm4, %v578_v54  ;;  %1564 = vrot.lane.b32.xlu0 %v1530_v34, %s5052_s18  ;;  %v1634_v34 = vld [vmem:[#allocation2 + $0xaa] sm:$0xff]  ;;  %v1633_v54 = vld [vmem:[#allocation2 + $0x9a] sm:$0xff] }
  0xac   : > { %v5500_v29 = vld [vmem:[#allocation3] sm:$0xff]  ;;  %v580_v31 = vpop.permute.xlu1 %579 }
  0xad   : > { %704 = vst.msk [vmem:[#allocation3] sm:$0xff] %vm205_vm0, %v5314_v63  ;;  %v1505_v63 = vld [vmem:[#allocation2 + $0x99] sm:$0xff] }
  0xae   : > { %625 = vst.msk [vmem:[#allocation3 + $0x18] sm:$0xff] %vm621_vm4, %v580_v31  ;;  %1566 = vrot.lane.b32.xlu1 %v1531_v33, %s5052_s18  ;;  %v913_v31 = vpop.permute.xlu0 %912  ;;  %1692 = vrot.lane.b32.xlu0 %v1658_v25, %s5053_s19  ;;  %v1532_v33 = vpack.c.bf16 %v1505_v63, %v1504_v51  ;;  %v1660_v25 = vpack.c.bf16 %v1633_v54, %v1632_v27  ;;  %v1508_v51 = vld [vmem:[#allocation2 + $0xc1] sm:$0xff]  ;;  %v1509_v63 = vld [vmem:[#allocation2 + $0xc9] sm:$0xff] }
  0xaf   : > { %832 = vst.msk [vmem:[#allocation3] sm:$0xff] %vm492_vm3, %v785_v62  ;;  %v1533_v62 = vpack.c.bf16 %v1507_v30, %v1506_v26  ;;  %v1510_v26 = vld [vmem:[#allocation2 + $0xd9] sm:$0xff]  ;;  %v1511_v30 = vld [vmem:[#allocation2 + $0xe1] sm:$0xff] }
  0xb0   : > { %v5509_v59 = vld [vmem:[#allocation3 + $0x8] sm:$0xff]  ;;  %v915_v28 = vpop.permute.xlu1 %914  ;;  %960 = vst.msk [vmem:[#allocation3] sm:$0xff] %vm621_vm4, %v913_v31 }
  0xb1   : > { %705 = vst.msk [vmem:[#allocation3 + $0x8] sm:$0xff] %vm205_vm0, %v5327_v37 }
  0xb2   : > { %833 = vst.msk [vmem:[#allocation3 + $0x8] sm:$0xff] %vm492_vm3, %v5478_v48  ;;  %1694 = vrot.lane.b32.xlu1 %v1659_v23, %s5053_s19  ;;  %v582_v22 = vpop.permute.xlu0 %581  ;;  %v5522_v48 = vld [vmem:[#allocation3 + $0x10] sm:$0xff]  ;;  %v1661_v23 = vpack.c.bf16 %v1635_v41, %v1634_v34  ;;  %1568 = vrot.lane.b32.xlu0 %v1532_v33, %s5052_s18  ;;  %v1535_v33 = vpack.c.bf16 %v1511_v30, %v1510_v26  ;;  %v1514_v26 = vld [vmem:[#allocation2 + $0x109] sm:$0xff]  ;;  %v1515_v30 = vld [vmem:[#allocation2 + $0x111] sm:$0xff] }
  0xb3   : > { %961 = vst.msk [vmem:[#allocation3 + $0x8] sm:$0xff] %vm621_vm4, %v915_v28  ;;  %626 = vst.msk [vmem:[#allocation3 + $0x20] sm:$0xff] %vm621_vm4, %v582_v22  ;;  %v1268_v22 = vsel %vm1049_vm2, %v5401_v46, 0  ;;  %v1534_v46 = vpack.c.bf16 %v1509_v63, %v1508_v51  ;;  %v1638_v34 = vld [vmem:[#allocation2 + $0xda] sm:$0xff]  ;;  %v1639_v41 = vld [vmem:[#allocation2 + $0xe2] sm:$0xff] }
  0xb4   : > { %v584_v43 = vpop.permute.xlu1 %583  ;;  %706 = vst.msk [vmem:[#allocation3 + $0x10] sm:$0xff] %vm205_vm0, %v5312_v56  ;;  %v5537_v56 = vld [vmem:[%s7220_s1 + $0x10] sm:$0x3f]  }
  0xb5   : > { %v5519_v32 = vld [vmem:[#allocation3 + $0x18] sm:$0xff]  ;;  %627 = vst.msk [vmem:[#allocation3 + $0x28] sm:$0xff] %vm621_vm4, %v584_v43  ;;  %v1512_v63 = vld [vmem:[#allocation2 + $0xf1] sm:$0xff] }
  0xb6   : > { %707 = vst.msk [vmem:[#allocation3 + $0x18] sm:$0xff] %vm205_vm0, %v5349_v60  ;;  %1570 = vrot.lane.b32.xlu1 %v1533_v62, %s5052_s18  ;;  %v789_v31 = vpop.permute.xlu0 %788  ;;  %1696 = vrot.lane.b32.xlu0 %v1660_v25, %s5053_s19 }
  0xb7   : > { %v976_v43 = vld [vmem:[#allocation3] sm:$0xff]  ;;  %834 = vst.msk [vmem:[#allocation3 + $0x10] sm:$0xff] %vm492_vm3, %v789_v31 }
  0xb8   : > { %v791_v28 = vpop.permute.xlu1 %790  ;;  %4688 = vmatprep.mubr.msk.bf16.mxu0 %vm1000_vm5, %v976_v43  ;;  %1480 = vst.msk [vmem:[#allocation3] sm:$0xff] %vm205_vm0, %v5327_v37  ;;  %v1637_v31 = vld [vmem:[#allocation2 + $0xca] sm:$0xff]  ;;  %v1663_v37 = vpack.c.bf16 %v1639_v41, %v1638_v34  ;;  %v1643_v41 = vld [vmem:[#allocation2 + $0x112] sm:$0xff] }
  0xb9   : > { %835 = vst.msk [vmem:[#allocation3 + $0x18] sm:$0xff] %vm492_vm3, %v791_v28  ;;  %v1636_v28 = vld [vmem:[#allocation2 + $0xc2] sm:$0xff]  ;;  %v1642_v34 = vld [vmem:[#allocation2 + $0x10a] sm:$0xff] }
  0xba   : > { %v977_v62 = vld [vmem:[#allocation3 + $0x8] sm:$0xff]  ;;  %1698 = vrot.lane.b32.xlu1 %v1661_v23, %s5053_s19  ;;  %v917_v43 = vpop.permute.xlu0 %916  ;;  %v5549_v23 = vld [vmem:[#allocation3 + $0x20] sm:$0xff]  ;;  %1572 = vrot.lane.b32.xlu0 %v1534_v46, %s5052_s18  ;;  %v1662_v25 = vpack.c.bf16 %v1637_v31, %v1636_v28 }
  0xbb   : > { %4689 = vmatmul.mubr.msk.bf16.vlgmr.msra.gmra.mrb[0].mxu0 %vm1000_vm5, %v977_v62  ;;  %962 = vst.msk [vmem:[#allocation3 + $0x10] sm:$0xff] %vm621_vm4, %v917_v43  ;;  %v1640_v31 = vld [vmem:[#allocation2 + $0xf2] sm:$0xff]  ;;  %v1641_v43 = vld [vmem:[#allocation2 + $0xfa] sm:$0xff] }
  0xbc   : > { %v919_v27 = vpop.permute.xlu1 %918  ;;  %v5546_v54 = vld [vmem:[#allocation3 + $0x28] sm:$0xff]  ;;  %4721 = vmatpush3.bf16.msra.mxu0 %v1268_v22  ;;  %708 = vst.msk [vmem:[#allocation3 + $0x20] sm:$0xff] %vm205_vm0, %v5325_v36 }
  0xbd   : > { %963 = vst.msk [vmem:[#allocation3 + $0x18] sm:$0xff] %vm621_vm4, %v919_v27  ;;  %5020 = vmatprep.subr.msk.bf16.mxu0 %vm1049_vm2, %v5537_v56  ;;  %v1513_v22 = vld [vmem:[#allocation2 + $0xf9] sm:$0xff]  ;;  %v1537_v27 = vpack.c.bf16 %v1515_v30, %v1514_v26  ;;  %v1516_v30 = vld [vmem:[#allocation2 + $0x121] sm:$0xff] }
  0xbe   : > { %709 = vst.msk [vmem:[#allocation3 + $0x28] sm:$0xff] %vm205_vm0, %v5358_v38  ;;  %1574 = vrot.lane.b32.xlu1 %v1535_v33, %s5052_s18  ;;  %v457_v62 = vpop.permute.xlu0 %456  ;;  %1700 = vrot.lane.b32.xlu0 %v1662_v25, %s5053_s19  ;;  %v1536_v33 = vpack.c.bf16 %v1513_v22, %v1512_v63  ;;  %v1664_v25 = vpack.c.bf16 %v1641_v43, %v1640_v31 }
  0xbf   : > { %499 = vst.msk [vmem:[#allocation3 + $0x30] sm:$0xff] %vm492_vm3, %v457_v62  ;;  %v1644_v62 = vld [vmem:[#allocation2 + $0x122] sm:$0xff] }
  0xc0   : > { %v459_v51 = vpop.permute.xlu1 %458 }
  0xc1   : > { %500 = vst.msk [vmem:[#allocation3 + $0x38] sm:$0xff] %vm492_vm3, %v459_v51  ;;  %v1517_v51 = vld [vmem:[#allocation2 + $0x129] sm:$0xff] }
  0xc2   : > { %1702 = vrot.lane.b32.xlu1 %v1663_v37, %s5053_s19  ;;  %v586_v21 = vpop.permute.xlu0 %585  ;;  %v978_v20 = vld [vmem:[#allocation3 + $0x10] sm:$0xff]  ;;  %v1665_v37 = vpack.c.bf16 %v1643_v41, %v1642_v34  ;;  %1576 = vrot.lane.b32.xlu0 %v1536_v33, %s5052_s18 }
  0xc3   : > { %628 = vst.msk [vmem:[#allocation3 + $0x30] sm:$0xff] %vm621_vm4, %v586_v21  ;;  %4692 = vmatprep.mubr.msk.bf16.mxu0 %vm1000_vm5, %v978_v20  ;;  %v1538_v20 = vpack.c.bf16 %v1517_v51, %v1516_v30  ;;  %v1646_v21 = vld [vmem:[#allocation2 + $0x13a] sm:$0xff]  ;;  %v1434_v51 = vld [vmem:[#allocation2 + $0x48] sm:$0xff] }
  0xc4   : > { %v588_v46 = vpop.permute.xlu1 %587  ;;  %v979_v28 = vld [vmem:[#allocation3 + $0x18] sm:$0xff]  ;;  %1482 = vst.msk [vmem:[#allocation3 + $0x10] sm:$0xff] %vm205_vm0, %v5349_v60 }
  0xc5   : > { %629 = vst.msk [vmem:[#allocation3 + $0x38] sm:$0xff] %vm621_vm4, %v588_v46  ;;  %4693 = vmatmul.mubr.msk.bf16.gmra.mrb[4].mxu0 %vm1000_vm5, %v979_v28  ;;  %v1527_v30 = vld [vmem:[#allocation2 + $0x1a1] sm:$0xff] }
  0xc6   : > { %1483 = vst.msk [vmem:[#allocation3 + $0x18] sm:$0xff] %vm205_vm0, %v5325_v36  ;;  %1578 = vrot.lane.b32.xlu1 %v1537_v27, %s5052_s18  ;;  %v793_v63 = vpop.permute.xlu0 %792  ;;  %1704 = vrot.lane.b32.xlu0 %v1664_v25, %s5053_s19  ;;  %v1647_v36 = vld [vmem:[#allocation2 + $0x142] sm:$0xff]  ;;  %v1645_v27 = vld [vmem:[#allocation2 + $0x12a] sm:$0xff] }
  0xc7   : > { %836 = vst.msk [vmem:[#allocation3 + $0x20] sm:$0xff] %vm492_vm3, %v793_v63  ;;  %v1667_v41 = vpack.c.bf16 %v1647_v36, %v1646_v21  ;;  %v1666_v46 = vpack.c.bf16 %v1645_v27, %v1644_v62  ;;  %v1435_v63 = vld [vmem:[#allocation2 + $0x50] sm:$0xff] }
  0xc8   : > { %v795_v26 = vpop.permute.xlu1 %794 }
  0xc9   : > { %837 = vst.msk [vmem:[#allocation3 + $0x28] sm:$0xff] %vm492_vm3, %v795_v26  ;;  %v1526_v26 = vld [vmem:[#allocation2 + $0x199] sm:$0xff] }
  0xca   : > { %1706 = vrot.lane.b32.xlu1 %v1665_v37, %s5053_s19  ;;  %v921_v33 = vpop.permute.xlu0 %920  ;;  %v5581_v34 = vld [vmem:[#allocation3 + $0x30] sm:$0xff]  ;;  %1580 = vrot.lane.b32.xlu0 %v1538_v20, %s5052_s18  ;;  %v1465_v20 = vpack.c.bf16 %v1435_v63, %v1434_v51 }
  0xcb   : > { %964 = vst.msk [vmem:[#allocation3 + $0x20] sm:$0xff] %vm621_vm4, %v921_v33 }
  0xcc   : > { %v923_v60 = vpop.permute.xlu1 %922  ;;  %v5578_v22 = vld [vmem:[#allocation3 + $0x38] sm:$0xff]  ;;  %710 = vst.msk [vmem:[#allocation3 + $0x30] sm:$0xff] %vm205_vm0, %v5360_v39  ;;  %1481 = vst.msk [vmem:[#allocation3 + $0x8] sm:$0xff] %vm205_vm0, %v1465_v20 }
  0xcd   : > { %965 = vst.msk [vmem:[#allocation3 + $0x28] sm:$0xff] %vm621_vm4, %v923_v60 }
  0xce   : > { %711 = vst.msk [vmem:[#allocation3 + $0x38] sm:$0xff] %vm205_vm0, %v5362_v57  ;;  %1582 = vrot.lane.b32.xlu1 %v5429_v61, %s5052_s18  ;;  %v461_v31 = vpop.permute.xlu0 %460  ;;  %1708 = vrot.lane.b32.xlu0 %v1666_v46, %s5053_s19 }
  0xcf   : > { %501 = vst.msk [vmem:[#allocation3 + $0x40] sm:$0xff] %vm492_vm3, %v461_v31 }
  0xd0   : > { %v463_v28 = vpop.permute.xlu1 %462 }
  0xd1   : > { %502 = vst.msk [vmem:[#allocation3 + $0x48] sm:$0xff] %vm492_vm3, %v463_v28 }
  0xd2   : > { %1710 = vrot.lane.b32.xlu1 %v1667_v41, %s5053_s19  ;;  %v590_v25 = vpop.permute.xlu0 %589  ;;  %v980_v61 = vld [vmem:[#allocation3 + $0x20] sm:$0xff]  ;;  %1584 = vrot.lane.b32.xlu0 %v5452_v55, %s5052_s18  ;;  %v1655_v55 = vld [vmem:[#allocation2 + $0x1a2] sm:$0xff] }
  0xd3   : > { %630 = vst.msk [vmem:[#allocation3 + $0x40] sm:$0xff] %vm621_vm4, %v590_v25  ;;  %4696 = vmatprep.mubr.msk.bf16.mxu0 %vm1000_vm5, %v980_v61 }
  0xd4   : > { %v592_v43 = vpop.permute.xlu1 %591  ;;  %v981_v37 = vld [vmem:[#allocation3 + $0x28] sm:$0xff]  ;;  %1484 = vst.msk [vmem:[#allocation3 + $0x20] sm:$0xff] %vm205_vm0, %v5358_v38 }
  0xd5   : > { %631 = vst.msk [vmem:[#allocation3 + $0x48] sm:$0xff] %vm621_vm4, %v592_v43  ;;  %4697 = vmatmul.mubr.msk.bf16.gmra.mrb[8].mxu0 %vm1000_vm5, %v981_v37  ;;  %v1654_v38 = vld [vmem:[#allocation2 + $0x19a] sm:$0xff] }
  0xd6   : > { %1485 = vst.msk [vmem:[#allocation3 + $0x28] sm:$0xff] %vm205_vm0, %v5360_v39  ;;  %1586 = vrot.lane.b32.xlu1 %v5449_v24, %s5052_s18  ;;  %v797_v21 = vpop.permute.xlu0 %796  ;;  %v1543_v24 = vpack.c.bf16 %v1527_v30, %v1526_v26  ;;  %1712 = vrot.lane.b32.xlu0 %v5460_v50, %s5053_s19 }
  0xd7   : > { %838 = vst.msk [vmem:[#allocation3 + $0x30] sm:$0xff] %vm492_vm3, %v797_v21 }
  0xd8   : > { %v799_v39 = vpop.permute.xlu1 %798 }
  0xd9   : > { %839 = vst.msk [vmem:[#allocation3 + $0x38] sm:$0xff] %vm492_vm3, %v799_v39 }
  0xda   : > { %1714 = vrot.lane.b32.xlu1 %v5456_v52, %s5053_s19  ;;  %v925_v62 = vpop.permute.xlu0 %924  ;;  %v5617_v27 = vld [vmem:[#allocation3 + $0x40] sm:$0xff]  ;;  %v1671_v52 = vpack.c.bf16 %v1655_v55, %v1654_v38  ;;  %1588 = vrot.lane.b32.xlu0 %v5474_v58, %s5052_s18 }
  0xdb   : > { %966 = vst.msk [vmem:[#allocation3 + $0x30] sm:$0xff] %vm621_vm4, %v925_v62 }
  0xdc   : > { %v927_v36 = vpop.permute.xlu1 %926  ;;  %v5614_v60 = vld [vmem:[#allocation3 + $0x48] sm:$0xff]  ;;  %712 = vst.msk [vmem:[#allocation3 + $0x40] sm:$0xff] %vm205_vm0, %v5370_v45 }
  0xdd   : > { %967 = vst.msk [vmem:[#allocation3 + $0x38] sm:$0xff] %vm621_vm4, %v927_v36 }
  0xde   : > { %713 = vst.msk [vmem:[#allocation3 + $0x48] sm:$0xff] %vm205_vm0, %v5387_v35  ;;  %1590 = vrot.lane.b32.xlu1 %v1543_v24, %s5052_s18  ;;  %v465_v33 = vpop.permute.xlu0 %464  ;;  %1716 = vrot.lane.b32.xlu0 %v5483_v40, %s5053_s19 }
  0xdf   : > { %503 = vst.msk [vmem:[#allocation3 + $0x50] sm:$0xff] %vm492_vm3, %v465_v33  ;;  %v686_v33 = vld [vmem:[#allocation2 + $0x180] sm:$0xff] }
  0xe0   : > { %v467_v50 = vpop.permute.xlu1 %466 }
  0xe1   : > { %504 = vst.msk [vmem:[#allocation3 + $0x58] sm:$0xff] %vm492_vm3, %v467_v50 }
  0xe2   : > { %1718 = vrot.lane.b32.xlu1 %v1671_v52, %s5053_s19  ;;  %v594_v28 = vpop.permute.xlu0 %593  ;;  %v982_v31 = vld [vmem:[#allocation3 + $0x30] sm:$0xff] }
  0xe3   : > { %632 = vst.msk [vmem:[#allocation3 + $0x50] sm:$0xff] %vm621_vm4, %v594_v28  ;;  %4700 = vmatprep.mubr.msk.bf16.mxu0 %vm1000_vm5, %v982_v31 }
  0xe4   : > { %v596_v41 = vpop.permute.xlu1 %595  ;;  %v983_v46 = vld [vmem:[#allocation3 + $0x38] sm:$0xff]  ;;  %1486 = vst.msk [vmem:[#allocation3 + $0x30] sm:$0xff] %vm205_vm0, %v5362_v57 }
  0xe5   : > { %633 = vst.msk [vmem:[#allocation3 + $0x58] sm:$0xff] %vm621_vm4, %v596_v41  ;;  %4701 = vmatmul.mubr.msk.bf16.gmra.mrb[12].mxu0 %vm1000_vm5, %v983_v46  ;;  %v687_v41 = vld [vmem:[#allocation2 + $0x188] sm:$0xff]  ;;  %v260_v46 = vld [vmem:[#allocation2 + $0x19a] sm:$0x1] }
  0xe6   : > { %1487 = vst.msk [vmem:[#allocation3 + $0x38] sm:$0xff] %vm205_vm0, %v5370_v45  ;;  %v801_v40 = vpop.permute.xlu0 %800 }
  0xe7   : > { %840 = vst.msk [vmem:[#allocation3 + $0x40] sm:$0xff] %vm492_vm3, %v801_v40 }
  0xe8   : > { %v803_v58 = vpop.permute.xlu1 %802  ;;  %279 = vst.msk [vmem:[#allocation2 + $0x198] sm:$0x1] %vm261_vm1, %v260_v46 }
  0xe9   : > { %841 = vst.msk [vmem:[#allocation3 + $0x48] sm:$0xff] %vm492_vm3, %v803_v58  ;;  %v703_v58 = vpack.c.bf16 %v687_v41, %v686_v33 }
  0xea   : > { %v929_v25 = vpop.permute.xlu0 %928  ;;  %v5645_v45 = vld [vmem:[#allocation3 + $0x50] sm:$0xff] }
  0xeb   : > { %968 = vst.msk [vmem:[#allocation3 + $0x40] sm:$0xff] %vm621_vm4, %v929_v25 }
  0xec   : > { %v931_v43 = vpop.permute.xlu1 %930  ;;  %v5642_v37 = vld [vmem:[#allocation3 + $0x58] sm:$0xff]  ;;  %714 = vst.msk [vmem:[#allocation3 + $0x50] sm:$0xff] %vm205_vm0, %v5389_v44 }
  0xed   : > { %969 = vst.msk [vmem:[#allocation3 + $0x48] sm:$0xff] %vm621_vm4, %v931_v43 }
  0xee   : > { %715 = vst.msk [vmem:[#allocation3 + $0x58] sm:$0xff] %vm205_vm0, %v5414_v47  ;;  %v469_v61 = vpop.permute.xlu0 %468 }
  0xef   : > { %505 = vst.msk [vmem:[#allocation3 + $0x60] sm:$0xff] %vm492_vm3, %v469_v61 }
  0xf0   : > { %v471_v57 = vpop.permute.xlu1 %470 }
  0xf1   : > { %506 = vst.msk [vmem:[#allocation3 + $0x68] sm:$0xff] %vm492_vm3, %v471_v57 }
  0xf2   : > { %v598_v51 = vpop.permute.xlu0 %597  ;;  %v984_v63 = vld [vmem:[#allocation3 + $0x40] sm:$0xff] }
  0xf3   : > { %634 = vst.msk [vmem:[#allocation3 + $0x60] sm:$0xff] %vm621_vm4, %v598_v51  ;;  %4704 = vmatprep.mubr.msk.bf16.mxu0 %vm1000_vm5, %v984_v63  ;;  %v1462_v63 = vld [vmem:[#allocation2 + $0x198] sm:$0xff] }
  0xf4   : > { %v600_v26 = vpop.permute.xlu1 %599  ;;  %v985_v30 = vld [vmem:[#allocation3 + $0x48] sm:$0xff]  ;;  %1488 = vst.msk [vmem:[#allocation3 + $0x40] sm:$0xff] %vm205_vm0, %v5387_v35 }
  0xf5   : > { %635 = vst.msk [vmem:[#allocation3 + $0x68] sm:$0xff] %vm621_vm4, %v600_v26  ;;  %4705 = vmatmul.mubr.msk.bf16.gmra.mrb[16].mxu0 %vm1000_vm5, %v985_v30 }
  0xf6   : > { %1489 = vst.msk [vmem:[#allocation3 + $0x48] sm:$0xff] %vm205_vm0, %v5389_v44  ;;  %v805_v20 = vpop.permute.xlu0 %804 }
  0xf7   : > { %842 = vst.msk [vmem:[#allocation3 + $0x50] sm:$0xff] %vm492_vm3, %v805_v20 }
  0xf8   : > { %v807_v39 = vpop.permute.xlu1 %806 }
  0xf9   : > { %843 = vst.msk [vmem:[#allocation3 + $0x58] sm:$0xff] %vm492_vm3, %v807_v39  ;;  %v1463_v39 = vld [vmem:[#allocation2 + $0x1a0] sm:$0xff] }
  0xfa   : > { %v933_v38 = vpop.permute.xlu0 %932  ;;  %v5667_v44 = vld [vmem:[#allocation3 + $0x60] sm:$0xff] }
  0xfb   : > { %970 = vst.msk [vmem:[#allocation3 + $0x50] sm:$0xff] %vm621_vm4, %v933_v38  ;;  %v1479_v38 = vpack.c.bf16 %v1463_v39, %v1462_v63 }
  0xfc   : > { %v935_v21 = vpop.permute.xlu1 %934  ;;  %v5664_v24 = vld [vmem:[#allocation3 + $0x68] sm:$0xff]  ;;  %716 = vst.msk [vmem:[#allocation3 + $0x60] sm:$0xff] %vm205_vm0, %v5416_v49 }
  0xfd   : > { %971 = vst.msk [vmem:[#allocation3 + $0x58] sm:$0xff] %vm621_vm4, %v935_v21 }
  0xfe   : > { %717 = vst.msk [vmem:[#allocation3 + $0x68] sm:$0xff] %vm205_vm0, %v5435_v42  ;;  %v473_v55 = vpop.permute.xlu0 %472 }
  0xff   : > { %507 = vst.msk [vmem:[#allocation3 + $0x70] sm:$0xff] %vm492_vm3, %v473_v55 }
 0x100   : > { %v475_v35 = vpop.permute.xlu1 %474 }
 0x101   : > { %508 = vst.msk [vmem:[#allocation3 + $0x78] sm:$0xff] %vm492_vm3, %v475_v35 }
 0x102   : > { %v602_v52 = vpop.permute.xlu0 %601  ;;  %v986_v50 = vld [vmem:[#allocation3 + $0x50] sm:$0xff] }
 0x103   : > { %636 = vst.msk [vmem:[#allocation3 + $0x70] sm:$0xff] %vm621_vm4, %v602_v52  ;;  %4708 = vmatprep.mubr.msk.bf16.mxu0 %vm1000_vm5, %v986_v50  ;;  %v1825_v50 = vsel %vm1049_vm2, %v5537_v56, 0 }
 0x104   : > { %v604_v36 = vpop.permute.xlu1 %603  ;;  %v987_v62 = vld [vmem:[#allocation3 + $0x58] sm:$0xff]  ;;  %1490 = vst.msk [vmem:[#allocation3 + $0x50] sm:$0xff] %vm205_vm0, %v5414_v47 }
 0x105   : > { %637 = vst.msk [vmem:[#allocation3 + $0x78] sm:$0xff] %vm621_vm4, %v604_v36  ;;  %4709 = vmatmul.mubr.msk.bf16.gmra.mrb[20].mxu0 %vm1000_vm5, %v987_v62 }
 0x106   : > { %1491 = vst.msk [vmem:[#allocation3 + $0x58] sm:$0xff] %vm205_vm0, %v5416_v49  ;;  %v809_v31 = vpop.permute.xlu0 %808 }
 0x107   : > { %844 = vst.msk [vmem:[#allocation3 + $0x60] sm:$0xff] %vm492_vm3, %v809_v31 }
 0x108   : > { %v811_v28 = vpop.permute.xlu1 %810 }
 0x109   : > { %845 = vst.msk [vmem:[#allocation3 + $0x68] sm:$0xff] %vm492_vm3, %v811_v28 }
 0x10a   : > { %v937_v43 = vpop.permute.xlu0 %936  ;;  %v5690_v25 = vld [vmem:[#allocation3 + $0x70] sm:$0xff] }
 0x10b   : > { %972 = vst.msk [vmem:[#allocation3 + $0x60] sm:$0xff] %vm621_vm4, %v937_v43 }
 0x10c   : > { %v939_v49 = vpop.permute.xlu1 %938  ;;  %v5687_v40 = vld [vmem:[#allocation3 + $0x78] sm:$0xff]  ;;  %718 = vst.msk [vmem:[#allocation3 + $0x70] sm:$0xff] %vm205_vm0, %v5437_v53 }
 0x10d   : > { %973 = vst.msk [vmem:[#allocation3 + $0x68] sm:$0xff] %vm621_vm4, %v939_v49 }
 0x10e   : > { %719 = vst.msk [vmem:[#allocation3 + $0x78] sm:$0xff] %vm205_vm0, %v703_v58  ;;  %v813_v57 = vpop.permute.xlu0 %812 }
 0x10f   : > { %846 = vst.msk [vmem:[#allocation3 + $0x70] sm:$0xff] %vm492_vm3, %v813_v57 }
 0x110   : > { %v815_v47 = vpop.permute.xlu1 %814 }
 0x111   : > { %847 = vst.msk [vmem:[#allocation3 + $0x78] sm:$0xff] %vm492_vm3, %v815_v47 }
 0x112   : > { %v941_v30 = vpop.permute.xlu0 %940  ;;  %v988_v51 = vld [vmem:[#allocation3 + $0x60] sm:$0xff] }
 0x113   : > { %974 = vst.msk [vmem:[#allocation3 + $0x70] sm:$0xff] %vm621_vm4, %v941_v30  ;;  %4712 = vmatprep.mubr.msk.bf16.mxu0 %vm1000_vm5, %v988_v51 }
 0x114   : > { %v943_v61 = vpop.permute.xlu1 %942  ;;  %v989_v26 = vld [vmem:[#allocation3 + $0x68] sm:$0xff]  ;;  %1492 = vst.msk [vmem:[#allocation3 + $0x60] sm:$0xff] %vm205_vm0, %v5435_v42 }
 0x115   : > { %975 = vst.msk [vmem:[#allocation3 + $0x78] sm:$0xff] %vm621_vm4, %v943_v61  ;;  %4713 = vmatmul.mubr.msk.bf16.gmra.mrb[24].mxu0 %vm1000_vm5, %v989_v26 }
 0x116   : > { %1493 = vst.msk [vmem:[#allocation3 + $0x68] sm:$0xff] %vm205_vm0, %v5437_v53  ;;  %v1561_v21 = vpop.permute.xlu0 %1560 }
 0x117   : > { %1608 = vst.msk [vmem:[#allocation3] sm:$0xff] %vm492_vm3, %v1561_v21 }
 0x118   : > { %v1563_v20 = vpop.permute.xlu1 %1562 }
 0x119   : > { %1609 = vst.msk [vmem:[#allocation3 + $0x8] sm:$0xff] %vm492_vm3, %v1563_v20 }
 0x11a   : > { %v990_v55 = vld [vmem:[#allocation3 + $0x70] sm:$0xff]  ;;  %v1689_v36 = vpop.permute.xlu0 %1688 }
 0x11b   : > { %4716 = vmatprep.mubr.msk.bf16.mxu0 %vm1000_vm5, %v990_v55  ;;  %1736 = vst.msk [vmem:[#allocation3] sm:$0xff] %vm621_vm4, %v1689_v36 }
 0x11c   : > { %v991_v35 = vld [vmem:[#allocation3 + $0x78] sm:$0xff]  ;;  %v1691_v53 = vpop.permute.xlu1 %1690  ;;  %1494 = vst.msk [vmem:[#allocation3 + $0x70] sm:$0xff] %vm205_vm0, %v703_v58 }
 0x11d   : > { %1737 = vst.msk [vmem:[#allocation3 + $0x8] sm:$0xff] %vm621_vm4, %v1691_v53  ;;  %4717 = vmatmul.mubr.msk.bf16.gmra.mrb[28].mxu0 %vm1000_vm5, %v991_v35 }
 0x11e   : > { %1495 = vst.msk [vmem:[#allocation3 + $0x78] sm:$0xff] %vm205_vm0, %v1479_v38  ;;  %4722 = vmatprep.mubr.msk.bf16.mxu0 %vm1000_vm5, %v5500_v29  ;;  %v1565_v62 = vpop.permute.xlu0 %1564 }
 0x11f   : > { %1610 = vst.msk [vmem:[#allocation3 + $0x10] sm:$0xff] %vm492_vm3, %v1565_v62 }
 0x120   : > { %v1567_v42 = vpop.permute.xlu1 %1566 }
 0x121   : > { %1611 = vst.msk [vmem:[#allocation3 + $0x18] sm:$0xff] %vm492_vm3, %v1567_v42 }
 0x122   : > { %v1693_v33 = vpop.permute.xlu0 %1692 }
 0x123   : > { %1738 = vst.msk [vmem:[#allocation3 + $0x10] sm:$0xff] %vm621_vm4, %v1693_v33 }
 0x124   : > { %v1695_v52 = vpop.permute.xlu1 %1694 }
 0x125   : > { %1739 = vst.msk [vmem:[#allocation3 + $0x18] sm:$0xff] %vm621_vm4, %v1695_v52  ;;  %4723 = vmatmul.mubr.msk.bf16.vlgmr.msra.gmra.mrb[0].mxu0 %vm1000_vm5, %v5509_v59 }
 0x126   : > { %4755 = vmatpush3.bf16.msra.mxu0 %v1825_v50  ;;  %4726 = vmatprep.mubr.msk.bf16.mxu0 %vm1000_vm5, %v5522_v48  ;;  %v1569_v41 = vpop.permute.xlu0 %1568 }
 0x127   : > { %1612 = vst.msk [vmem:[#allocation3 + $0x20] sm:$0xff] %vm492_vm3, %v1569_v41 }
 0x128   : > { %v1571_v29 = vpop.permute.xlu1 %1570 }
 0x129   : > { %1613 = vst.msk [vmem:[#allocation3 + $0x28] sm:$0xff] %vm492_vm3, %v1571_v29 }
 0x12a   : > { %v1697_v56 = vpop.permute.xlu0 %1696  ;;  %v1754_v51 = vld [vmem:[#allocation3 + $0x10] sm:$0xff] }
 0x12b   : > { %1740 = vst.msk [vmem:[#allocation3 + $0x20] sm:$0xff] %vm621_vm4, %v1697_v56 }
 0x12c   : > { %v1699_v46 = vpop.permute.xlu1 %1698  ;;  %v1755_v63 = vld [vmem:[#allocation3 + $0x18] sm:$0xff] }
 0x12d   : > { %1741 = vst.msk [vmem:[#allocation3 + $0x28] sm:$0xff] %vm621_vm4, %v1699_v46  ;;  %4727 = vmatmul.mubr.msk.bf16.gmra.mrb[4].mxu0 %vm1000_vm5, %v5519_v32 }
 0x12e   : > { %4730 = vmatprep.mubr.msk.bf16.mxu0 %vm1000_vm5, %v5549_v23  ;;  %v1573_v48 = vpop.permute.xlu0 %1572 }
 0x12f   : > { %1614 = vst.msk [vmem:[#allocation3 + $0x30] sm:$0xff] %vm492_vm3, %v1573_v48 }
 0x130   : > { %v1575_v59 = vpop.permute.xlu1 %1574 }
 0x131   : > { %1615 = vst.msk [vmem:[#allocation3 + $0x38] sm:$0xff] %vm492_vm3, %v1575_v59 }
 0x132   : > { %v1701_v31 = vpop.permute.xlu0 %1700  ;;  %v1756_v39 = vld [vmem:[#allocation3 + $0x20] sm:$0xff] }
 0x133   : > { %1742 = vst.msk [vmem:[#allocation3 + $0x30] sm:$0xff] %vm621_vm4, %v1701_v31 }
 0x134   : > { %v1703_v28 = vpop.permute.xlu1 %1702 }
 0x135   : > { %1743 = vst.msk [vmem:[#allocation3 + $0x38] sm:$0xff] %vm621_vm4, %v1703_v28  ;;  %4731 = vmatmul.mubr.msk.bf16.gmra.mrb[8].mxu0 %vm1000_vm5, %v5546_v54 }
 0x136   : > { %4734 = vmatprep.mubr.msk.bf16.mxu0 %vm1000_vm5, %v5581_v34  ;;  %v1577_v23 = vpop.permute.xlu0 %1576 }
 0x137   : > { %1616 = vst.msk [vmem:[#allocation3 + $0x40] sm:$0xff] %vm492_vm3, %v1577_v23 }
 0x138   : > { %v1579_v32 = vpop.permute.xlu1 %1578 }
 0x139   : > { %1617 = vst.msk [vmem:[#allocation3 + $0x48] sm:$0xff] %vm492_vm3, %v1579_v32 }
 0x13a   : > { %v1705_v49 = vpop.permute.xlu0 %1704 }
 0x13b   : > { %1744 = vst.msk [vmem:[#allocation3 + $0x40] sm:$0xff] %vm621_vm4, %v1705_v49 }
 0x13c   : > { %v1707_v58 = vpop.permute.xlu1 %1706 }
 0x13d   : > { %1745 = vst.msk [vmem:[#allocation3 + $0x48] sm:$0xff] %vm621_vm4, %v1707_v58  ;;  %4735 = vmatmul.mubr.msk.bf16.gmra.mrb[12].mxu0 %vm1000_vm5, %v5578_v22 }
 0x13e   : > { %4738 = vmatprep.mubr.msk.bf16.mxu0 %vm1000_vm5, %v5617_v27  ;;  %v1581_v34 = vpop.permute.xlu0 %1580 }
 0x13f   : > { %1618 = vst.msk [vmem:[#allocation3 + $0x50] sm:$0xff] %vm492_vm3, %v1581_v34 }
 0x140   : > { %v1583_v54 = vpop.permute.xlu1 %1582 }
 0x141   : > { %1619 = vst.msk [vmem:[#allocation3 + $0x58] sm:$0xff] %vm492_vm3, %v1583_v54 }
 0x142   : > { %v1709_v47 = vpop.permute.xlu0 %1708  ;;  %v1760_v20 = vld [vmem:[#allocation3 + $0x40] sm:$0xff] }
 0x143   : > { %1746 = vst.msk [vmem:[#allocation3 + $0x50] sm:$0xff] %vm621_vm4, %v1709_v47 }
 0x144   : > { %v1711_v43 = vpop.permute.xlu1 %1710  ;;  %v1761_v21 = vld [vmem:[#allocation3 + $0x48] sm:$0xff] }
 0x145   : > { %1747 = vst.msk [vmem:[#allocation3 + $0x58] sm:$0xff] %vm621_vm4, %v1711_v43  ;;  %4739 = vmatmul.mubr.msk.bf16.gmra.mrb[16].mxu0 %vm1000_vm5, %v5614_v60 }
 0x146   : > { %4742 = vmatprep.mubr.msk.bf16.mxu0 %vm1000_vm5, %v5645_v45  ;;  %v1585_v27 = vpop.permute.xlu0 %1584 }
 0x147   : > { %1620 = vst.msk [vmem:[#allocation3 + $0x60] sm:$0xff] %vm492_vm3, %v1585_v27 }
 0x148   : > { %v1587_v22 = vpop.permute.xlu1 %1586 }
 0x149   : > { %1621 = vst.msk [vmem:[#allocation3 + $0x68] sm:$0xff] %vm492_vm3, %v1587_v22 }
 0x14a   : > { %v1713_v61 = vpop.permute.xlu0 %1712  ;;  %v1762_v38 = vld [vmem:[#allocation3 + $0x50] sm:$0xff] }
 0x14b   : > { %1748 = vst.msk [vmem:[#allocation3 + $0x60] sm:$0xff] %vm621_vm4, %v1713_v61 }
 0x14c   : > { %v1715_v57 = vpop.permute.xlu1 %1714  ;;  %v1763_v35 = vld [vmem:[#allocation3 + $0x58] sm:$0xff] }
 0x14d   : > { %1749 = vst.msk [vmem:[#allocation3 + $0x68] sm:$0xff] %vm621_vm4, %v1715_v57  ;;  %4743 = vmatmul.mubr.msk.bf16.gmra.mrb[20].mxu0 %vm1000_vm5, %v5642_v37  ;;  %v1752_v37 = vld [vmem:[#allocation3] sm:$0xff] }
 0x14e   : > { %4746 = vmatprep.mubr.msk.bf16.mxu0 %vm1000_vm5, %v5667_v44  ;;  %v1589_v45 = vpop.permute.xlu0 %1588  ;;  %v1753_v44 = vld [vmem:[#allocation3 + $0x8] sm:$0xff] }
 0x14f   : > { %1622 = vst.msk [vmem:[#allocation3 + $0x70] sm:$0xff] %vm492_vm3, %v1589_v45 }
 0x150   : > { %v1591_v60 = vpop.permute.xlu1 %1590 }
 0x151   : > { %1623 = vst.msk [vmem:[#allocation3 + $0x78] sm:$0xff] %vm492_vm3, %v1591_v60 }
 0x152   : > { %v1717_v30 = vpop.permute.xlu0 %1716  ;;  %v1764_v53 = vld [vmem:[#allocation3 + $0x60] sm:$0xff] }
 0x153   : > { %1750 = vst.msk [vmem:[#allocation3 + $0x70] sm:$0xff] %vm621_vm4, %v1717_v30 }
 0x154   : > { %v1719_v26 = vpop.permute.xlu1 %1718  ;;  %v1765_v55 = vld [vmem:[#allocation3 + $0x68] sm:$0xff] }
 0x155   : > { %1751 = vst.msk [vmem:[#allocation3 + $0x78] sm:$0xff] %vm621_vm4, %v1719_v26  ;;  %4747 = vmatmul.mubr.msk.bf16.gmra.mrb[24].mxu0 %vm1000_vm5, %v5664_v24  ;;  %v1757_v24 = vld [vmem:[#allocation3 + $0x28] sm:$0xff] }
 0x156   : > { %4750 = vmatprep.mubr.msk.bf16.mxu0 %vm1000_vm5, %v5690_v25  ;;  %v1758_v25 = vld [vmem:[#allocation3 + $0x30] sm:$0xff] }
 0x15a   : > { %v1766_v36 = vld [vmem:[#allocation3 + $0x70] sm:$0xff] }
 0x15c   : > { %v1767_v42 = vld [vmem:[#allocation3 + $0x78] sm:$0xff] }
 0x15d   : > { %4751 = vmatmul.mubr.msk.bf16.gmra.mrb[28].mxu0 %vm1000_vm5, %v5687_v40  ;;  %v1759_v40 = vld [vmem:[#allocation3 + $0x38] sm:$0xff] }
 0x15e   : > { %4756 = vmatprep.mubr.msk.bf16.mxu0 %vm1000_vm5, %v1752_v37 }
 0x165   : > { %4757 = vmatmul.mubr.msk.bf16.vlgmr.msra.gmra.mrb[0].mxu0 %vm1000_vm5, %v1753_v44 }
 0x166   : > { %4760 = vmatprep.mubr.msk.bf16.mxu0 %vm1000_vm5, %v1754_v51 }
 0x16d   : > { %4761 = vmatmul.mubr.msk.bf16.gmra.mrb[4].mxu0 %vm1000_vm5, %v1755_v63 }
 0x16e   : > { %4764 = vmatprep.mubr.msk.bf16.mxu0 %vm1000_vm5, %v1756_v39 }
 0x175   : > { %4765 = vmatmul.mubr.msk.bf16.gmra.mrb[8].mxu0 %vm1000_vm5, %v1757_v24 }
 0x176   : > { %4768 = vmatprep.mubr.msk.bf16.mxu0 %vm1000_vm5, %v1758_v25 }
 0x17d   : > { %4769 = vmatmul.mubr.msk.bf16.gmra.mrb[12].mxu0 %vm1000_vm5, %v1759_v40 }
 0x17e   : > { %4772 = vmatprep.mubr.msk.bf16.mxu0 %vm1000_vm5, %v1760_v20 }
 0x185   : > { %4773 = vmatmul.mubr.msk.bf16.gmra.mrb[16].mxu0 %vm1000_vm5, %v1761_v21 }
 0x186   : > { %4776 = vmatprep.mubr.msk.bf16.mxu0 %vm1000_vm5, %v1762_v38 }
 0x18d   : > { %4777 = vmatmul.mubr.msk.bf16.gmra.mrb[20].mxu0 %vm1000_vm5, %v1763_v35 }
 0x18e   : > { %4780 = vmatprep.mubr.msk.bf16.mxu0 %vm1000_vm5, %v1764_v53 }
 0x195   : > { %4781 = vmatmul.mubr.msk.bf16.gmra.mrb[24].mxu0 %vm1000_vm5, %v1765_v55 }
 0x196   : > { %4784 = vmatprep.mubr.msk.bf16.mxu0 %vm1000_vm5, %v1766_v36 }
 0x19d   : > { %4785 = vmatmul.mubr.msk.bf16.gmra.mrb[28].mxu0 %vm1000_vm5, %v1767_v42 }
 0x238   : > { %v5792_v62 = vpop.f32.mrb[0].mxu0 }
 0x239   : > { %v5794_v52 = vpop.f32.mrb[1].mxu0  ;;  %v2093_v41 = vmul.f32 %v5792_v62, %v5792_v62  ;;  %v2023_v28 = vsel %vm205_vm0, %v5792_v62, 0.0 }
 0x23a   : > { %v2091_v50 = vmul.f32 %v5794_v52, %v5794_v52  ;;  %v5798_v33 = vpop.f32.mrb[2].mxu0  ;;  %v2020_v46 = vsel %vm205_vm0, %v5794_v52, 0.0 }
 0x23b   : > { %v5800_v29 = vpop.f32.mrb[3].mxu0  ;;  %v2094_v32 = vmul.f32 %v5798_v33, %v5798_v33  ;;  %v2126_v54 = vsel %vm205_vm0, %v2093_v41, 0.0  ;;  %v2025_v34 = vsel %vm205_vm0, %v5798_v33, 0.0 }
 0x23c   : > { %v2021_v56 = vsel %vm205_vm0, %v5800_v29, 0.0  ;;  %v2092_v59 = vmul.f32 %v5800_v29, %v5800_v29  ;;  %v2123_v31 = vsel %vm205_vm0, %v2091_v50, 0.0 }
 0x23d   : > { %v2022_v48 = vadd.f32 %v2021_v56, %v2020_v46  ;;  %v2128_v57 = vsel %vm205_vm0, %v2094_v32, 0.0 }
 0x23e   : > { %v2124_v23 = vsel %vm205_vm0, %v2092_v59, 0.0 }
 0x23f   : > { %v2024_v58 = vadd.f32 %v2023_v28, %v2022_v48  ;;  %v2125_v49 = vadd.f32 %v2124_v23, %v2123_v31 }
 0x240   : > { %v5819_v43 = vpop.f32.mrb[4].mxu0 }
 0x241   : > { %v2127_v47 = vadd.f32 %v2126_v54, %v2125_v49  ;;  %v5821_v22 = vpop.f32.mrb[5].mxu0  ;;  %v2026_v27 = vadd.f32 %v2025_v34, %v2024_v58  ;;  %v2097_v44 = vmul.f32 %v5819_v43, %v5819_v43  ;;  %v2031_v40 = vsel %vm205_vm0, %v5819_v43, 0.0 }
 0x242   : > { %v2027_v61 = vsel %vm205_vm0, %v5821_v22, 0.0  ;;  %v2095_v60 = vmul.f32 %v5821_v22, %v5821_v22  ;;  %v5828_v45 = vpop.f32.mrb[6].mxu0 }
 0x243   : > { %v2028_v26 = vadd.f32 %v2027_v61, %v2026_v27  ;;  %v2129_v30 = vadd.f32 %v2128_v57, %v2127_v47  ;;  %v5830_v37 = vpop.f32.mrb[7].mxu0  ;;  %v2098_v20 = vmul.f32 %v5828_v45, %v5828_v45  ;;  %v2134_v53 = vsel %vm205_vm0, %v2097_v44, 0.0 }
 0x244   : > { %v2130_v51 = vsel %vm205_vm0, %v2095_v60, 0.0  ;;  %v2029_v63 = vsel %vm205_vm0, %v5830_v37, 0.0  ;;  %v2096_v39 = vmul.f32 %v5830_v37, %v5830_v37  ;;  %v2033_v55 = vsel %vm205_vm0, %v5828_v45, 0.0 }
 0x245   : > { %v2131_v24 = vadd.f32 %v2130_v51, %v2129_v30  ;;  %v2030_v25 = vadd.f32 %v2029_v63, %v2028_v26  ;;  %v2136_v46 = vsel %vm205_vm0, %v2098_v20, 0.0 }
 0x246   : > { %v2132_v21 = vsel %vm205_vm0, %v2096_v39, 0.0 }
 0x247   : > { %v2032_v38 = vadd.f32 %v2031_v40, %v2030_v25  ;;  %v2133_v35 = vadd.f32 %v2132_v21, %v2131_v24 }
 0x248   : > { %v5847_v36 = vpop.f32.mrb[8].mxu0 }
 0x249   : > { %v2135_v42 = vadd.f32 %v2134_v53, %v2133_v35  ;;  %v5849_v50 = vpop.f32.mrb[9].mxu0  ;;  %v2034_v41 = vadd.f32 %v2033_v55, %v2032_v38  ;;  %v2101_v23 = vmul.f32 %v5847_v36, %v5847_v36  ;;  %v2039_v27 = vsel %vm205_vm0, %v5847_v36, 0.0 }
 0x24a   : > { %v2035_v56 = vsel %vm205_vm0, %v5849_v50, 0.0  ;;  %v2099_v59 = vmul.f32 %v5849_v50, %v5849_v50  ;;  %v5856_v48 = vpop.f32.mrb[10].mxu0 }
 0x24b   : > { %v2036_v28 = vadd.f32 %v2035_v56, %v2034_v41  ;;  %v2137_v31 = vadd.f32 %v2136_v46, %v2135_v42  ;;  %v5858_v32 = vpop.f32.mrb[11].mxu0  ;;  %v2102_v57 = vmul.f32 %v5856_v48, %v5856_v48  ;;  %v2142_v30 = vsel %vm205_vm0, %v2101_v23, 0.0 }
 0x24c   : > { %v2138_v58 = vsel %vm205_vm0, %v2099_v59, 0.0  ;;  %v2037_v49 = vsel %vm205_vm0, %v5858_v32, 0.0  ;;  %v2100_v54 = vmul.f32 %v5858_v32, %v5858_v32  ;;  %v2041_v44 = vsel %vm205_vm0, %v5856_v48, 0.0 }
 0x24d   : > { %v2139_v34 = vadd.f32 %v2138_v58, %v2137_v31  ;;  %v2038_v47 = vadd.f32 %v2037_v49, %v2036_v28  ;;  %v2144_v25 = vsel %vm205_vm0, %v2102_v57, 0.0 }
 0x24e   : > { %v2140_v61 = vsel %vm205_vm0, %v2100_v54, 0.0 }
 0x24f   : > { %v2040_v60 = vadd.f32 %v2039_v27, %v2038_v47  ;;  %v2141_v26 = vadd.f32 %v2140_v61, %v2139_v34 }
 0x250   : > { %v5875_v51 = vpop.f32.mrb[12].mxu0 }
 0x251   : > { %v2143_v63 = vadd.f32 %v2142_v30, %v2141_v26  ;;  %v5877_v39 = vpop.f32.mrb[13].mxu0  ;;  %v2042_v24 = vadd.f32 %v2041_v44, %v2040_v60  ;;  %v2105_v55 = vmul.f32 %v5875_v51, %v5875_v51  ;;  %v2047_v28 = vsel %vm205_vm0, %v5875_v51, 0.0 }
 0x252   : > { %v2043_v40 = vsel %vm205_vm0, %v5877_v39, 0.0  ;;  %v2103_v20 = vmul.f32 %v5877_v39, %v5877_v39  ;;  %v5884_v21 = vpop.f32.mrb[14].mxu0 }
 0x253   : > { %v2044_v38 = vadd.f32 %v2043_v40, %v2042_v24  ;;  %v2145_v35 = vadd.f32 %v2144_v25, %v2143_v63  ;;  %v5886_v53 = vpop.f32.mrb[15].mxu0  ;;  %v2106_v31 = vmul.f32 %v5884_v21, %v5884_v21  ;;  %v2150_v54 = vsel %vm205_vm0, %v2105_v55, 0.0 }
 0x254   : > { %v2146_v42 = vsel %vm205_vm0, %v2103_v20, 0.0  ;;  %v2045_v41 = vsel %vm205_vm0, %v5886_v53, 0.0  ;;  %v2104_v46 = vmul.f32 %v5886_v53, %v5886_v53  ;;  %v2049_v34 = vsel %vm205_vm0, %v5884_v21, 0.0 }
 0x255   : > { %v2147_v56 = vadd.f32 %v2146_v42, %v2145_v35  ;;  %v2046_v59 = vadd.f32 %v2045_v41, %v2044_v38  ;;  %v2152_v60 = vsel %vm205_vm0, %v2106_v31, 0.0 }
 0x256   : > { %v2148_v23 = vsel %vm205_vm0, %v2104_v46, 0.0 }
 0x257   : > { %v2048_v58 = vadd.f32 %v2047_v28, %v2046_v59  ;;  %v2149_v49 = vadd.f32 %v2148_v23, %v2147_v56 }
 0x258   : > { %v5903_v47 = vpop.f32.mrb[16].mxu0 }
 0x259   : > { %v2151_v27 = vadd.f32 %v2150_v54, %v2149_v49  ;;  %v5905_v57 = vpop.f32.mrb[17].mxu0  ;;  %v2050_v61 = vadd.f32 %v2049_v34, %v2048_v58  ;;  %v2109_v40 = vmul.f32 %v5903_v47, %v5903_v47  ;;  %v2055_v41 = vsel %vm205_vm0, %v5903_v47, 0.0 }
 0x25a   : > { %v2051_v26 = vsel %vm205_vm0, %v5905_v57, 0.0  ;;  %v2107_v30 = vmul.f32 %v5905_v57, %v5905_v57  ;;  %v5912_v44 = vpop.f32.mrb[18].mxu0 }
 0x25b   : > { %v2052_v63 = vadd.f32 %v2051_v26, %v2050_v61  ;;  %v2153_v24 = vadd.f32 %v2152_v60, %v2151_v27  ;;  %v5914_v25 = vpop.f32.mrb[19].mxu0  ;;  %v2110_v46 = vmul.f32 %v5912_v44, %v5912_v44  ;;  %v2158_v31 = vsel %vm205_vm0, %v2109_v40, 0.0 }
 0x25c   : > { %v2154_v20 = vsel %vm205_vm0, %v2107_v30, 0.0  ;;  %v2053_v38 = vsel %vm205_vm0, %v5914_v25, 0.0  ;;  %v2108_v35 = vmul.f32 %v5914_v25, %v5914_v25  ;;  %v2057_v23 = vsel %vm205_vm0, %v5912_v44, 0.0 }
 0x25d   : > { %v2155_v55 = vadd.f32 %v2154_v20, %v2153_v24  ;;  %v2054_v42 = vadd.f32 %v2053_v38, %v2052_v63  ;;  %v2160_v27 = vsel %vm205_vm0, %v2110_v46, 0.0 }
 0x25e   : > { %v2156_v56 = vsel %vm205_vm0, %v2108_v35, 0.0 }
 0x25f   : > { %v2056_v59 = vadd.f32 %v2055_v41, %v2054_v42  ;;  %v2157_v28 = vadd.f32 %v2156_v56, %v2155_v55 }
 0x260   : > { %v5931_v58 = vpop.f32.mrb[20].mxu0 }
 0x261   : > { %v2159_v49 = vadd.f32 %v2158_v31, %v2157_v28  ;;  %v5933_v54 = vpop.f32.mrb[21].mxu0  ;;  %v2058_v34 = vadd.f32 %v2057_v23, %v2056_v59  ;;  %v2113_v40 = vmul.f32 %v5931_v58, %v5931_v58  ;;  %v2063_v41 = vsel %vm205_vm0, %v5931_v58, 0.0 }
 0x262   : > { %v2059_v61 = vsel %vm205_vm0, %v5933_v54, 0.0  ;;  %v2111_v60 = vmul.f32 %v5933_v54, %v5933_v54  ;;  %v5940_v26 = vpop.f32.mrb[22].mxu0 }
 0x263   : > { %v2060_v30 = vadd.f32 %v2059_v61, %v2058_v34  ;;  %v2161_v63 = vadd.f32 %v2160_v27, %v2159_v49  ;;  %v5942_v24 = vpop.f32.mrb[23].mxu0  ;;  %v2114_v46 = vmul.f32 %v5940_v26, %v5940_v26  ;;  %v2166_v31 = vsel %vm205_vm0, %v2113_v40, 0.0 }
 0x264   : > { %v2162_v20 = vsel %vm205_vm0, %v2111_v60, 0.0  ;;  %v2061_v38 = vsel %vm205_vm0, %v5942_v24, 0.0  ;;  %v2112_v35 = vmul.f32 %v5942_v24, %v5942_v24  ;;  %v2065_v23 = vsel %vm205_vm0, %v5940_v26, 0.0 }
 0x265   : > { %v2163_v55 = vadd.f32 %v2162_v20, %v2161_v63  ;;  %v2062_v42 = vadd.f32 %v2061_v38, %v2060_v30  ;;  %v2168_v60 = vsel %vm205_vm0, %v2114_v46, 0.0 }
 0x266   : > { %v2164_v56 = vsel %vm205_vm0, %v2112_v35, 0.0 }
 0x267   : > { %v2064_v59 = vadd.f32 %v2063_v41, %v2062_v42  ;;  %v2165_v28 = vadd.f32 %v2164_v56, %v2163_v55 }
 0x268   : > { %v5959_v49 = vpop.f32.mrb[24].mxu0 }
 0x269   : > { %v2167_v34 = vadd.f32 %v2166_v31, %v2165_v28  ;;  %v5961_v27 = vpop.f32.mrb[25].mxu0  ;;  %v2066_v61 = vadd.f32 %v2065_v23, %v2064_v59  ;;  %v2117_v55 = vmul.f32 %v5959_v49, %v5959_v49  ;;  %v2071_v28 = vsel %vm205_vm0, %v5959_v49, 0.0 }
 0x26a   : > { %v2067_v30 = vsel %vm205_vm0, %v5961_v27, 0.0  ;;  %v2115_v63 = vmul.f32 %v5961_v27, %v5961_v27  ;;  %v5968_v20 = vpop.f32.mrb[26].mxu0 }
 0x26b   : > { %v2068_v40 = vadd.f32 %v2067_v30, %v2066_v61  ;;  %v2169_v38 = vadd.f32 %v2168_v60, %v2167_v34  ;;  %v5970_v35 = vpop.f32.mrb[27].mxu0  ;;  %v2118_v31 = vmul.f32 %v5968_v20, %v5968_v20  ;;  %v2174_v60 = vsel %vm205_vm0, %v2117_v55, 0.0 }
 0x26c   : > { %v2170_v42 = vsel %vm205_vm0, %v2115_v63, 0.0  ;;  %v2069_v41 = vsel %vm205_vm0, %v5970_v35, 0.0  ;;  %v2116_v46 = vmul.f32 %v5970_v35, %v5970_v35  ;;  %v2073_v30 = vsel %vm205_vm0, %v5968_v20, 0.0 }
 0x26d   : > { %v2171_v56 = vadd.f32 %v2170_v42, %v2169_v38  ;;  %v2070_v59 = vadd.f32 %v2069_v41, %v2068_v40  ;;  %v2176_v42 = vsel %vm205_vm0, %v2118_v31, 0.0 }
 0x26e   : > { %v2172_v23 = vsel %vm205_vm0, %v2116_v46, 0.0 }
 0x26f   : > { %v2072_v34 = vadd.f32 %v2071_v28, %v2070_v59  ;;  %v2173_v61 = vadd.f32 %v2172_v23, %v2171_v56 }
 0x270   : > { %v5987_v63 = vpop.f32.mrb[28].mxu0 }
 0x271   : > { %v2175_v19 = vadd.f32 %v2174_v60, %v2173_v61  ;;  %v5989_v38 = vpop.f32.mrb[29].mxu0  ;;  %v2074_v40 = vadd.f32 %v2073_v30, %v2072_v34  ;;  %v2121_v23 = vmul.f32 %v5987_v63, %v5987_v63  ;;  %v2079_v18 = vsel %vm205_vm0, %v5987_v63, 0.0 }
 0x272   : > { %v2075_v41 = vsel %vm205_vm0, %v5989_v38, 0.0  ;;  %v2119_v46 = vmul.f32 %v5989_v38, %v5989_v38  ;;  %v5996_v56 = vpop.f32.mrb[30].mxu0 }
 0x273   : > { %v2076_v55 = vadd.f32 %v2075_v41, %v2074_v40  ;;  %v2177_v59 = vadd.f32 %v2176_v42, %v2175_v19  ;;  %v5998_v28 = vpop.f32.mrb[31].mxu0  ;;  %v2122_v19 = vmul.f32 %v5996_v56, %v5996_v56  ;;  %v2081_v17 = vsel %vm205_vm0, %v5996_v56, 0.0 }
 0x274   : > { %v2178_v61 = vsel %vm205_vm0, %v2119_v46, 0.0  ;;  %v2077_v31 = vsel %vm205_vm0, %v5998_v28, 0.0  ;;  %v2120_v34 = vmul.f32 %v5998_v28, %v5998_v28  ;;  %v2182_v46 = vsel %vm205_vm0, %v2121_v23, 0.0 }
 0x275   : > { %v2179_v60 = vadd.f32 %v2178_v61, %v2177_v59  ;;  %v2078_v30 = vadd.f32 %v2077_v31, %v2076_v55  ;;  %v2184_v59 = vsel %vm205_vm0, %v2122_v19, 0.0 }
 0x276   : > { %v2180_v40 = vsel %vm205_vm0, %v2120_v34, 0.0 }
 0x277   : > { %v2080_v42 = vadd.f32 %v2079_v18, %v2078_v30  ;;  %v2181_v41 = vadd.f32 %v2180_v40, %v2179_v60 }
 0x279   : > { %v2082_v16 = vadd.f32 %v2081_v17, %v2080_v42  ;;  %v2183_v15 = vadd.f32 %v2182_v46, %v2181_v41 }
 0x27b   : > { %v2083_v55 = vrot.slane %v2082_v16, 4  ;;  %v2185_v61 = vadd.f32 %v2184_v59, %v2183_v15 }
 0x27d   : > { %v2084_v31 = vadd.f32 %v2083_v55, %v2082_v16  ;;  %v2186_v14 = vrot.slane %v2185_v61, 4 }
 0x27f   : > { %v2085_v13 = vrot.slane %v2084_v31, 2  ;;  %v2187_v12 = vadd.f32 %v2186_v14, %v2185_v61 }
 0x281   : > { %v2086_v11 = vadd.f32 %v2085_v13, %v2084_v31  ;;  %v2188_v10 = vrot.slane %v2187_v12, 2 }
 0x283   : > { %v2087_v34 = vrot.slane %v2086_v11, 1  ;;  %v2189_v18 = vadd.f32 %v2188_v10, %v2187_v12 }
 0x285   : > { %v2088_v60 = vadd.f32 %v2087_v34, %v2086_v11  ;;  %v2190_v30 = vrot.slane %v2189_v18, 1 }
 0x287   : > { %v6016_v23 = vmul.f32 0.00390625, %v2088_v60  ;;  %v2191_v40 = vadd.f32 %v2190_v30, %v2189_v18 }
 0x289   : > { %v2192_v7 = vmul.f32 0.00390625, %v2191_v40  ;;  %v2193_v17 = vmul.f32 %v6016_v23, %v6016_v23  ;;  %v2225_v15 = vsub.f32 %v5998_v28, %v6016_v23  ;;  %v2196_v16 = vsub.f32 %v5794_v52, %v6016_v23 }
 0x28a   : > { %v2197_v13 = vsub.f32 %v5800_v29, %v6016_v23  ;;  %v2198_v10 = vsub.f32 %v5792_v62, %v6016_v23  ;;  %v2199_v11 = vsub.f32 %v5798_v33, %v6016_v23  ;;  %v2200_v12 = vsub.f32 %v5821_v22, %v6016_v23 }
 0x28b   : > { %v2194_v14 = vsub.f32 %v2192_v7, %v2193_v17  ;;  %v2201_v19 = vsub.f32 %v5830_v37, %v6016_v23  ;;  %v2202_v28 = vsub.f32 %v5819_v43, %v6016_v23  ;;  %v2203_v52 = vsub.f32 %v5828_v45, %v6016_v23 }
 0x28c   : > { %v2204_v29 = vsub.f32 %v5849_v50, %v6016_v23  ;;  %v2205_v62 = vsub.f32 %v5858_v32, %v6016_v23  ;;  %v2206_v33 = vsub.f32 %v5847_v36, %v6016_v23  ;;  %v2207_v7 = vsub.f32 %v5856_v48, %v6016_v23 }
 0x28d   : > { %v2195_v22 = vmax.f32 %v2194_v14, 0.0  ;;  %v2208_v37 = vsub.f32 %v5877_v39, %v6016_v23  ;;  %v2209_v43 = vsub.f32 %v5886_v53, %v6016_v23  ;;  %v2210_v45 = vsub.f32 %v5875_v51, %v6016_v23 }
 0x28e   : > { %v2211_v50 = vsub.f32 %v5884_v21, %v6016_v23  ;;  %v2212_v32 = vsub.f32 %v5905_v57, %v6016_v23  ;;  %v2213_v36 = vsub.f32 %v5914_v25, %v6016_v23  ;;  %v2214_v48 = vsub.f32 %v5903_v47, %v6016_v23 }
 0x28f   : > { %v2228_v42 = vadd.f32 1e-05, %v2195_v22  ;;  %v2215_v39 = vsub.f32 %v5912_v44, %v6016_v23  ;;  %v2216_v53 = vsub.f32 %v5933_v54, %v6016_v23  ;;  %v2217_v51 = vsub.f32 %v5942_v24, %v6016_v23 }
 0x290   : > { %v2218_v21 = vsub.f32 %v5931_v58, %v6016_v23  ;;  %v2219_v57 = vsub.f32 %v5940_v26, %v6016_v23  ;;  %v2220_v25 = vsub.f32 %v5961_v27, %v6016_v23  ;;  %v2221_v47 = vsub.f32 %v5970_v35, %v6016_v23 }
 0x291   : > { %5040 = vrsqrt.f32 %v2228_v42  ;;  %v2222_v44 = vsub.f32 %v5959_v49, %v6016_v23  ;;  %v2223_v54 = vsub.f32 %v5968_v20, %v6016_v23  ;;  %v2224_v24 = vsub.f32 %v5989_v38, %v6016_v23 }
 0x292   : > { %v2226_v58 = vsub.f32 %v5987_v63, %v6016_v23  ;;  %v2227_v26 = vsub.f32 %v5996_v56, %v6016_v23 }
 0x29b   : > { %v5041_v27 = vpop.eup %5040 }
 0x29c   : > { %v2259_v41 = vmul.f32 %v5041_v27, %v2225_v15  ;;  %v2232_v46 = vmul.f32 %v5041_v27, %v2198_v10  ;;  %v2233_v35 = vmul.f32 %v5041_v27, %v2199_v11  ;;  %v2230_v59 = vmul.f32 %v5041_v27, %v2196_v16 }
 0x29d   : > { %v2231_v55 = vmul.f32 %v5041_v27, %v2197_v13  ;;  %v2234_v61 = vmul.f32 %v5041_v27, %v2200_v12  ;;  %v2235_v49 = vmul.f32 %v5041_v27, %v2201_v19  ;;  %v2236_v31 = vmul.f32 %v5041_v27, %v2202_v28 }
 0x29e   : > { %v2291_v34 = vmax.f32 %v2259_v41, 0.0  ;;  %v2264_v20 = vmax.f32 %v2232_v46, 0.0  ;;  %v2265_v18 = vmax.f32 %v2233_v35, 0.0  ;;  %v2237_v60 = vmul.f32 %v5041_v27, %v2203_v52 }
 0x29f   : > { %v2238_v38 = vmul.f32 %v5041_v27, %v2204_v29  ;;  %v2239_v30 = vmul.f32 %v5041_v27, %v2205_v62  ;;  %v2240_v40 = vmul.f32 %v5041_v27, %v2206_v33  ;;  %v2241_v63 = vmul.f32 %v5041_v27, %v2207_v7 }
 0x2a0   : > { %2329 = vst.msk [vmem:[#allocation2 + $0x1a1] sm:$0xff] %vm205_vm0, %v2291_v34  ;;  %2323 = vst.msk [vmem:[#allocation2 + $0x171] sm:$0xff] %vm205_vm0, %v2291_v34  ;;  %v2242_v56 = vmul.f32 %v5041_v27, %v2208_v37  ;;  %v2243_v23 = vmul.f32 %v5041_v27, %v2209_v43  ;;  %v2244_v17 = vmul.f32 %v5041_v27, %v2210_v45  ;;  %v2262_v43 = vmax.f32 %v2230_v59, 0.0 }
 0x2a1   : > { %2326 = vst.msk [vmem:[#allocation2 + $0x1] sm:$0xff] %vm205_vm0, %v2264_v20  ;;  %2327 = vst.msk [vmem:[#allocation2 + $0x9] sm:$0xff] %vm205_vm0, %v2265_v18  ;;  %v6088_v15 = vmul.f32 %v5041_v27, %v2211_v50  ;;  %v2246_v16 = vmul.f32 %v5041_v27, %v2212_v32  ;;  %v2247_v13 = vmul.f32 %v5041_v27, %v2213_v36  ;;  %v2263_v45 = vmax.f32 %v2231_v55, 0.0 }
 0x2a2   : > { %2296 = vst.msk [vmem:[#allocation2 + $0x31] sm:$0xff] %vm205_vm0, %v2264_v20  ;;  %2297 = vst.msk [vmem:[#allocation2 + $0x39] sm:$0xff] %vm205_vm0, %v2265_v18  ;;  %v6092_v10 = vmul.f32 %v5041_v27, %v2214_v48  ;;  %v6094_v11 = vmul.f32 %v5041_v27, %v2215_v39  ;;  %v6096_v12 = vmul.f32 %v5041_v27, %v2216_v53  ;;  %v2266_v50 = vmax.f32 %v2234_v61, 0.0 }
 0x2a3   : > { %v6098_v14 = vmul.f32 %v5041_v27, %v2217_v51  ;;  %v6100_v19 = vmul.f32 %v5041_v27, %v2218_v21  ;;  %v6102_v28 = vmul.f32 %v5041_v27, %v2219_v57  ;;  %v6104_v52 = vmul.f32 %v5041_v27, %v2220_v25  ;;  %2294 = vst.msk [vmem:[#allocation2 + $0x19] sm:$0xff] %vm205_vm0, %v2262_v43 }
 0x2a4   : > { %v6106_v29 = vmul.f32 %v5041_v27, %v2221_v47  ;;  %v6108_v62 = vmul.f32 %v5041_v27, %v2222_v44  ;;  %v6110_v33 = vmul.f32 %v5041_v27, %v2223_v54  ;;  %v6112_v7 = vmul.f32 %v5041_v27, %v2224_v24  ;;  %2295 = vst.msk [vmem:[#allocation2 + $0x21] sm:$0xff] %vm205_vm0, %v2263_v45 }
 0x2a5   : > { %v6114_v22 = vmul.f32 %v5041_v27, %v2226_v58  ;;  %v6116_v37 = vmul.f32 %v5041_v27, %v2227_v26  ;;  %v2267_v32 = vmax.f32 %v2235_v49, 0.0  ;;  %v2268_v36 = vmax.f32 %v2236_v31, 0.0  ;;  %2298 = vst.msk [vmem:[#allocation2 + $0x49] sm:$0xff] %vm205_vm0, %v2266_v50 }
 0x2a6   : > { %v2269_v48 = vmax.f32 %v2237_v60, 0.0  ;;  %v2270_v42 = vmax.f32 %v2238_v38, 0.0  ;;  %v2271_v39 = vmax.f32 %v2239_v30, 0.0  ;;  %v2272_v53 = vmax.f32 %v2240_v40, 0.0 }
 0x2a7   : > { %v2273_v57 = vmax.f32 %v2241_v63, 0.0  ;;  %v2274_v25 = vmax.f32 %v2242_v56, 0.0  ;;  %v2275_v47 = vmax.f32 %v2243_v23, 0.0  ;;  %v2276_v44 = vmax.f32 %v2244_v17, 0.0  ;;  %2299 = vst.msk [vmem:[#allocation2 + $0x51] sm:$0xff] %vm205_vm0, %v2267_v32  ;;  %2300 = vst.msk [vmem:[#allocation2 + $0x61] sm:$0xff] %vm205_vm0, %v2268_v36 }
 0x2a8   : > { %v2466_v51 = vld [vmem:[#allocation2 + $0x1] sm:$0xff]  ;;  %v2467_v21 = vld [vmem:[#allocation2 + $0x9] sm:$0xff]  ;;  %v2277_v24 = vmax.f32 %v6088_v15, 0.0  ;;  %v2278_v58 = vmax.f32 %v2246_v16, 0.0  ;;  %v2279_v26 = vmax.f32 %v2247_v13, 0.0  ;;  %2301 = vst.msk [vmem:[#allocation2 + $0x69] sm:$0xff] %vm205_vm0, %v2269_v48 }
 0x2a9   : > { %v2498_v54 = vpack.c.bf16 %v2467_v21, %v2466_v51  ;;  %v2470_v27 = vld [vmem:[#allocation2 + $0x31] sm:$0xff]  ;;  %v2471_v41 = vld [vmem:[#allocation2 + $0x39] sm:$0xff]  ;;  %2302 = vst.msk [vmem:[#allocation2 + $0x79] sm:$0xff] %vm205_vm0, %v2270_v42  ;;  %2303 = vst.msk [vmem:[#allocation2 + $0x81] sm:$0xff] %vm205_vm0, %v2271_v39  ;;  %v2280_v46 = vmax.f32 %v6092_v10, 0.0  ;;  %v2281_v35 = vmax.f32 %v6094_v11, 0.0 }
 0x2aa   : > { %2304 = vst.msk [vmem:[#allocation2 + $0x91] sm:$0xff] %vm205_vm0, %v2272_v53  ;;  %v2282_v59 = vmax.f32 %v6096_v12, 0.0  ;;  %v2283_v55 = vmax.f32 %v6098_v14, 0.0  ;;  %2305 = vst.msk [vmem:[#allocation2 + $0x99] sm:$0xff] %vm205_vm0, %v2273_v57  ;;  %v2366_v61 = vld [vmem:[#allocation2 + $0xf] sm:$0x1]  ;;  %v6154_v56 = vpack.c.bf16 %v2471_v41, %v2470_v27 }
 0x2ab   : > { %2306 = vst.msk [vmem:[#allocation2 + $0xa9] sm:$0xff] %vm205_vm0, %v2274_v25  ;;  %2307 = vst.msk [vmem:[#allocation2 + $0xb1] sm:$0xff] %vm205_vm0, %v2275_v47  ;;  %2530 = vrot.lane.b32.xlu0 %v2498_v54, %s5052_s18  ;;  %v2284_v49 = vmax.f32 %v6100_v19, 0.0  ;;  %v2285_v31 = vmax.f32 %v6102_v28, 0.0  ;;  %v2286_v34 = vmax.f32 %v6104_v52, 0.0  ;;  %v2287_v20 = vmax.f32 %v6106_v29, 0.0 }
 0x2ac   : > { %2308 = vst.msk [vmem:[#allocation2 + $0xc1] sm:$0xff] %vm205_vm0, %v2276_v44  ;;  %2309 = vst.msk [vmem:[#allocation2 + $0xc9] sm:$0xff] %vm205_vm0, %v2277_v24  ;;  %v2288_v18 = vmax.f32 %v6108_v62, 0.0  ;;  %v2289_v60 = vmax.f32 %v6110_v33, 0.0  ;;  %v2290_v38 = vmax.f32 %v6112_v7, 0.0  ;;  %v2292_v30 = vmax.f32 %v6114_v22, 0.0 }
 0x2ad   : > { %2310 = vst.msk [vmem:[#allocation2 + $0xd9] sm:$0xff] %vm205_vm0, %v2278_v58  ;;  %2311 = vst.msk [vmem:[#allocation2 + $0xe1] sm:$0xff] %vm205_vm0, %v2279_v26  ;;  %v2368_v40 = vld [vmem:[#allocation2 + $0x3f] sm:$0x1]  ;;  %v2293_v63 = vmax.f32 %v6116_v37, 0.0  ;;  %v2469_v10 = vld [vmem:[#allocation2 + $0x21] sm:$0xff] }
 0x2ae   : > { %2384 = vst.msk [vmem:[#allocation2 + $0x11] sm:$0x1] %vm261_vm1, %v2366_v61  ;;  %2386 = vst.msk [vmem:[#allocation2 + $0x41] sm:$0x1] %vm261_vm1, %v2368_v40  ;;  %v2381_v23 = vld [vmem:[#allocation2 + $0x177] sm:$0x1] }
 0x2af   : > { %2312 = vst.msk [vmem:[#allocation2 + $0xf1] sm:$0xff] %vm205_vm0, %v2280_v46  ;;  %2313 = vst.msk [vmem:[#allocation2 + $0xf9] sm:$0xff] %vm205_vm0, %v2281_v35  ;;  %v2330_v17 = vld [vmem:[#allocation2 + $0x2] sm:$0x1]  ;;  %v2468_v15 = vld [vmem:[#allocation2 + $0x19] sm:$0xff]  ;;  %2534 = vrot.lane.b32.xlu0 %v6154_v56, %s5052_s18 }
 0x2b0   : > { %2314 = vst.msk [vmem:[#allocation2 + $0x109] sm:$0xff] %vm205_vm0, %v2282_v59  ;;  %2315 = vst.msk [vmem:[#allocation2 + $0x111] sm:$0xff] %vm205_vm0, %v2283_v55  ;;  %v2331_v16 = vld [vmem:[#allocation2 + $0x1a] sm:$0x1]  ;;  %v2332_v13 = vld [vmem:[#allocation2 + $0x32] sm:$0x1]  ;;  %v2499_v11 = vpack.c.bf16 %v2469_v10, %v2468_v15 }
 0x2b1   : > { %2316 = vst.msk [vmem:[#allocation2 + $0x121] sm:$0xff] %vm205_vm0, %v2284_v49  ;;  %2317 = vst.msk [vmem:[#allocation2 + $0x129] sm:$0xff] %vm205_vm0, %v2285_v31  ;;  %v2472_v12 = vld [vmem:[#allocation2 + $0x49] sm:$0xff]  ;;  %v2473_v14 = vld [vmem:[#allocation2 + $0x51] sm:$0xff] }
 0x2b2   : > { %2318 = vst.msk [vmem:[#allocation2 + $0x139] sm:$0xff] %vm205_vm0, %v2286_v34  ;;  %2319 = vst.msk [vmem:[#allocation2 + $0x141] sm:$0xff] %vm205_vm0, %v2287_v20  ;;  %2532 = vrot.lane.b32.xlu1 %v2499_v11, %s5052_s18  ;;  %v2474_v19 = vld [vmem:[#allocation2 + $0x61] sm:$0xff]  ;;  %v2475_v28 = vld [vmem:[#allocation2 + $0x69] sm:$0xff]  ;;  %v6175_v52 = vpack.c.bf16 %v2473_v14, %v2472_v12 }
 0x2b3   : > { %2320 = vst.msk [vmem:[#allocation2 + $0x151] sm:$0xff] %vm205_vm0, %v2288_v18  ;;  %2321 = vst.msk [vmem:[#allocation2 + $0x159] sm:$0xff] %vm205_vm0, %v2289_v60  ;;  %2868 = vrot.lane.b32.xlu0 %v2499_v11, %s5052_s18  ;;  %v6177_v29 = vpack.c.bf16 %v2475_v28, %v2474_v19  ;;  %v2476_v62 = vld [vmem:[#allocation2 + $0x79] sm:$0xff]  ;;  %v2367_v33 = vld [vmem:[#allocation2 + $0x27] sm:$0x1] }
 0x2b4   : > { %2322 = vst.msk [vmem:[#allocation2 + $0x169] sm:$0xff] %vm205_vm0, %v2290_v38  ;;  %2324 = vst.msk [vmem:[#allocation2 + $0x181] sm:$0xff] %vm205_vm0, %v2292_v30  ;;  %v2477_v7 = vld [vmem:[#allocation2 + $0x81] sm:$0xff]  ;;  %v2369_v22 = vld [vmem:[#allocation2 + $0x57] sm:$0x1] }
 0x2b5   : > { %2328 = vst.msk [vmem:[#allocation2 + $0x199] sm:$0xff] %vm205_vm0, %v2290_v38  ;;  %2325 = vst.msk [vmem:[#allocation2 + $0x189] sm:$0xff] %vm205_vm0, %v2293_v63  ;;  %v2370_v37 = vld [vmem:[#allocation2 + $0x6f] sm:$0x1]  ;;  %v2478_v43 = vld [vmem:[#allocation2 + $0x91] sm:$0xff]  ;;  %v6191_v48 = vpack.c.bf16 %v2477_v7, %v2476_v62 }
 0x2b6   : > { %2399 = vst.msk [vmem:[#allocation2 + $0x179] sm:$0x1] %vm261_vm1, %v2381_v23  ;;  %2348 = vst.msk [vmem:[#allocation2] sm:$0x1] %vm261_vm1, %v2330_v17  ;;  %2536 = vrot.lane.b32.xlu1 %v6175_v52, %s5052_s18  ;;  %v2479_v45 = vld [vmem:[#allocation2 + $0x99] sm:$0xff]  ;;  %v2480_v44 = vld [vmem:[#allocation2 + $0xa9] sm:$0xff] }
 0x2b7   : > { %2349 = vst.msk [vmem:[#allocation2 + $0x18] sm:$0x1] %vm261_vm1, %v2331_v16  ;;  %2350 = vst.msk [vmem:[#allocation2 + $0x30] sm:$0x1] %vm261_vm1, %v2332_v13  ;;  %2538 = vrot.lane.b32.xlu0 %v6177_v29, %s5052_s18  ;;  %v2371_v50 = vld [vmem:[#allocation2 + $0x87] sm:$0x1]  ;;  %v6195_v39 = vpack.c.bf16 %v2479_v45, %v2478_v43 }
 0x2b8   : > { %2385 = vst.msk [vmem:[#allocation2 + $0x29] sm:$0x1] %vm261_vm1, %v2367_v33  ;;  %2387 = vst.msk [vmem:[#allocation2 + $0x59] sm:$0x1] %vm261_vm1, %v2369_v22  ;;  %v2372_v32 = vld [vmem:[#allocation2 + $0x9f] sm:$0x1] }
 0x2b9   : > { %2388 = vst.msk [vmem:[#allocation2 + $0x71] sm:$0x1] %vm261_vm1, %v2370_v37  ;;  %2389 = vst.msk [vmem:[#allocation2 + $0x89] sm:$0x1] %vm261_vm1, %v2371_v50  ;;  %v2373_v36 = vld [vmem:[#allocation2 + $0xb7] sm:$0x1] }
 0x2ba   : > { %2870 = vrot.lane.b32.xlu1 %v6154_v56, %s5052_s18  ;;  %2390 = vst.msk [vmem:[#allocation2 + $0xa1] sm:$0x1] %vm261_vm1, %v2372_v32  ;;  %2391 = vst.msk [vmem:[#allocation2 + $0xb9] sm:$0x1] %vm261_vm1, %v2373_v36  ;;  %v2374_v42 = vld [vmem:[#allocation2 + $0xcf] sm:$0x1] }
 0x2bb   : > { %2872 = vrot.lane.b32.xlu0 %v6175_v52, %s5052_s18  ;;  %2392 = vst.msk [vmem:[#allocation2 + $0xd1] sm:$0x1] %vm261_vm1, %v2374_v42  ;;  %v2375_v53 = vld [vmem:[#allocation2 + $0xe7] sm:$0x1]  ;;  %v2376_v51 = vld [vmem:[#allocation2 + $0xff] sm:$0x1] }
 0x2bc   : > { %2393 = vst.msk [vmem:[#allocation2 + $0xe9] sm:$0x1] %vm261_vm1, %v2375_v53  ;;  %2394 = vst.msk [vmem:[#allocation2 + $0x101] sm:$0x1] %vm261_vm1, %v2376_v51  ;;  %v2377_v21 = vld [vmem:[#allocation2 + $0x117] sm:$0x1] }
 0x2bd   : > { %2395 = vst.msk [vmem:[#allocation2 + $0x119] sm:$0x1] %vm261_vm1, %v2377_v21  ;;  %v2378_v57 = vld [vmem:[#allocation2 + $0x12f] sm:$0x1]  ;;  %v2379_v25 = vld [vmem:[#allocation2 + $0x147] sm:$0x1] }
 0x2be   : > { %2540 = vrot.lane.b32.xlu1 %v6191_v48, %s5052_s18  ;;  %2396 = vst.msk [vmem:[#allocation2 + $0x131] sm:$0x1] %vm261_vm1, %v2378_v57  ;;  %2397 = vst.msk [vmem:[#allocation2 + $0x149] sm:$0x1] %vm261_vm1, %v2379_v25  ;;  %v2380_v47 = vld [vmem:[#allocation2 + $0x15f] sm:$0x1] }
 0x2bf   : > { %2542 = vrot.lane.b32.xlu0 %v6195_v39, %s5052_s18  ;;  %v2481_v54 = vld [vmem:[#allocation2 + $0xb1] sm:$0xff]  ;;  %2398 = vst.msk [vmem:[#allocation2 + $0x161] sm:$0x1] %vm261_vm1, %v2380_v47  ;;  %v2482_v24 = vld [vmem:[#allocation2 + $0xc1] sm:$0xff]  ;;  %v2483_v58 = vld [vmem:[#allocation2 + $0xc9] sm:$0xff] }
 0x2c0   : > { %v2402_v26 = vld [vmem:[#allocation2] sm:$0xff]  ;;  %v2403_v27 = vld [vmem:[#allocation2 + $0x8] sm:$0xff]  ;;  %v6212_v41 = vpack.c.bf16 %v2481_v54, %v2480_v44  ;;  %v2404_v35 = vld [vmem:[#allocation2 + $0x18] sm:$0xff]  ;;  %v6214_v55 = vpack.c.bf16 %v2483_v58, %v2482_v24 }
 0x2c1   : > { %v2434_v46 = vpack.c.bf16 %v2403_v27, %v2402_v26  ;;  %v2405_v59 = vld [vmem:[#allocation2 + $0x20] sm:$0xff]  ;;  %v2406_v49 = vld [vmem:[#allocation2 + $0x30] sm:$0xff]  ;;  %v2407_v31 = vld [vmem:[#allocation2 + $0x38] sm:$0xff] }
 0x2c2   : > { %2874 = vrot.lane.b32.xlu1 %v6177_v29, %s5052_s18  ;;  %v6216_v61 = vpack.c.bf16 %v2405_v59, %v2404_v35  ;;  %v2333_v34 = vld [vmem:[#allocation2 + $0x4a] sm:$0x1]  ;;  %v6225_v20 = vpack.c.bf16 %v2407_v31, %v2406_v49  ;;  %v2484_v18 = vld [vmem:[#allocation2 + $0xd9] sm:$0xff]  ;;  %v2485_v60 = vld [vmem:[#allocation2 + $0xe1] sm:$0xff] }
 0x2c3   : > { %2876 = vrot.lane.b32.xlu0 %v6191_v48, %s5052_s18  ;;  %2450 = vst.msk [vmem:[#allocation3] sm:$0xff] %vm205_vm0, %v2434_v46  ;;  %v2382_v38 = vld [vmem:[#allocation2 + $0x18f] sm:$0x1]  ;;  %v2334_v30 = vld [vmem:[#allocation2 + $0x62] sm:$0x1]  ;;  %v2486_v40 = vld [vmem:[#allocation2 + $0xf1] sm:$0xff]  ;;  %v6237_v16 = vpack.c.bf16 %v2485_v60, %v2484_v18 }
 0x2c4   : > { %2451 = vst.msk [vmem:[#allocation3 + $0x8] sm:$0xff] %vm205_vm0, %v6216_v61  ;;  %2452 = vst.msk [vmem:[#allocation3 + $0x10] sm:$0xff] %vm205_vm0, %v6225_v20  ;;  %v2487_v63 = vld [vmem:[#allocation2 + $0xf9] sm:$0xff]  ;;  %v2336_v17 = vld [vmem:[#allocation2 + $0x92] sm:$0x1] }
 0x2c5   : > { %2351 = vst.msk [vmem:[#allocation2 + $0x48] sm:$0x1] %vm261_vm1, %v2333_v34  ;;  %2400 = vst.msk [vmem:[#allocation2 + $0x191] sm:$0x1] %vm261_vm1, %v2382_v38  ;;  %v2335_v23 = vld [vmem:[#allocation2 + $0x7a] sm:$0x1]  ;;  %v6241_v10 = vpack.c.bf16 %v2487_v63, %v2486_v40 }
 0x2c6   : > { %2544 = vrot.lane.b32.xlu1 %v6212_v41, %s5052_s18  ;;  %2352 = vst.msk [vmem:[#allocation2 + $0x60] sm:$0x1] %vm261_vm1, %v2334_v30  ;;  %2353 = vst.msk [vmem:[#allocation2 + $0x78] sm:$0x1] %vm261_vm1, %v2335_v23  ;;  %v2337_v15 = vld [vmem:[#allocation2 + $0xaa] sm:$0x1] }
 0x2c7   : > { %2546 = vrot.lane.b32.xlu0 %v6214_v55, %s5052_s18  ;;  %2354 = vst.msk [vmem:[#allocation2 + $0x90] sm:$0x1] %vm261_vm1, %v2336_v17  ;;  %2355 = vst.msk [vmem:[#allocation2 + $0xa8] sm:$0x1] %vm261_vm1, %v2337_v15  ;;  %v2338_v13 = vld [vmem:[#allocation2 + $0xc2] sm:$0x1] }
 0x2c8   : > { %2356 = vst.msk [vmem:[#allocation2 + $0xc0] sm:$0x1] %vm261_vm1, %v2338_v13  ;;  %v2339_v11 = vld [vmem:[#allocation2 + $0xda] sm:$0x1]  ;;  %v2340_v12 = vld [vmem:[#allocation2 + $0xf2] sm:$0x1] }
 0x2c9   : > { %v2409_v19 = vld [vmem:[#allocation2 + $0x50] sm:$0xff]  ;;  %2357 = vst.msk [vmem:[#allocation2 + $0xd8] sm:$0x1] %vm261_vm1, %v2339_v11  ;;  %2358 = vst.msk [vmem:[#allocation2 + $0xf0] sm:$0x1] %vm261_vm1, %v2340_v12  ;;  %v2411_v22 = vld [vmem:[#allocation2 + $0x68] sm:$0xff] }
 0x2ca   : > { %2878 = vrot.lane.b32.xlu1 %v6195_v39, %s5052_s18  ;;  %v2341_v28 = vld [vmem:[#allocation2 + $0x10a] sm:$0x1]  ;;  %v2489_v33 = vld [vmem:[#allocation2 + $0x111] sm:$0xff]  ;;  %v2342_v37 = vld [vmem:[#allocation2 + $0x122] sm:$0x1] }
 0x2cb   : > { %2880 = vrot.lane.b32.xlu0 %v6212_v41, %s5052_s18  ;;  %v2488_v62 = vld [vmem:[#allocation2 + $0x109] sm:$0xff]  ;;  %2359 = vst.msk [vmem:[#allocation2 + $0x108] sm:$0x1] %vm261_vm1, %v2341_v28  ;;  %v2490_v43 = vld [vmem:[#allocation2 + $0x121] sm:$0xff]  ;;  %2360 = vst.msk [vmem:[#allocation2 + $0x120] sm:$0x1] %vm261_vm1, %v2342_v37 }
 0x2cc   : > { %v2408_v14 = vld [vmem:[#allocation2 + $0x48] sm:$0xff]  ;;  %v2413_v50 = vld [vmem:[#allocation2 + $0x80] sm:$0xff]  ;;  %v2343_v32 = vld [vmem:[#allocation2 + $0x13a] sm:$0x1]  ;;  %v6267_v26 = vpack.c.bf16 %v2489_v33, %v2488_v62 }
 0x2cd   : > { %v6250_v7 = vpack.c.bf16 %v2409_v19, %v2408_v14  ;;  %v2491_v45 = vld [vmem:[#allocation2 + $0x129] sm:$0xff]  ;;  %v2344_v36 = vld [vmem:[#allocation2 + $0x152] sm:$0x1]  ;;  %v2410_v42 = vld [vmem:[#allocation2 + $0x60] sm:$0xff]  ;;  %2361 = vst.msk [vmem:[#allocation2 + $0x138] sm:$0x1] %vm261_vm1, %v2343_v32 }
 0x2ce   : > { %2548 = vrot.lane.b32.xlu1 %v6237_v16, %s5052_s18  ;;  %v2415_v53 = vld [vmem:[#allocation2 + $0x98] sm:$0xff]  ;;  %v2417_v51 = vld [vmem:[#allocation2 + $0xb0] sm:$0xff]  ;;  %2362 = vst.msk [vmem:[#allocation2 + $0x150] sm:$0x1] %vm261_vm1, %v2344_v36  ;;  %v6260_v21 = vpack.c.bf16 %v2411_v22, %v2410_v42  ;;  %v2419_v25 = vld [vmem:[#allocation2 + $0xc8] sm:$0xff]  ;;  %v6275_v31 = vpack.c.bf16 %v2491_v45, %v2490_v43 }
 0x2cf   : > { %2550 = vrot.lane.b32.xlu0 %v6241_v10, %s5052_s18  ;;  %2453 = vst.msk [vmem:[#allocation3 + $0x18] sm:$0xff] %vm205_vm0, %v6250_v7  ;;  %v2412_v57 = vld [vmem:[#allocation2 + $0x78] sm:$0xff]  ;;  %v2345_v47 = vld [vmem:[#allocation2 + $0x16a] sm:$0x1]  ;;  %v2414_v54 = vld [vmem:[#allocation2 + $0x90] sm:$0xff] }
 0x2d0   : > { %v6264_v44 = vpack.c.bf16 %v2413_v50, %v2412_v57  ;;  %v2416_v24 = vld [vmem:[#allocation2 + $0xa8] sm:$0xff]  ;;  %v2421_v58 = vld [vmem:[#allocation2 + $0xe0] sm:$0xff]  ;;  %2363 = vst.msk [vmem:[#allocation2 + $0x168] sm:$0x1] %vm261_vm1, %v2345_v47  ;;  %v6271_v27 = vpack.c.bf16 %v2415_v53, %v2414_v54  ;;  %v2423_v59 = vld [vmem:[#allocation2 + $0xf8] sm:$0xff] }
 0x2d1   : > { %2454 = vst.msk [vmem:[#allocation3 + $0x20] sm:$0xff] %vm205_vm0, %v6260_v21  ;;  %v6273_v46 = vpack.c.bf16 %v2417_v51, %v2416_v24  ;;  %v2418_v35 = vld [vmem:[#allocation2 + $0xc0] sm:$0xff]  ;;  %v2420_v18 = vld [vmem:[#allocation2 + $0xd8] sm:$0xff]  ;;  %v2422_v60 = vld [vmem:[#allocation2 + $0xf0] sm:$0xff] }
 0x2d2   : > { %2882 = vrot.lane.b32.xlu1 %v6214_v55, %s5052_s18  ;;  %v2383_v49 = vld [vmem:[#allocation2 + $0x1a7] sm:$0x1]  ;;  %2455 = vst.msk [vmem:[#allocation3 + $0x28] sm:$0xff] %vm205_vm0, %v6264_v44  ;;  %v6279_v34 = vpack.c.bf16 %v2419_v25, %v2418_v35  ;;  %v2425_v38 = vld [vmem:[#allocation2 + $0x110] sm:$0xff]  ;;  %2456 = vst.msk [vmem:[#allocation3 + $0x30] sm:$0xff] %vm205_vm0, %v6271_v27  ;;  %v6288_v30 = vpack.c.bf16 %v2421_v58, %v2420_v18  ;;  %v6290_v40 = vpack.c.bf16 %v2423_v59, %v2422_v60 }
 0x2d3   : > { %2884 = vrot.lane.b32.xlu0 %v6237_v16, %s5052_s18  ;;  %2401 = vst.msk [vmem:[#allocation2 + $0x1a9] sm:$0x1] %vm261_vm1, %v2383_v49  ;;  %v2424_v63 = vld [vmem:[#allocation2 + $0x108] sm:$0xff]  ;;  %v2346_v17 = vld [vmem:[#allocation2 + $0x182] sm:$0x1]  ;;  %v2431_v62 = vld [vmem:[#allocation2 + $0x158] sm:$0xff] }
 0x2d4   : > { %2457 = vst.msk [vmem:[#allocation3 + $0x38] sm:$0xff] %vm205_vm0, %v6273_v46  ;;  %v2427_v23 = vld [vmem:[#allocation2 + $0x128] sm:$0xff]  ;;  %2458 = vst.msk [vmem:[#allocation3 + $0x40] sm:$0xff] %vm205_vm0, %v6279_v34  ;;  %v6296_v15 = vpack.c.bf16 %v2425_v38, %v2424_v63  ;;  %v2426_v13 = vld [vmem:[#allocation2 + $0x120] sm:$0xff] }
 0x2d5   : > { %v2429_v11 = vld [vmem:[#allocation2 + $0x140] sm:$0xff]  ;;  %2364 = vst.msk [vmem:[#allocation2 + $0x180] sm:$0x1] %vm261_vm1, %v2346_v17  ;;  %v2347_v12 = vld [vmem:[#allocation2 + $0x19a] sm:$0x1]  ;;  %v6303_v14 = vpack.c.bf16 %v2427_v23, %v2426_v13  ;;  %v2430_v28 = vld [vmem:[#allocation2 + $0x150] sm:$0xff] }
 0x2d6   : > { %2552 = vrot.lane.b32.xlu1 %v6267_v26, %s5052_s18  ;;  %2459 = vst.msk [vmem:[#allocation3 + $0x48] sm:$0xff] %vm205_vm0, %v6288_v30  ;;  %2460 = vst.msk [vmem:[#allocation3 + $0x50] sm:$0xff] %vm205_vm0, %v6290_v40  ;;  %v2428_v19 = vld [vmem:[#allocation2 + $0x138] sm:$0xff]  ;;  %v2493_v22 = vld [vmem:[#allocation2 + $0x141] sm:$0xff]  ;;  %v6310_v45 = vpack.c.bf16 %v2431_v62, %v2430_v28 }
 0x2d7   : > { %2554 = vrot.lane.b32.xlu0 %v6275_v31, %s5052_s18  ;;  %2365 = vst.msk [vmem:[#allocation2 + $0x198] sm:$0x1] %vm261_vm1, %v2347_v12  ;;  %v2492_v33 = vld [vmem:[#allocation2 + $0x139] sm:$0xff]  ;;  %v2494_v37 = vld [vmem:[#allocation2 + $0x151] sm:$0xff]  ;;  %v6308_v43 = vpack.c.bf16 %v2429_v11, %v2428_v19  ;;  %v2432_v32 = vld [vmem:[#allocation2 + $0x168] sm:$0xff] }
 0x2d8   : > { %2461 = vst.msk [vmem:[#allocation3 + $0x58] sm:$0xff] %vm205_vm0, %v6296_v15  ;;  %v2495_v50 = vld [vmem:[#allocation2 + $0x159] sm:$0xff]  ;;  %2462 = vst.msk [vmem:[#allocation3 + $0x60] sm:$0xff] %vm205_vm0, %v6303_v14  ;;  %v2433_v36 = vld [vmem:[#allocation2 + $0x170] sm:$0xff]  ;;  %v6324_v53 = vpack.c.bf16 %v2493_v22, %v2492_v33 }
 0x2d9   : > { %2463 = vst.msk [vmem:[#allocation3 + $0x68] sm:$0xff] %vm205_vm0, %v6308_v43  ;;  %2464 = vst.msk [vmem:[#allocation3 + $0x70] sm:$0xff] %vm205_vm0, %v6310_v45  ;;  %v6322_v42 = vpack.c.bf16 %v2433_v36, %v2432_v32  ;;  %v6326_v51 = vpack.c.bf16 %v2495_v50, %v2494_v37  ;;  %v2595_v57 = vld [vmem:[#allocation2 + $0xa] sm:$0xff]  ;;  %v2594_v25 = vld [vmem:[#allocation2 + $0x2] sm:$0xff] }
 0x2da   : > { %2886 = vrot.lane.b32.xlu1 %v6241_v10, %s5052_s18  ;;  %v2496_v47 = vld [vmem:[#allocation2 + $0x169] sm:$0xff]  ;;  %v2497_v54 = vld [vmem:[#allocation2 + $0x171] sm:$0xff]  ;;  %v2626_v24 = vpack.c.bf16 %v2595_v57, %v2594_v25  ;;  %v2599_v59 = vld [vmem:[#allocation2 + $0x3a] sm:$0xff] }
 0x2db   : > { %2888 = vrot.lane.b32.xlu0 %v6267_v26, %s5052_s18  ;;  %2465 = vst.msk [vmem:[#allocation3 + $0x78] sm:$0xff] %vm205_vm0, %v6322_v42  ;;  %v6337_v58 = vpack.c.bf16 %v2497_v54, %v2496_v47  ;;  %v2597_v35 = vld [vmem:[#allocation2 + $0x22] sm:$0xff]  ;;  %v2596_v49 = vld [vmem:[#allocation2 + $0x1a] sm:$0xff]  ;;  %v2598_v60 = vld [vmem:[#allocation2 + $0x32] sm:$0xff] }
 0x2dc   : > { %v2627_v18 = vpack.c.bf16 %v2597_v35, %v2596_v49  ;;  %v6343_v38 = vpack.c.bf16 %v2599_v59, %v2598_v60  ;;  %v2601_v63 = vld [vmem:[#allocation2 + $0x52] sm:$0xff]  ;;  %v2603_v23 = vld [vmem:[#allocation2 + $0x6a] sm:$0xff]  ;;  %v2602_v11 = vld [vmem:[#allocation2 + $0x62] sm:$0xff] }
 0x2dd   : > { %v2600_v17 = vld [vmem:[#allocation2 + $0x4a] sm:$0xff]  ;;  %v6353_v12 = vpack.c.bf16 %v2603_v23, %v2602_v11  ;;  %v2605_v19 = vld [vmem:[#allocation2 + $0x82] sm:$0xff]  ;;  %v2607_v28 = vld [vmem:[#allocation2 + $0x9a] sm:$0xff] }
 0x2de   : > { %2556 = vrot.lane.b32.xlu1 %v6324_v53, %s5052_s18  ;;  %v6351_v13 = vpack.c.bf16 %v2601_v63, %v2600_v17  ;;  %v5037_v62 = vld [vmem:[%s7221_s2 + $0x8] sm:$0x3f]   ;;  %v6367_v33 = vld [vmem:[%s7221_s2] sm:$0x3f]   ;;  %v2606_v50 = vld [vmem:[#allocation2 + $0x92] sm:$0xff] }
 0x2df   : > { %2558 = vrot.lane.b32.xlu0 %v6326_v51, %s5052_s18  ;;  %v2604_v22 = vld [vmem:[#allocation2 + $0x7a] sm:$0xff]  ;;  %5021 = vmatprep.subr.msk.bf16.mxu1 %vm1049_vm2, %v5037_v62  ;;  %v3133_v32 = vsel %vm1049_vm2, %v5037_v62, 0  ;;  %v6375_v36 = vpack.c.bf16 %v2607_v28, %v2606_v50  ;;  %v2609_v57 = vld [vmem:[#allocation2 + $0xb2] sm:$0xff]  ;;  %v2611_v25 = vld [vmem:[#allocation2 + $0xca] sm:$0xff] }
 0x2e0   : > { %v6371_v37 = vpack.c.bf16 %v2605_v19, %v2604_v22  ;;  %4789 = vmatpush3.bf16.msra.mxu1 %v3133_v32  ;;  %v2608_v47 = vld [vmem:[#allocation2 + $0xaa] sm:$0xff]  ;;  %v2613_v59 = vld [vmem:[#allocation2 + $0xe2] sm:$0xff]  ;;  %v2615_v49 = vld [vmem:[#allocation2 + $0xfa] sm:$0xff] }
 0x2e1   : > { %5022 = vmatprep.subr.msk.bf16.mxu1 %vm1049_vm2, %v6367_v33  ;;  %v6387_v54 = vpack.c.bf16 %v2609_v57, %v2608_v47  ;;  %v2614_v63 = vld [vmem:[#allocation2 + $0xf2] sm:$0xff]  ;;  %v2619_v11 = vld [vmem:[#allocation2 + $0x12a] sm:$0xff]  ;;  %v2618_v62 = vld [vmem:[#allocation2 + $0x122] sm:$0xff] }
 0x2e2   : > { %2890 = vrot.lane.b32.xlu1 %v6275_v31, %s5052_s18  ;;  %v6401_v23 = vpack.c.bf16 %v2615_v49, %v2614_v63  ;;  %v2617_v17 = vld [vmem:[#allocation2 + $0x112] sm:$0xff]  ;;  %v2616_v19 = vld [vmem:[#allocation2 + $0x10a] sm:$0xff]  ;;  %v6413_v22 = vpack.c.bf16 %v2619_v11, %v2618_v62  ;;  %v2621_v50 = vld [vmem:[#allocation2 + $0x142] sm:$0xff] }
 0x2e3   : > { %2658 = vrot.lane.b32.xlu0 %v2626_v24, %s5053_s19  ;;  %v2610_v24 = vld [vmem:[#allocation2 + $0xc2] sm:$0xff]  ;;  %v6411_v28 = vpack.c.bf16 %v2617_v17, %v2616_v19  ;;  %v2623_v32 = vld [vmem:[#allocation2 + $0x15a] sm:$0xff]  ;;  %v2622_v47 = vld [vmem:[#allocation2 + $0x152] sm:$0xff] }
 0x2e4   : > { %v6389_v35 = vpack.c.bf16 %v2611_v25, %v2610_v24  ;;  %v2620_v57 = vld [vmem:[#allocation2 + $0x13a] sm:$0xff]  ;;  %v6425_v24 = vpack.c.bf16 %v2623_v32, %v2622_v47  ;;  %v2835_v62 = vld [vmem:[#allocation2 + $0x189] sm:$0xff] }
 0x2e5   : > { %v6423_v25 = vpack.c.bf16 %v2621_v50, %v2620_v57  ;;  %v2834_v19 = vld [vmem:[#allocation2 + $0x181] sm:$0xff]  ;;  %v2963_v47 = vld [vmem:[#allocation2 + $0x18a] sm:$0xff] }
 0x2e6   : > { %2560 = vrot.lane.b32.xlu1 %v6337_v58, %s5052_s18  ;;  %v6450_v57 = vpack.c.bf16 %v2835_v62, %v2834_v19 }
 0x2e7   : > { %2892 = vrot.lane.b32.xlu0 %v6324_v53, %s5052_s18 }
 0x2ea   : > { %2660 = vrot.lane.b32.xlu1 %v2627_v18, %s5053_s19 }
 0x2eb   : > { %2662 = vrot.lane.b32.xlu0 %v6343_v38, %s5053_s19 }
 0x2ee   : > { %2894 = vrot.lane.b32.xlu1 %v6326_v51, %s5052_s18 }
 0x2ef   : > { %2996 = vrot.lane.b32.xlu0 %v2627_v18, %s5053_s19  ;;  %v2612_v18 = vld [vmem:[#allocation2 + $0xda] sm:$0xff] }
 0x2f0   : > { %v6399_v60 = vpack.c.bf16 %v2613_v59, %v2612_v18  ;;  %v2625_v59 = vld [vmem:[#allocation2 + $0x172] sm:$0xff]  ;;  %v2624_v18 = vld [vmem:[#allocation2 + $0x16a] sm:$0xff] }
 0x2f1   : > { %v6436_v63 = vpack.c.bf16 %v2625_v59, %v2624_v18 }
 0x2f2   : > { %2664 = vrot.lane.b32.xlu1 %v6351_v13, %s5053_s19 }
 0x2f3   : > { %2666 = vrot.lane.b32.xlu0 %v6353_v12, %s5053_s19 }
 0x2f6   : > { %2998 = vrot.lane.b32.xlu1 %v6343_v38, %s5053_s19 }
 0x2f7   : > { %3000 = vrot.lane.b32.xlu0 %v6351_v13, %s5053_s19 }
 0x2fa   : > { %2668 = vrot.lane.b32.xlu1 %v6371_v37, %s5053_s19 }
 0x2fb   : > { %2670 = vrot.lane.b32.xlu0 %v6375_v36, %s5053_s19 }
 0x2fe   : > { %3002 = vrot.lane.b32.xlu1 %v6353_v12, %s5053_s19 }
 0x2ff   : > { %3004 = vrot.lane.b32.xlu0 %v6371_v37, %s5053_s19 }
 0x302   : > { %2672 = vrot.lane.b32.xlu1 %v6387_v54, %s5053_s19 }
 0x303   : > { %2674 = vrot.lane.b32.xlu0 %v6389_v35, %s5053_s19 }
 0x306   : > { %3006 = vrot.lane.b32.xlu1 %v6375_v36, %s5053_s19 }
 0x307   : > { %3008 = vrot.lane.b32.xlu0 %v6387_v54, %s5053_s19 }
 0x30a   : > { %2676 = vrot.lane.b32.xlu1 %v6399_v60, %s5053_s19 }
 0x30b   : > { %2678 = vrot.lane.b32.xlu0 %v6401_v23, %s5053_s19 }
 0x30e   : > { %3010 = vrot.lane.b32.xlu1 %v6389_v35, %s5053_s19 }
 0x30f   : > { %3012 = vrot.lane.b32.xlu0 %v6399_v60, %s5053_s19 }
 0x312   : > { %2680 = vrot.lane.b32.xlu1 %v6411_v28, %s5053_s19 }
 0x313   : > { %2682 = vrot.lane.b32.xlu0 %v6413_v22, %s5053_s19 }
 0x316   : > { %3014 = vrot.lane.b32.xlu1 %v6401_v23, %s5053_s19 }
 0x317   : > { %3016 = vrot.lane.b32.xlu0 %v6411_v28, %s5053_s19 }
 0x31a   : > { %2684 = vrot.lane.b32.xlu1 %v6423_v25, %s5053_s19 }
 0x31b   : > { %2686 = vrot.lane.b32.xlu0 %v6425_v24, %s5053_s19 }
 0x31d   : > { %v2531_v49 = vpop.permute.xlu0 %2530 }
 0x31e   : > { %3018 = vrot.lane.b32.xlu1 %v6413_v22, %s5053_s19  ;;  %2578 = vst.msk [vmem:[#allocation3] sm:$0xff] %vm492_vm3, %v2531_v49  ;;  %v2962_v49 = vld [vmem:[#allocation2 + $0x182] sm:$0xff] }
 0x31f   : > { %3020 = vrot.lane.b32.xlu0 %v6423_v25, %s5053_s19 }
 0x321   : > { %v2535_v17 = vpop.permute.xlu0 %2534 }
 0x322   : > { %2688 = vrot.lane.b32.xlu1 %v6436_v63, %s5053_s19  ;;  %2580 = vst.msk [vmem:[#allocation3 + $0x10] sm:$0xff] %vm492_vm3, %v2535_v17  ;;  %v6460_v17 = vpack.c.bf16 %v2963_v47, %v2962_v49  ;;  %v3736_v49 = vld [vmem:[#allocation2 + $0x1a2] sm:$0xff] }
 0x323   : > { %2896 = vrot.lane.b32.xlu0 %v6337_v58, %s5052_s18 }
 0x324   : > { %v2533_v11 = vpop.permute.xlu1 %2532 }
 0x325   : > { %2579 = vst.msk [vmem:[#allocation3 + $0x8] sm:$0xff] %vm492_vm3, %v2533_v11  ;;  %v6444_v50 = vpop.permute.xlu0 %2868 }
 0x326   : > { %3022 = vrot.lane.b32.xlu1 %v6425_v24, %s5053_s19 }
 0x327   : > { %3024 = vrot.lane.b32.xlu0 %v6436_v63, %s5053_s19 }
 0x328   : > { %v2537_v32 = vpop.permute.xlu1 %2536 }
 0x329   : > { %2581 = vst.msk [vmem:[#allocation3 + $0x18] sm:$0xff] %vm492_vm3, %v2537_v32  ;;  %v2539_v59 = vpop.permute.xlu0 %2538 }
 0x32a   : > { %2898 = vrot.lane.b32.xlu1 %v6450_v57, %s5052_s18  ;;  %2582 = vst.msk [vmem:[#allocation3 + $0x20] sm:$0xff] %vm492_vm3, %v2539_v59 }
 0x32b   : > { %3641 = vrot.lane.b32.xlu0 %v6154_v56, %s5052_s18 }
 0x32c   : > { %v6458_v18 = vpop.permute.xlu1 %2870 }
 0x32d   : > { %v6462_v11 = vpop.permute.xlu0 %2872 }
 0x32e   : > { %3026 = vrot.lane.b32.xlu1 %v6460_v17, %s5053_s19 }
 0x32f   : > { %3769 = vrot.lane.b32.xlu0 %v6343_v38, %s5053_s19 }
 0x330   : > { %v2541_v19 = vpop.permute.xlu1 %2540 }
 0x331   : > { %2583 = vst.msk [vmem:[#allocation3 + $0x28] sm:$0xff] %vm492_vm3, %v2541_v19  ;;  %v2543_v62 = vpop.permute.xlu0 %2542 }
 0x332   : > { %3643 = vrot.lane.b32.xlu1 %v6175_v52, %s5052_s18  ;;  %2584 = vst.msk [vmem:[#allocation3 + $0x30] sm:$0xff] %vm492_vm3, %v2543_v62 }
 0x333   : > { %3645 = vrot.lane.b32.xlu0 %v6177_v29, %s5052_s18 }
 0x334   : > { %v6474_v56 = vpop.permute.xlu1 %2874 }
 0x335   : > { %v6476_v32 = vpop.permute.xlu0 %2876 }
 0x336   : > { %3771 = vrot.lane.b32.xlu1 %v6351_v13, %s5053_s19 }
 0x337   : > { %3773 = vrot.lane.b32.xlu0 %v6353_v12, %s5053_s19 }
 0x338   : > { %v2545_v38 = vpop.permute.xlu1 %2544 }
 0x339   : > { %2585 = vst.msk [vmem:[#allocation3 + $0x38] sm:$0xff] %vm492_vm3, %v2545_v38  ;;  %v2547_v47 = vpop.permute.xlu0 %2546 }
 0x33a   : > { %3647 = vrot.lane.b32.xlu1 %v6191_v48, %s5052_s18  ;;  %2586 = vst.msk [vmem:[#allocation3 + $0x40] sm:$0xff] %vm492_vm3, %v2547_v47 }
 0x33b   : > { %3649 = vrot.lane.b32.xlu0 %v6195_v39, %s5052_s18 }
 0x33c   : > { %v6488_v52 = vpop.permute.xlu1 %2878 }
 0x33d   : > { %v6490_v29 = vpop.permute.xlu0 %2880 }
 0x33e   : > { %3775 = vrot.lane.b32.xlu1 %v6371_v37, %s5053_s19 }
 0x33f   : > { %3777 = vrot.lane.b32.xlu0 %v6375_v36, %s5053_s19 }
 0x340   : > { %v2549_v13 = vpop.permute.xlu1 %2548 }
 0x341   : > { %2587 = vst.msk [vmem:[#allocation3 + $0x48] sm:$0xff] %vm492_vm3, %v2549_v13  ;;  %v2551_v12 = vpop.permute.xlu0 %2550  ;;  %v6607_v13 = vld [vmem:[%s7221_s2 + $0x10] sm:$0x3f]  }
 0x342   : > { %3651 = vrot.lane.b32.xlu1 %v6212_v41, %s5052_s18  ;;  %2588 = vst.msk [vmem:[#allocation3 + $0x50] sm:$0xff] %vm492_vm3, %v2551_v12 }
 0x343   : > { %3653 = vrot.lane.b32.xlu0 %v6214_v55, %s5052_s18 }
 0x344   : > { %v6502_v48 = vpop.permute.xlu1 %2882 }
 0x345   : > { %v6504_v39 = vpop.permute.xlu0 %2884 }
 0x346   : > { %3779 = vrot.lane.b32.xlu1 %v6387_v54, %s5053_s19 }
 0x347   : > { %3781 = vrot.lane.b32.xlu0 %v6389_v35, %s5053_s19 }
 0x348   : > { %v2553_v37 = vpop.permute.xlu1 %2552 }
 0x349   : > { %2589 = vst.msk [vmem:[#allocation3 + $0x58] sm:$0xff] %vm492_vm3, %v2553_v37  ;;  %v2555_v36 = vpop.permute.xlu0 %2554 }
 0x34a   : > { %3655 = vrot.lane.b32.xlu1 %v6237_v16, %s5052_s18  ;;  %2590 = vst.msk [vmem:[#allocation3 + $0x60] sm:$0xff] %vm492_vm3, %v2555_v36 }
 0x34b   : > { %3657 = vrot.lane.b32.xlu0 %v6241_v10, %s5052_s18 }
 0x34c   : > { %v6516_v41 = vpop.permute.xlu1 %2886 }
 0x34d   : > { %v6518_v55 = vpop.permute.xlu0 %2888 }
 0x34e   : > { %3783 = vrot.lane.b32.xlu1 %v6399_v60, %s5053_s19 }
 0x34f   : > { %3785 = vrot.lane.b32.xlu0 %v6401_v23, %s5053_s19 }
 0x350   : > { %v2557_v54 = vpop.permute.xlu1 %2556 }
 0x351   : > { %2591 = vst.msk [vmem:[#allocation3 + $0x68] sm:$0xff] %vm492_vm3, %v2557_v54  ;;  %v2559_v35 = vpop.permute.xlu0 %2558 }
 0x352   : > { %3659 = vrot.lane.b32.xlu1 %v6267_v26, %s5052_s18  ;;  %2592 = vst.msk [vmem:[#allocation3 + $0x70] sm:$0xff] %vm492_vm3, %v2559_v35 }
 0x353   : > { %3661 = vrot.lane.b32.xlu0 %v6275_v31, %s5052_s18 }
 0x354   : > { %v6530_v16 = vpop.permute.xlu1 %2890 }
 0x355   : > { %v2659_v10 = vpop.permute.xlu0 %2658 }
 0x356   : > { %3787 = vrot.lane.b32.xlu1 %v6411_v28, %s5053_s19  ;;  %2706 = vst.msk [vmem:[#allocation3] sm:$0xff] %vm621_vm4, %v2659_v10 }
 0x357   : > { %3789 = vrot.lane.b32.xlu0 %v6413_v22, %s5053_s19 }
 0x358   : > { %v2561_v60 = vpop.permute.xlu1 %2560 }
 0x359   : > { %2593 = vst.msk [vmem:[#allocation3 + $0x78] sm:$0xff] %vm492_vm3, %v2561_v60  ;;  %v6538_v26 = vpop.permute.xlu0 %2892 }
 0x35a   : > { %3663 = vrot.lane.b32.xlu1 %v6324_v53, %s5052_s18 }
 0x35b   : > { %3665 = vrot.lane.b32.xlu0 %v6326_v51, %s5052_s18 }
 0x35c   : > { %v2661_v31 = vpop.permute.xlu1 %2660 }
 0x35d   : > { %v6544_v23 = vld [vmem:[#allocation3] sm:$0xff]  ;;  %2707 = vst.msk [vmem:[#allocation3 + $0x8] sm:$0xff] %vm621_vm4, %v2661_v31  ;;  %v2663_v28 = vpop.permute.xlu0 %2662 }
 0x35e   : > { %2788 = vst.msk [vmem:[#allocation3] sm:$0xff] %vm205_vm0, %v6216_v61  ;;  %3791 = vrot.lane.b32.xlu1 %v6423_v25, %s5053_s19 }
 0x35f   : > { %2708 = vst.msk [vmem:[#allocation3 + $0x10] sm:$0xff] %vm621_vm4, %v2663_v28  ;;  %3793 = vrot.lane.b32.xlu0 %v6425_v24, %s5053_s19  ;;  %v3607_v24 = vld [vmem:[#allocation2 + $0x199] sm:$0xff] }
 0x360   : > { %2916 = vst.msk [vmem:[#allocation3] sm:$0xff] %vm492_vm3, %v6444_v50  ;;  %v6556_v53 = vpop.permute.xlu1 %2894  ;;  %v3608_v50 = vld [vmem:[#allocation2 + $0x1a1] sm:$0xff] }
 0x361   : > { %v2997_v51 = vpop.permute.xlu0 %2996 }
 0x362   : > { %3667 = vrot.lane.b32.xlu1 %v6337_v58, %s5052_s18  ;;  %3044 = vst.msk [vmem:[#allocation3] sm:$0xff] %vm621_vm4, %v2997_v51 }
 0x363   : > { %3669 = vrot.lane.b32.xlu0 %v6450_v57, %s5052_s18  ;;  %v3624_v57 = vpack.c.bf16 %v3608_v50, %v3607_v24 }
 0x364   : > { %v6563_v61 = vld [vmem:[#allocation3 + $0x8] sm:$0xff]  ;;  %v2665_v22 = vpop.permute.xlu1 %2664 }
 0x365   : > { %2789 = vst.msk [vmem:[#allocation3 + $0x8] sm:$0xff] %vm205_vm0, %v6225_v20  ;;  %v2667_v59 = vpop.permute.xlu0 %2666 }
 0x366   : > { %v6567_v25 = vld [vmem:[#allocation3 + $0x10] sm:$0xff]  ;;  %2709 = vst.msk [vmem:[#allocation3 + $0x18] sm:$0xff] %vm621_vm4, %v2665_v22  ;;  %3795 = vrot.lane.b32.xlu1 %v6436_v63, %s5053_s19  ;;  %2710 = vst.msk [vmem:[#allocation3 + $0x20] sm:$0xff] %vm621_vm4, %v2667_v59 }
 0x367   : > { %2917 = vst.msk [vmem:[#allocation3 + $0x8] sm:$0xff] %vm492_vm3, %v6458_v18  ;;  %3797 = vrot.lane.b32.xlu0 %v6460_v17, %s5053_s19  ;;  %v3735_v63 = vld [vmem:[#allocation2 + $0x19a] sm:$0xff] }
 0x368   : > { %2790 = vst.msk [vmem:[#allocation3 + $0x10] sm:$0xff] %vm205_vm0, %v6250_v7  ;;  %v2999_v58 = vpop.permute.xlu1 %2998  ;;  %v3752_v62 = vpack.c.bf16 %v3736_v49, %v3735_v63 }
 0x369   : > { %2918 = vst.msk [vmem:[#allocation3 + $0x10] sm:$0xff] %vm492_vm3, %v6462_v11  ;;  %v3001_v18 = vpop.permute.xlu0 %3000  ;;  %v3060_v19 = vld [vmem:[#allocation3] sm:$0xff] }
 0x36a   : > { %3045 = vst.msk [vmem:[#allocation3 + $0x8] sm:$0xff] %vm621_vm4, %v2999_v58  ;;  %3671 = vrot.lane.b32.xlu1 %v3624_v57, %s5052_s18  ;;  %3046 = vst.msk [vmem:[#allocation3 + $0x10] sm:$0xff] %vm621_vm4, %v3001_v18  ;;  %4790 = vmatprep.mubr.msk.bf16.mxu1 %vm1000_vm5, %v3060_v19 }
 0x36b   : > { %3561 = vst.msk [vmem:[#allocation3] sm:$0xff] %vm205_vm0, %v6225_v20  ;;  %v3350_v20 = vsel %vm1049_vm2, %v6367_v33, 0 }
 0x36c   : > { %v2669_v17 = vpop.permute.xlu1 %2668 }
 0x36d   : > { %v6587_v11 = vld [vmem:[#allocation3 + $0x18] sm:$0xff]  ;;  %v6591_v38 = vld [vmem:[#allocation3 + $0x20] sm:$0xff]  ;;  %2711 = vst.msk [vmem:[#allocation3 + $0x28] sm:$0xff] %vm621_vm4, %v2669_v17  ;;  %v2671_v47 = vpop.permute.xlu0 %2670 }
 0x36e   : > { %2791 = vst.msk [vmem:[#allocation3 + $0x18] sm:$0xff] %vm205_vm0, %v6260_v21  ;;  %2792 = vst.msk [vmem:[#allocation3 + $0x20] sm:$0xff] %vm205_vm0, %v6264_v44  ;;  %3799 = vrot.lane.b32.xlu1 %v3752_v62, %s5053_s19  ;;  %v2770_v62 = vld [vmem:[#allocation2 + $0x180] sm:$0xff] }
 0x36f   : > { %2919 = vst.msk [vmem:[#allocation3 + $0x18] sm:$0xff] %vm492_vm3, %v6474_v56  ;;  %2920 = vst.msk [vmem:[#allocation3 + $0x20] sm:$0xff] %vm492_vm3, %v6476_v32 }
 0x370   : > { %2712 = vst.msk [vmem:[#allocation3 + $0x30] sm:$0xff] %vm621_vm4, %v2671_v47  ;;  %v3003_v12 = vpop.permute.xlu1 %3002 }
 0x371   : > { %v3061_v56 = vld [vmem:[#allocation3 + $0x8] sm:$0xff]  ;;  %3047 = vst.msk [vmem:[#allocation3 + $0x18] sm:$0xff] %vm621_vm4, %v3003_v12  ;;  %v3005_v37 = vpop.permute.xlu0 %3004  ;;  %v3062_v36 = vld [vmem:[#allocation3 + $0x10] sm:$0xff]  ;;  %v2771_v12 = vld [vmem:[#allocation2 + $0x188] sm:$0xff] }
 0x372   : > { %4791 = vmatmul.mubr.msk.bf16.vlgmr.msra.gmra.mrb[0].mxu1 %vm1000_vm5, %v3061_v56  ;;  %3562 = vst.msk [vmem:[#allocation3 + $0x8] sm:$0xff] %vm205_vm0, %v6250_v7  ;;  %3563 = vst.msk [vmem:[#allocation3 + $0x10] sm:$0xff] %vm205_vm0, %v6260_v21 }
 0x373   : > { %4823 = vmatpush3.bf16.msra.mxu1 %v3350_v20  ;;  %3048 = vst.msk [vmem:[#allocation3 + $0x20] sm:$0xff] %vm621_vm4, %v3005_v37  ;;  %4794 = vmatprep.mubr.msk.bf16.mxu1 %vm1000_vm5, %v3062_v36 }
 0x374   : > { %5023 = vmatprep.subr.msk.bf16.mxu1 %vm1049_vm2, %v6607_v13  ;;  %v6619_v33 = vld [vmem:[#allocation3 + $0x28] sm:$0xff]  ;;  %v2673_v32 = vpop.permute.xlu1 %2672 }
 0x375   : > { %2793 = vst.msk [vmem:[#allocation3 + $0x28] sm:$0xff] %vm205_vm0, %v6271_v27  ;;  %v2675_v7 = vpop.permute.xlu0 %2674 }
 0x376   : > { %2713 = vst.msk [vmem:[#allocation3 + $0x38] sm:$0xff] %vm621_vm4, %v2673_v32  ;;  %2714 = vst.msk [vmem:[#allocation3 + $0x40] sm:$0xff] %vm621_vm4, %v2675_v7 }
 0x377   : > { %v6623_v54 = vld [vmem:[#allocation3 + $0x30] sm:$0xff]  ;;  %2921 = vst.msk [vmem:[#allocation3 + $0x28] sm:$0xff] %vm492_vm3, %v6488_v52 }
 0x378   : > { %2794 = vst.msk [vmem:[#allocation3 + $0x30] sm:$0xff] %vm205_vm0, %v6273_v46  ;;  %v3007_v21 = vpop.permute.xlu1 %3006  ;;  %v3063_v35 = vld [vmem:[#allocation3 + $0x18] sm:$0xff] }
 0x379   : > { %2922 = vst.msk [vmem:[#allocation3 + $0x30] sm:$0xff] %vm492_vm3, %v6490_v29  ;;  %v3009_v10 = vpop.permute.xlu0 %3008 }
 0x37a   : > { %3049 = vst.msk [vmem:[#allocation3 + $0x28] sm:$0xff] %vm621_vm4, %v3007_v21  ;;  %4795 = vmatmul.mubr.msk.bf16.gmra.mrb[4].mxu1 %vm1000_vm5, %v3063_v35  ;;  %v3064_v60 = vld [vmem:[#allocation3 + $0x20] sm:$0xff]  ;;  %3050 = vst.msk [vmem:[#allocation3 + $0x30] sm:$0xff] %vm621_vm4, %v3009_v10  ;;  %v3543_v35 = vld [vmem:[#allocation2 + $0x198] sm:$0xff] }
 0x37b   : > { %3564 = vst.msk [vmem:[#allocation3 + $0x18] sm:$0xff] %vm205_vm0, %v6264_v44  ;;  %4798 = vmatprep.mubr.msk.bf16.mxu1 %vm1000_vm5, %v3064_v60  ;;  %3565 = vst.msk [vmem:[#allocation3 + $0x20] sm:$0xff] %vm205_vm0, %v6271_v27  ;;  %v3544_v60 = vld [vmem:[#allocation2 + $0x1a0] sm:$0xff] }
 0x37c   : > { %v2677_v29 = vpop.permute.xlu1 %2676 }
 0x37d   : > { %v6641_v52 = vld [vmem:[#allocation3 + $0x38] sm:$0xff]  ;;  %v6645_v31 = vld [vmem:[#allocation3 + $0x40] sm:$0xff]  ;;  %2715 = vst.msk [vmem:[#allocation3 + $0x48] sm:$0xff] %vm621_vm4, %v2677_v29  ;;  %v2679_v28 = vpop.permute.xlu0 %2678  ;;  %v3560_v29 = vpack.c.bf16 %v3544_v60, %v3543_v35 }
 0x37e   : > { %2795 = vst.msk [vmem:[#allocation3 + $0x38] sm:$0xff] %vm205_vm0, %v6279_v34  ;;  %2796 = vst.msk [vmem:[#allocation3 + $0x40] sm:$0xff] %vm205_vm0, %v6288_v30 }
 0x37f   : > { %2923 = vst.msk [vmem:[#allocation3 + $0x38] sm:$0xff] %vm492_vm3, %v6502_v48  ;;  %2924 = vst.msk [vmem:[#allocation3 + $0x40] sm:$0xff] %vm492_vm3, %v6504_v39 }
 0x380   : > { %2716 = vst.msk [vmem:[#allocation3 + $0x50] sm:$0xff] %vm621_vm4, %v2679_v28  ;;  %v3011_v44 = vpop.permute.xlu1 %3010 }
 0x381   : > { %v3065_v27 = vld [vmem:[#allocation3 + $0x28] sm:$0xff]  ;;  %3051 = vst.msk [vmem:[#allocation3 + $0x38] sm:$0xff] %vm621_vm4, %v3011_v44  ;;  %v3013_v51 = vpop.permute.xlu0 %3012  ;;  %v3066_v22 = vld [vmem:[#allocation3 + $0x30] sm:$0xff] }
 0x382   : > { %4799 = vmatmul.mubr.msk.bf16.gmra.mrb[8].mxu1 %vm1000_vm5, %v3065_v27  ;;  %3566 = vst.msk [vmem:[#allocation3 + $0x28] sm:$0xff] %vm205_vm0, %v6273_v46  ;;  %3567 = vst.msk [vmem:[#allocation3 + $0x30] sm:$0xff] %vm205_vm0, %v6279_v34 }
 0x383   : > { %3052 = vst.msk [vmem:[#allocation3 + $0x40] sm:$0xff] %vm621_vm4, %v3013_v51  ;;  %4802 = vmatprep.mubr.msk.bf16.mxu1 %vm1000_vm5, %v3066_v22  ;;  %v3906_v22 = vsel %vm1049_vm2, %v6607_v13, 0 }
 0x384   : > { %v6663_v48 = vld [vmem:[#allocation3 + $0x48] sm:$0xff]  ;;  %v2681_v39 = vpop.permute.xlu1 %2680 }
 0x385   : > { %2797 = vst.msk [vmem:[#allocation3 + $0x48] sm:$0xff] %vm205_vm0, %v6290_v40  ;;  %v2683_v50 = vpop.permute.xlu0 %2682 }
 0x386   : > { %2717 = vst.msk [vmem:[#allocation3 + $0x58] sm:$0xff] %vm621_vm4, %v2681_v39  ;;  %2718 = vst.msk [vmem:[#allocation3 + $0x60] sm:$0xff] %vm621_vm4, %v2683_v50 }
 0x387   : > { %v6667_v24 = vld [vmem:[#allocation3 + $0x50] sm:$0xff]  ;;  %2925 = vst.msk [vmem:[#allocation3 + $0x48] sm:$0xff] %vm492_vm3, %v6516_v41 }
 0x388   : > { %2798 = vst.msk [vmem:[#allocation3 + $0x50] sm:$0xff] %vm205_vm0, %v6296_v15  ;;  %v3015_v46 = vpop.permute.xlu1 %3014  ;;  %v3067_v34 = vld [vmem:[#allocation3 + $0x38] sm:$0xff] }
 0x389   : > { %2926 = vst.msk [vmem:[#allocation3 + $0x50] sm:$0xff] %vm492_vm3, %v6518_v55  ;;  %v3017_v59 = vpop.permute.xlu0 %3016 }
 0x38a   : > { %3053 = vst.msk [vmem:[#allocation3 + $0x48] sm:$0xff] %vm621_vm4, %v3015_v46  ;;  %4803 = vmatmul.mubr.msk.bf16.gmra.mrb[12].mxu1 %vm1000_vm5, %v3067_v34  ;;  %v3068_v58 = vld [vmem:[#allocation3 + $0x40] sm:$0xff]  ;;  %3054 = vst.msk [vmem:[#allocation3 + $0x50] sm:$0xff] %vm621_vm4, %v3017_v59 }
 0x38b   : > { %3568 = vst.msk [vmem:[#allocation3 + $0x38] sm:$0xff] %vm205_vm0, %v6288_v30  ;;  %4806 = vmatprep.mubr.msk.bf16.mxu1 %vm1000_vm5, %v3068_v58  ;;  %3569 = vst.msk [vmem:[#allocation3 + $0x40] sm:$0xff] %vm205_vm0, %v6290_v40 }
 0x38c   : > { %v2685_v55 = vpop.permute.xlu1 %2684 }
 0x38d   : > { %v6685_v41 = vld [vmem:[#allocation3 + $0x58] sm:$0xff]  ;;  %v6689_v57 = vld [vmem:[#allocation3 + $0x60] sm:$0xff]  ;;  %2719 = vst.msk [vmem:[#allocation3 + $0x68] sm:$0xff] %vm621_vm4, %v2685_v55  ;;  %v2687_v49 = vpop.permute.xlu0 %2686 }
 0x38e   : > { %2799 = vst.msk [vmem:[#allocation3 + $0x58] sm:$0xff] %vm205_vm0, %v6303_v14  ;;  %2800 = vst.msk [vmem:[#allocation3 + $0x60] sm:$0xff] %vm205_vm0, %v6308_v43 }
 0x38f   : > { %2927 = vst.msk [vmem:[#allocation3 + $0x58] sm:$0xff] %vm492_vm3, %v6530_v16  ;;  %2928 = vst.msk [vmem:[#allocation3 + $0x60] sm:$0xff] %vm492_vm3, %v6538_v26 }
 0x390   : > { %2720 = vst.msk [vmem:[#allocation3 + $0x70] sm:$0xff] %vm621_vm4, %v2687_v49  ;;  %v3019_v30 = vpop.permute.xlu1 %3018 }
 0x391   : > { %v3069_v40 = vld [vmem:[#allocation3 + $0x48] sm:$0xff]  ;;  %3055 = vst.msk [vmem:[#allocation3 + $0x58] sm:$0xff] %vm621_vm4, %v3019_v30  ;;  %v3021_v18 = vpop.permute.xlu0 %3020  ;;  %v3070_v19 = vld [vmem:[#allocation3 + $0x50] sm:$0xff] }
 0x392   : > { %4807 = vmatmul.mubr.msk.bf16.gmra.mrb[16].mxu1 %vm1000_vm5, %v3069_v40  ;;  %3570 = vst.msk [vmem:[#allocation3 + $0x48] sm:$0xff] %vm205_vm0, %v6296_v15  ;;  %3571 = vst.msk [vmem:[#allocation3 + $0x50] sm:$0xff] %vm205_vm0, %v6303_v14 }
 0x393   : > { %3056 = vst.msk [vmem:[#allocation3 + $0x60] sm:$0xff] %vm621_vm4, %v3021_v18  ;;  %4810 = vmatprep.mubr.msk.bf16.mxu1 %vm1000_vm5, %v3070_v19 }
 0x394   : > { %v6707_v16 = vld [vmem:[#allocation3 + $0x68] sm:$0xff]  ;;  %v2689_v26 = vpop.permute.xlu1 %2688 }
 0x395   : > { %2801 = vst.msk [vmem:[#allocation3 + $0x68] sm:$0xff] %vm205_vm0, %v6310_v45  ;;  %v2897_v17 = vpop.permute.xlu0 %2896 }
 0x396   : > { %2721 = vst.msk [vmem:[#allocation3 + $0x78] sm:$0xff] %vm621_vm4, %v2689_v26 }
 0x397   : > { %v6712_v63 = vld [vmem:[#allocation3 + $0x70] sm:$0xff]  ;;  %2929 = vst.msk [vmem:[#allocation3 + $0x68] sm:$0xff] %vm492_vm3, %v6556_v53  ;;  %v2787_v53 = vpack.c.bf16 %v2771_v12, %v2770_v62 }
 0x398   : > { %2802 = vst.msk [vmem:[#allocation3 + $0x70] sm:$0xff] %vm205_vm0, %v6322_v42  ;;  %v3023_v15 = vpop.permute.xlu1 %3022  ;;  %v3071_v14 = vld [vmem:[#allocation3 + $0x58] sm:$0xff] }
 0x399   : > { %2930 = vst.msk [vmem:[#allocation3 + $0x70] sm:$0xff] %vm492_vm3, %v2897_v17  ;;  %v3025_v47 = vpop.permute.xlu0 %3024 }
 0x39a   : > { %3057 = vst.msk [vmem:[#allocation3 + $0x68] sm:$0xff] %vm621_vm4, %v3023_v15  ;;  %4811 = vmatmul.mubr.msk.bf16.gmra.mrb[20].mxu1 %vm1000_vm5, %v3071_v14  ;;  %v3072_v20 = vld [vmem:[#allocation3 + $0x60] sm:$0xff]  ;;  %3058 = vst.msk [vmem:[#allocation3 + $0x70] sm:$0xff] %vm621_vm4, %v3025_v47 }
 0x39b   : > { %3572 = vst.msk [vmem:[#allocation3 + $0x58] sm:$0xff] %vm205_vm0, %v6308_v43  ;;  %4814 = vmatprep.mubr.msk.bf16.mxu1 %vm1000_vm5, %v3072_v20  ;;  %3573 = vst.msk [vmem:[#allocation3 + $0x60] sm:$0xff] %vm205_vm0, %v6310_v45 }
 0x39c   : > { %v2899_v37 = vpop.permute.xlu1 %2898 }
 0x39d   : > { %v6727_v56 = vld [vmem:[#allocation3 + $0x78] sm:$0xff]  ;;  %v3642_v36 = vpop.permute.xlu0 %3641 }
 0x39e   : > { %2803 = vst.msk [vmem:[#allocation3 + $0x78] sm:$0xff] %vm205_vm0, %v2787_v53 }
 0x39f   : > { %2931 = vst.msk [vmem:[#allocation3 + $0x78] sm:$0xff] %vm492_vm3, %v2899_v37  ;;  %3689 = vst.msk [vmem:[#allocation3] sm:$0xff] %vm492_vm3, %v3642_v36 }
 0x3a0   : > { %v3027_v43 = vpop.permute.xlu1 %3026 }
 0x3a1   : > { %v3073_v32 = vld [vmem:[#allocation3 + $0x68] sm:$0xff]  ;;  %3059 = vst.msk [vmem:[#allocation3 + $0x78] sm:$0xff] %vm621_vm4, %v3027_v43  ;;  %v3770_v7 = vpop.permute.xlu0 %3769  ;;  %v3074_v21 = vld [vmem:[#allocation3 + $0x70] sm:$0xff] }
 0x3a2   : > { %4815 = vmatmul.mubr.msk.bf16.gmra.mrb[24].mxu1 %vm1000_vm5, %v3073_v32  ;;  %3574 = vst.msk [vmem:[#allocation3 + $0x68] sm:$0xff] %vm205_vm0, %v6322_v42  ;;  %3575 = vst.msk [vmem:[#allocation3 + $0x70] sm:$0xff] %vm205_vm0, %v2787_v53 }
 0x3a3   : > { %3817 = vst.msk [vmem:[#allocation3] sm:$0xff] %vm621_vm4, %v3770_v7  ;;  %4818 = vmatprep.mubr.msk.bf16.mxu1 %vm1000_vm5, %v3074_v21 }
 0x3a4   : > { %v3644_v45 = vpop.permute.xlu1 %3643 }
 0x3a5   : > { %3690 = vst.msk [vmem:[#allocation3 + $0x8] sm:$0xff] %vm492_vm3, %v3644_v45  ;;  %v3646_v10 = vpop.permute.xlu0 %3645 }
 0x3a6   : > { %3691 = vst.msk [vmem:[#allocation3 + $0x10] sm:$0xff] %vm492_vm3, %v3646_v10 }
 0x3a8   : > { %v3772_v28 = vpop.permute.xlu1 %3771  ;;  %v3075_v44 = vld [vmem:[#allocation3 + $0x78] sm:$0xff] }
 0x3a9   : > { %3818 = vst.msk [vmem:[#allocation3 + $0x8] sm:$0xff] %vm621_vm4, %v3772_v28  ;;  %v3774_v42 = vpop.permute.xlu0 %3773 }
 0x3aa   : > { %4819 = vmatmul.mubr.msk.bf16.gmra.mrb[28].mxu1 %vm1000_vm5, %v3075_v44  ;;  %3576 = vst.msk [vmem:[#allocation3 + $0x78] sm:$0xff] %vm205_vm0, %v3560_v29 }
 0x3ab   : > { %4824 = vmatprep.mubr.msk.bf16.mxu1 %vm1000_vm5, %v6544_v23  ;;  %3819 = vst.msk [vmem:[#allocation3 + $0x10] sm:$0xff] %vm621_vm4, %v3774_v42 }
 0x3ac   : > { %v3648_v27 = vpop.permute.xlu1 %3647 }
 0x3ad   : > { %3692 = vst.msk [vmem:[#allocation3 + $0x18] sm:$0xff] %vm492_vm3, %v3648_v27  ;;  %v3650_v51 = vpop.permute.xlu0 %3649 }
 0x3ae   : > { %3693 = vst.msk [vmem:[#allocation3 + $0x20] sm:$0xff] %vm492_vm3, %v3650_v51 }
 0x3b0   : > { %v3776_v39 = vpop.permute.xlu1 %3775 }
 0x3b1   : > { %3820 = vst.msk [vmem:[#allocation3 + $0x18] sm:$0xff] %vm621_vm4, %v3776_v39  ;;  %v3778_v50 = vpop.permute.xlu0 %3777 }
 0x3b2   : > { %4825 = vmatmul.mubr.msk.bf16.vlgmr.msra.gmra.mrb[0].mxu1 %vm1000_vm5, %v6563_v61  ;;  %3821 = vst.msk [vmem:[#allocation3 + $0x20] sm:$0xff] %vm621_vm4, %v3778_v50  ;;  %v3835_v26 = vld [vmem:[#allocation3 + $0x10] sm:$0xff] }
 0x3b3   : > { %4857 = vmatpush3.bf16.msra.mxu1 %v3906_v22  ;;  %4828 = vmatprep.mubr.msk.bf16.mxu1 %vm1000_vm5, %v6567_v25 }
 0x3b4   : > { %v3652_v23 = vpop.permute.xlu1 %3651 }
 0x3b5   : > { %3694 = vst.msk [vmem:[#allocation3 + $0x28] sm:$0xff] %vm492_vm3, %v3652_v23  ;;  %v3654_v46 = vpop.permute.xlu0 %3653 }
 0x3b6   : > { %3695 = vst.msk [vmem:[#allocation3 + $0x30] sm:$0xff] %vm492_vm3, %v3654_v46 }
 0x3b8   : > { %v3780_v13 = vpop.permute.xlu1 %3779  ;;  %v3836_v17 = vld [vmem:[#allocation3 + $0x18] sm:$0xff] }
 0x3b9   : > { %3822 = vst.msk [vmem:[#allocation3 + $0x28] sm:$0xff] %vm621_vm4, %v3780_v13  ;;  %v3782_v61 = vpop.permute.xlu0 %3781  ;;  %v3837_v15 = vld [vmem:[#allocation3 + $0x20] sm:$0xff] }
 0x3ba   : > { %4829 = vmatmul.mubr.msk.bf16.gmra.mrb[4].mxu1 %vm1000_vm5, %v6587_v11  ;;  %3823 = vst.msk [vmem:[#allocation3 + $0x30] sm:$0xff] %vm621_vm4, %v3782_v61 }
 0x3bb   : > { %4832 = vmatprep.mubr.msk.bf16.mxu1 %vm1000_vm5, %v6591_v38 }
 0x3bc   : > { %v3656_v25 = vpop.permute.xlu1 %3655 }
 0x3bd   : > { %3696 = vst.msk [vmem:[#allocation3 + $0x38] sm:$0xff] %vm492_vm3, %v3656_v25  ;;  %v3658_v34 = vpop.permute.xlu0 %3657 }
 0x3be   : > { %3697 = vst.msk [vmem:[#allocation3 + $0x40] sm:$0xff] %vm492_vm3, %v3658_v34 }
 0x3c0   : > { %v3784_v59 = vpop.permute.xlu1 %3783 }
 0x3c1   : > { %3824 = vst.msk [vmem:[#allocation3 + $0x38] sm:$0xff] %vm621_vm4, %v3784_v59  ;;  %v3786_v58 = vpop.permute.xlu0 %3785 }
 0x3c2   : > { %4833 = vmatmul.mubr.msk.bf16.gmra.mrb[8].mxu1 %vm1000_vm5, %v6619_v33  ;;  %3825 = vst.msk [vmem:[#allocation3 + $0x40] sm:$0xff] %vm621_vm4, %v3786_v58 }
 0x3c3   : > { %4836 = vmatprep.mubr.msk.bf16.mxu1 %vm1000_vm5, %v6623_v54 }
 0x3c4   : > { %v3660_v11 = vpop.permute.xlu1 %3659 }
 0x3c5   : > { %3698 = vst.msk [vmem:[#allocation3 + $0x48] sm:$0xff] %vm492_vm3, %v3660_v11  ;;  %v3662_v38 = vpop.permute.xlu0 %3661 }
 0x3c6   : > { %3699 = vst.msk [vmem:[#allocation3 + $0x50] sm:$0xff] %vm492_vm3, %v3662_v38 }
 0x3c8   : > { %v3788_v55 = vpop.permute.xlu1 %3787  ;;  %v3840_v14 = vld [vmem:[#allocation3 + $0x38] sm:$0xff] }
 0x3c9   : > { %3826 = vst.msk [vmem:[#allocation3 + $0x48] sm:$0xff] %vm621_vm4, %v3788_v55  ;;  %v3790_v49 = vpop.permute.xlu0 %3789  ;;  %v3841_v62 = vld [vmem:[#allocation3 + $0x40] sm:$0xff] }
 0x3ca   : > { %4837 = vmatmul.mubr.msk.bf16.gmra.mrb[12].mxu1 %vm1000_vm5, %v6641_v52  ;;  %3827 = vst.msk [vmem:[#allocation3 + $0x50] sm:$0xff] %vm621_vm4, %v3790_v49 }
 0x3cb   : > { %4840 = vmatprep.mubr.msk.bf16.mxu1 %vm1000_vm5, %v6645_v31 }
 0x3cc   : > { %v3664_v33 = vpop.permute.xlu1 %3663 }
 0x3cd   : > { %3700 = vst.msk [vmem:[#allocation3 + $0x58] sm:$0xff] %vm492_vm3, %v3664_v33  ;;  %v3666_v54 = vpop.permute.xlu0 %3665 }
 0x3ce   : > { %3701 = vst.msk [vmem:[#allocation3 + $0x60] sm:$0xff] %vm492_vm3, %v3666_v54 }
 0x3d0   : > { %v3792_v30 = vpop.permute.xlu1 %3791  ;;  %v3842_v47 = vld [vmem:[#allocation3 + $0x48] sm:$0xff] }
 0x3d1   : > { %3828 = vst.msk [vmem:[#allocation3 + $0x58] sm:$0xff] %vm621_vm4, %v3792_v30  ;;  %v3794_v40 = vpop.permute.xlu0 %3793  ;;  %v3843_v20 = vld [vmem:[#allocation3 + $0x50] sm:$0xff] }
 0x3d2   : > { %4841 = vmatmul.mubr.msk.bf16.gmra.mrb[16].mxu1 %vm1000_vm5, %v6663_v48  ;;  %3829 = vst.msk [vmem:[#allocation3 + $0x60] sm:$0xff] %vm621_vm4, %v3794_v40 }
 0x3d3   : > { %4844 = vmatprep.mubr.msk.bf16.mxu1 %vm1000_vm5, %v6667_v24 }
 0x3d4   : > { %v3668_v52 = vpop.permute.xlu1 %3667 }
 0x3d5   : > { %3702 = vst.msk [vmem:[#allocation3 + $0x68] sm:$0xff] %vm492_vm3, %v3668_v52  ;;  %v3670_v31 = vpop.permute.xlu0 %3669 }
 0x3d6   : > { %3703 = vst.msk [vmem:[#allocation3 + $0x70] sm:$0xff] %vm492_vm3, %v3670_v31 }
 0x3d8   : > { %v3796_v18 = vpop.permute.xlu1 %3795  ;;  %v3844_v12 = vld [vmem:[#allocation3 + $0x58] sm:$0xff] }
 0x3d9   : > { %3830 = vst.msk [vmem:[#allocation3 + $0x68] sm:$0xff] %vm621_vm4, %v3796_v18  ;;  %v3798_v19 = vpop.permute.xlu0 %3797  ;;  %v3845_v53 = vld [vmem:[#allocation3 + $0x60] sm:$0xff] }
 0x3da   : > { %4845 = vmatmul.mubr.msk.bf16.gmra.mrb[20].mxu1 %vm1000_vm5, %v6685_v41  ;;  %3831 = vst.msk [vmem:[#allocation3 + $0x70] sm:$0xff] %vm621_vm4, %v3798_v19  ;;  %v3833_v41 = vld [vmem:[#allocation3] sm:$0xff] }
 0x3db   : > { %4848 = vmatprep.mubr.msk.bf16.mxu1 %vm1000_vm5, %v6689_v57  ;;  %v3834_v57 = vld [vmem:[#allocation3 + $0x8] sm:$0xff] }
 0x3dc   : > { %v3672_v48 = vpop.permute.xlu1 %3671 }
 0x3dd   : > { %3704 = vst.msk [vmem:[#allocation3 + $0x78] sm:$0xff] %vm492_vm3, %v3672_v48 }
 0x3e0   : > { %v3800_v24 = vpop.permute.xlu1 %3799 }
 0x3e1   : > { %3832 = vst.msk [vmem:[#allocation3 + $0x78] sm:$0xff] %vm621_vm4, %v3800_v24  ;;  %v3847_v37 = vld [vmem:[#allocation3 + $0x70] sm:$0xff] }
 0x3e2   : > { %4849 = vmatmul.mubr.msk.bf16.gmra.mrb[24].mxu1 %vm1000_vm5, %v6707_v16  ;;  %v3838_v16 = vld [vmem:[#allocation3 + $0x28] sm:$0xff] }
 0x3e3   : > { %4852 = vmatprep.mubr.msk.bf16.mxu1 %vm1000_vm5, %v6712_v63  ;;  %v3839_v63 = vld [vmem:[#allocation3 + $0x30] sm:$0xff] }
 0x3e8   : > { %v3848_v36 = vld [vmem:[#allocation3 + $0x78] sm:$0xff] }
 0x3ea   : > { %4853 = vmatmul.mubr.msk.bf16.gmra.mrb[28].mxu1 %vm1000_vm5, %v6727_v56  ;;  %v3846_v56 = vld [vmem:[#allocation3 + $0x68] sm:$0xff] }
 0x3eb   : > { %4858 = vmatprep.mubr.msk.bf16.mxu1 %vm1000_vm5, %v3833_v41 }
 0x3f2   : > { %4859 = vmatmul.mubr.msk.bf16.vlgmr.msra.gmra.mrb[0].mxu1 %vm1000_vm5, %v3834_v57 }
 0x3f3   : > { %4862 = vmatprep.mubr.msk.bf16.mxu1 %vm1000_vm5, %v3835_v26 }
 0x3fa   : > { %4863 = vmatmul.mubr.msk.bf16.gmra.mrb[4].mxu1 %vm1000_vm5, %v3836_v17 }
 0x3fb   : > { %4866 = vmatprep.mubr.msk.bf16.mxu1 %vm1000_vm5, %v3837_v15 }
 0x402   : > { %4867 = vmatmul.mubr.msk.bf16.gmra.mrb[8].mxu1 %vm1000_vm5, %v3838_v16 }
 0x403   : > { %4870 = vmatprep.mubr.msk.bf16.mxu1 %vm1000_vm5, %v3839_v63 }
 0x40a   : > { %4871 = vmatmul.mubr.msk.bf16.gmra.mrb[12].mxu1 %vm1000_vm5, %v3840_v14 }
 0x40b   : > { %4874 = vmatprep.mubr.msk.bf16.mxu1 %vm1000_vm5, %v3841_v62 }
 0x412   : > { %4875 = vmatmul.mubr.msk.bf16.gmra.mrb[16].mxu1 %vm1000_vm5, %v3842_v47 }
 0x413   : > { %4878 = vmatprep.mubr.msk.bf16.mxu1 %vm1000_vm5, %v3843_v20 }
 0x41a   : > { %4879 = vmatmul.mubr.msk.bf16.gmra.mrb[20].mxu1 %vm1000_vm5, %v3844_v12 }
 0x41b   : > { %4882 = vmatprep.mubr.msk.bf16.mxu1 %vm1000_vm5, %v3845_v53 }
 0x422   : > { %4883 = vmatmul.mubr.msk.bf16.gmra.mrb[24].mxu1 %vm1000_vm5, %v3846_v56 }
 0x423   : > { %4886 = vmatprep.mubr.msk.bf16.mxu1 %vm1000_vm5, %v3847_v37 }
 0x42a   : > { %4887 = vmatmul.mubr.msk.bf16.gmra.mrb[28].mxu1 %vm1000_vm5, %v3848_v36 }
 0x4c5   : > { %v6821_v43 = vpop.f32.mrb[0].mxu1 }
 0x4c6   : > { %v6823_v32 = vpop.f32.mrb[1].mxu1  ;;  %v4173_v35 = vmul.f32 %v6821_v43, %v6821_v43  ;;  %v4104_v44 = vsel %vm205_vm0, %v6821_v43, 0.0 }
 0x4c7   : > { %v4171_v7 = vmul.f32 %v6823_v32, %v6823_v32  ;;  %v6827_v21 = vpop.f32.mrb[2].mxu1  ;;  %v4101_v10 = vsel %vm205_vm0, %v6823_v32, 0.0 }
 0x4c8   : > { %v6829_v45 = vpop.f32.mrb[3].mxu1  ;;  %v4174_v27 = vmul.f32 %v6827_v21, %v6827_v21  ;;  %v4206_v50 = vsel %vm205_vm0, %v4173_v35, 0.0  ;;  %v4106_v23 = vsel %vm205_vm0, %v6827_v21, 0.0 }
 0x4c9   : > { %v4102_v60 = vsel %vm205_vm0, %v6829_v45, 0.0  ;;  %v4172_v29 = vmul.f32 %v6829_v45, %v6829_v45  ;;  %v4203_v42 = vsel %vm205_vm0, %v4171_v7, 0.0 }
 0x4ca   : > { %v4103_v28 = vadd.f32 %v4102_v60, %v4101_v10  ;;  %v4208_v34 = vsel %vm205_vm0, %v4174_v27, 0.0 }
 0x4cb   : > { %v4204_v51 = vsel %vm205_vm0, %v4172_v29, 0.0 }
 0x4cc   : > { %v4105_v22 = vadd.f32 %v4104_v44, %v4103_v28  ;;  %v4205_v39 = vadd.f32 %v4204_v51, %v4203_v42 }
 0x4cd   : > { %v6848_v46 = vpop.f32.mrb[4].mxu1 }
 0x4ce   : > { %v4207_v13 = vadd.f32 %v4206_v50, %v4205_v39  ;;  %v6850_v61 = vpop.f32.mrb[5].mxu1  ;;  %v4107_v25 = vadd.f32 %v4106_v23, %v4105_v22  ;;  %v4177_v33 = vmul.f32 %v6848_v46, %v6848_v46  ;;  %v4112_v18 = vsel %vm205_vm0, %v6848_v46, 0.0 }
 0x4cf   : > { %v4108_v59 = vsel %vm205_vm0, %v6850_v61, 0.0  ;;  %v4175_v58 = vmul.f32 %v6850_v61, %v6850_v61  ;;  %v6857_v11 = vpop.f32.mrb[6].mxu1 }
 0x4d0   : > { %v4109_v38 = vadd.f32 %v4108_v59, %v4107_v25  ;;  %v4209_v55 = vadd.f32 %v4208_v34, %v4207_v13  ;;  %v6859_v49 = vpop.f32.mrb[7].mxu1  ;;  %v4178_v19 = vmul.f32 %v6857_v11, %v6857_v11  ;;  %v4214_v57 = vsel %vm205_vm0, %v4177_v33, 0.0 }
 0x4d1   : > { %v4210_v54 = vsel %vm205_vm0, %v4175_v58, 0.0  ;;  %v4110_v30 = vsel %vm205_vm0, %v6859_v49, 0.0  ;;  %v4176_v40 = vmul.f32 %v6859_v49, %v6859_v49  ;;  %v4114_v26 = vsel %vm205_vm0, %v6857_v11, 0.0 }
 0x4d2   : > { %v4211_v52 = vadd.f32 %v4210_v54, %v4209_v55  ;;  %v4111_v31 = vadd.f32 %v4110_v30, %v4109_v38  ;;  %v4216_v14 = vsel %vm205_vm0, %v4178_v19, 0.0 }
 0x4d3   : > { %v4212_v48 = vsel %vm205_vm0, %v4176_v40, 0.0 }
 0x4d4   : > { %v4113_v24 = vadd.f32 %v4112_v18, %v4111_v31  ;;  %v4213_v41 = vadd.f32 %v4212_v48, %v4211_v52 }
 0x4d5   : > { %v6876_v17 = vpop.f32.mrb[8].mxu1 }
 0x4d6   : > { %v4215_v15 = vadd.f32 %v4214_v57, %v4213_v41  ;;  %v6878_v16 = vpop.f32.mrb[9].mxu1  ;;  %v4115_v63 = vadd.f32 %v4114_v26, %v4113_v24  ;;  %v4181_v37 = vmul.f32 %v6876_v17, %v6876_v17  ;;  %v4120_v29 = vsel %vm205_vm0, %v6876_v17, 0.0 }
 0x4d7   : > { %v4116_v62 = vsel %vm205_vm0, %v6878_v16, 0.0  ;;  %v4179_v47 = vmul.f32 %v6878_v16, %v6878_v16  ;;  %v6885_v20 = vpop.f32.mrb[10].mxu1 }
 0x4d8   : > { %v4117_v12 = vadd.f32 %v4116_v62, %v4115_v63  ;;  %v4217_v53 = vadd.f32 %v4216_v14, %v4215_v15  ;;  %v6887_v56 = vpop.f32.mrb[11].mxu1  ;;  %v4182_v28 = vmul.f32 %v6885_v20, %v6885_v20  ;;  %v4222_v51 = vsel %vm205_vm0, %v4181_v37, 0.0 }
 0x4d9   : > { %v4218_v36 = vsel %vm205_vm0, %v4179_v47, 0.0  ;;  %v4118_v7 = vsel %vm205_vm0, %v6887_v56, 0.0  ;;  %v4180_v35 = vmul.f32 %v6887_v56, %v6887_v56  ;;  %v4122_v22 = vsel %vm205_vm0, %v6885_v20, 0.0 }
 0x4da   : > { %v4219_v10 = vadd.f32 %v4218_v36, %v4217_v53  ;;  %v4119_v60 = vadd.f32 %v4118_v7, %v4117_v12  ;;  %v4224_v25 = vsel %vm205_vm0, %v4182_v28, 0.0 }
 0x4db   : > { %v4220_v44 = vsel %vm205_vm0, %v4180_v35, 0.0 }
 0x4dc   : > { %v4121_v42 = vadd.f32 %v4120_v29, %v4119_v60  ;;  %v4221_v27 = vadd.f32 %v4220_v44, %v4219_v10 }
 0x4dd   : > { %v6904_v39 = vpop.f32.mrb[12].mxu1 }
 0x4de   : > { %v4223_v50 = vadd.f32 %v4222_v51, %v4221_v27  ;;  %v6906_v23 = vpop.f32.mrb[13].mxu1  ;;  %v4123_v13 = vadd.f32 %v4122_v22, %v4121_v42  ;;  %v4185_v54 = vmul.f32 %v6904_v39, %v6904_v39  ;;  %v4128_v19 = vsel %vm205_vm0, %v6904_v39, 0.0 }
 0x4df   : > { %v4124_v34 = vsel %vm205_vm0, %v6906_v23, 0.0  ;;  %v4183_v59 = vmul.f32 %v6906_v23, %v6906_v23  ;;  %v6913_v58 = vpop.f32.mrb[14].mxu1 }
 0x4e0   : > { %v4125_v38 = vadd.f32 %v4124_v34, %v4123_v13  ;;  %v4225_v55 = vadd.f32 %v4224_v25, %v4223_v50  ;;  %v6915_v33 = vpop.f32.mrb[15].mxu1  ;;  %v4186_v48 = vmul.f32 %v6913_v58, %v6913_v58  ;;  %v4230_v26 = vsel %vm205_vm0, %v4185_v54, 0.0 }
 0x4e1   : > { %v4226_v30 = vsel %vm205_vm0, %v4183_v59, 0.0  ;;  %v4126_v40 = vsel %vm205_vm0, %v6915_v33, 0.0  ;;  %v4184_v52 = vmul.f32 %v6915_v33, %v6915_v33  ;;  %v4130_v15 = vsel %vm205_vm0, %v6913_v58, 0.0 }
 0x4e2   : > { %v4227_v31 = vadd.f32 %v4226_v30, %v4225_v55  ;;  %v4127_v18 = vadd.f32 %v4126_v40, %v4125_v38  ;;  %v4232_v12 = vsel %vm205_vm0, %v4186_v48, 0.0 }
 0x4e3   : > { %v4228_v24 = vsel %vm205_vm0, %v4184_v52, 0.0 }
 0x4e4   : > { %v4129_v41 = vadd.f32 %v4128_v19, %v4127_v18  ;;  %v4229_v57 = vadd.f32 %v4228_v24, %v4227_v31 }
 0x4e5   : > { %v6932_v63 = vpop.f32.mrb[16].mxu1 }
 0x4e6   : > { %v4231_v14 = vadd.f32 %v4230_v26, %v4229_v57  ;;  %v6934_v62 = vpop.f32.mrb[17].mxu1  ;;  %v4131_v47 = vadd.f32 %v4130_v15, %v4129_v41  ;;  %v4189_v60 = vmul.f32 %v6932_v63, %v6932_v63  ;;  %v4136_v51 = vsel %vm205_vm0, %v6932_v63, 0.0 }
 0x4e7   : > { %v4132_v53 = vsel %vm205_vm0, %v6934_v62, 0.0  ;;  %v4187_v37 = vmul.f32 %v6934_v62, %v6934_v62  ;;  %v6941_v36 = vpop.f32.mrb[18].mxu1 }
 0x4e8   : > { %v4133_v7 = vadd.f32 %v4132_v53, %v4131_v47  ;;  %v4233_v35 = vadd.f32 %v4232_v12, %v4231_v14  ;;  %v6943_v10 = vpop.f32.mrb[19].mxu1  ;;  %v4190_v22 = vmul.f32 %v6941_v36, %v6941_v36  ;;  %v4238_v34 = vsel %vm205_vm0, %v4189_v60, 0.0 }
 0x4e9   : > { %v4234_v29 = vsel %vm205_vm0, %v4187_v37, 0.0  ;;  %v4134_v28 = vsel %vm205_vm0, %v6943_v10, 0.0  ;;  %v4188_v44 = vmul.f32 %v6943_v10, %v6943_v10  ;;  %v4138_v59 = vsel %vm205_vm0, %v6941_v36, 0.0 }
 0x4ea   : > { %v4235_v42 = vadd.f32 %v4234_v29, %v4233_v35  ;;  %v4135_v27 = vadd.f32 %v4134_v28, %v4133_v7  ;;  %v4240_v40 = vsel %vm205_vm0, %v4190_v22, 0.0 }
 0x4eb   : > { %v4236_v50 = vsel %vm205_vm0, %v4188_v44, 0.0 }
 0x4ec   : > { %v4137_v13 = vadd.f32 %v4136_v51, %v4135_v27  ;;  %v4237_v25 = vadd.f32 %v4236_v50, %v4235_v42 }
 0x4ed   : > { %v6960_v38 = vpop.f32.mrb[20].mxu1 }
 0x4ee   : > { %v4239_v55 = vadd.f32 %v4238_v34, %v4237_v25  ;;  %v6962_v54 = vpop.f32.mrb[21].mxu1  ;;  %v4139_v30 = vadd.f32 %v4138_v59, %v4137_v13  ;;  %v4193_v41 = vmul.f32 %v6960_v38, %v6960_v38  ;;  %v4144_v12 = vsel %vm205_vm0, %v6960_v38, 0.0 }
 0x4ef   : > { %v4140_v52 = vsel %vm205_vm0, %v6962_v54, 0.0  ;;  %v4191_v31 = vmul.f32 %v6962_v54, %v6962_v54  ;;  %v6969_v18 = vpop.f32.mrb[22].mxu1 }
 0x4f0   : > { %v4141_v19 = vadd.f32 %v4140_v52, %v4139_v30  ;;  %v4241_v48 = vadd.f32 %v4240_v40, %v4239_v55  ;;  %v6971_v24 = vpop.f32.mrb[23].mxu1  ;;  %v4194_v53 = vmul.f32 %v6969_v18, %v6969_v18  ;;  %v4246_v60 = vsel %vm205_vm0, %v4193_v41, 0.0 }
 0x4f1   : > { %v4242_v57 = vsel %vm205_vm0, %v4191_v31, 0.0  ;;  %v4142_v26 = vsel %vm205_vm0, %v6971_v24, 0.0  ;;  %v4192_v15 = vmul.f32 %v6971_v24, %v6971_v24  ;;  %v4146_v29 = vsel %vm205_vm0, %v6969_v18, 0.0 }
 0x4f2   : > { %v4243_v14 = vadd.f32 %v4242_v57, %v4241_v48  ;;  %v4143_v47 = vadd.f32 %v4142_v26, %v4141_v19  ;;  %v4248_v51 = vsel %vm205_vm0, %v4194_v53, 0.0 }
 0x4f3   : > { %v4244_v37 = vsel %vm205_vm0, %v4192_v15, 0.0 }
 0x4f4   : > { %v4145_v7 = vadd.f32 %v4144_v12, %v4143_v47  ;;  %v4245_v35 = vadd.f32 %v4244_v37, %v4243_v14 }
 0x4f5   : > { %v6988_v28 = vpop.f32.mrb[24].mxu1 }
 0x4f6   : > { %v4247_v44 = vadd.f32 %v4246_v60, %v4245_v35  ;;  %v6990_v42 = vpop.f32.mrb[25].mxu1  ;;  %v4147_v27 = vadd.f32 %v4146_v29, %v4145_v7  ;;  %v4197_v55 = vmul.f32 %v6988_v28, %v6988_v28  ;;  %v4152_v48 = vsel %vm205_vm0, %v6988_v28, 0.0 }
 0x4f7   : > { %v4148_v22 = vsel %vm205_vm0, %v6990_v42, 0.0  ;;  %v4195_v50 = vmul.f32 %v6990_v42, %v6990_v42  ;;  %v6997_v13 = vpop.f32.mrb[26].mxu1 }
 0x4f8   : > { %v4149_v25 = vadd.f32 %v4148_v22, %v4147_v27  ;;  %v4249_v34 = vadd.f32 %v4248_v51, %v4247_v44  ;;  %v6999_v59 = vpop.f32.mrb[27].mxu1  ;;  %v4198_v41 = vmul.f32 %v6997_v13, %v6997_v13  ;;  %v4254_v14 = vsel %vm205_vm0, %v4197_v55, 0.0 }
 0x4f9   : > { %v4250_v30 = vsel %vm205_vm0, %v4195_v50, 0.0  ;;  %v4150_v40 = vsel %vm205_vm0, %v6999_v59, 0.0  ;;  %v4196_v52 = vmul.f32 %v6999_v59, %v6999_v59  ;;  %v4154_v47 = vsel %vm205_vm0, %v6997_v13, 0.0 }
 0x4fa   : > { %v4251_v31 = vadd.f32 %v4250_v30, %v4249_v34  ;;  %v4151_v19 = vadd.f32 %v4150_v40, %v4149_v25  ;;  %v4256_v35 = vsel %vm205_vm0, %v4198_v41, 0.0 }
 0x4fb   : > { %v4252_v57 = vsel %vm205_vm0, %v4196_v52, 0.0 }
 0x4fc   : > { %v4153_v26 = vadd.f32 %v4152_v48, %v4151_v19  ;;  %v4253_v15 = vadd.f32 %v4252_v57, %v4251_v31 }
 0x4fd   : > { %v7016_v12 = vpop.f32.mrb[28].mxu1 }
 0x4fe   : > { %v4255_v53 = vadd.f32 %v4254_v14, %v4253_v15  ;;  %v7018_v37 = vpop.f32.mrb[29].mxu1  ;;  %v4155_v7 = vadd.f32 %v4154_v47, %v4153_v26  ;;  %v4201_v50 = vmul.f32 %v7016_v12, %v7016_v12  ;;  %v4160_v52 = vsel %vm205_vm0, %v7016_v12, 0.0 }
 0x4ff   : > { %v4156_v60 = vsel %vm205_vm0, %v7018_v37, 0.0  ;;  %v4199_v29 = vmul.f32 %v7018_v37, %v7018_v37  ;;  %v7025_v44 = vpop.f32.mrb[30].mxu1 }
 0x500   : > { %v4157_v27 = vadd.f32 %v4156_v60, %v4155_v7  ;;  %v4257_v51 = vadd.f32 %v4256_v35, %v4255_v53  ;;  %v7027_v22 = vpop.f32.mrb[31].mxu1  ;;  %v4202_v31 = vmul.f32 %v7025_v44, %v7025_v44  ;;  %v4262_v57 = vsel %vm205_vm0, %v4201_v50, 0.0 }
 0x501   : > { %v4258_v25 = vsel %vm205_vm0, %v4199_v29, 0.0  ;;  %v4158_v34 = vsel %vm205_vm0, %v7027_v22, 0.0  ;;  %v4200_v55 = vmul.f32 %v7027_v22, %v7027_v22  ;;  %v4162_v26 = vsel %vm205_vm0, %v7025_v44, 0.0 }
 0x502   : > { %v4259_v30 = vadd.f32 %v4258_v25, %v4257_v51  ;;  %v4159_v40 = vadd.f32 %v4158_v34, %v4157_v27  ;;  %v4264_v47 = vsel %vm205_vm0, %v4202_v31, 0.0 }
 0x503   : > { %v4260_v19 = vsel %vm205_vm0, %v4200_v55, 0.0 }
 0x504   : > { %v4161_v48 = vadd.f32 %v4160_v52, %v4159_v40  ;;  %v4261_v41 = vadd.f32 %v4260_v19, %v4259_v30 }
 0x506   : > { %v4163_v15 = vadd.f32 %v4162_v26, %v4161_v48  ;;  %v4263_v14 = vadd.f32 %v4262_v57, %v4261_v41 }
 0x508   : > { %v4164_v53 = vrot.slane %v4163_v15, 4  ;;  %v4265_v7 = vadd.f32 %v4264_v47, %v4263_v14 }
 0x50a   : > { %v4165_v35 = vadd.f32 %v4164_v53, %v4163_v15  ;;  %v4266_v60 = vrot.slane %v4265_v7, 4 }
 0x50c   : > { %v4166_v29 = vrot.slane %v4165_v35, 2  ;;  %v4267_v27 = vadd.f32 %v4266_v60, %v4265_v7 }
 0x50e   : > { %v4167_v51 = vadd.f32 %v4166_v29, %v4165_v35  ;;  %v4268_v25 = vrot.slane %v4267_v27, 2 }
 0x510   : > { %v4168_v34 = vrot.slane %v4167_v51, 1  ;;  %v4269_v55 = vadd.f32 %v4268_v25, %v4267_v27 }
 0x512   : > { %v4169_v30 = vadd.f32 %v4168_v34, %v4167_v51  ;;  %v4270_v40 = vrot.slane %v4269_v55, 1 }
 0x514   : > { %v7045_v50 = vmul.f32 0.00390625, %v4169_v30  ;;  %v4271_v52 = vadd.f32 %v4270_v40, %v4269_v55 }
 0x516   : > { %v4272_v19 = vmul.f32 0.00390625, %v4271_v52  ;;  %v4273_v48 = vmul.f32 %v7045_v50, %v7045_v50  ;;  %v4276_v31 = vsub.f32 %v6823_v32, %v7045_v50  ;;  %v4277_v41 = vsub.f32 %v6829_v45, %v7045_v50 }
 0x517   : > { %v4278_v57 = vsub.f32 %v6821_v43, %v7045_v50  ;;  %v4279_v26 = vsub.f32 %v6827_v21, %v7045_v50  ;;  %v4280_v15 = vsub.f32 %v6850_v61, %v7045_v50  ;;  %v4281_v14 = vsub.f32 %v6859_v49, %v7045_v50 }
 0x518   : > { %v4274_v47 = vsub.f32 %v4272_v19, %v4273_v48  ;;  %v4282_v53 = vsub.f32 %v6848_v46, %v7045_v50  ;;  %v4283_v32 = vsub.f32 %v6857_v11, %v7045_v50  ;;  %v4284_v45 = vsub.f32 %v6878_v16, %v7045_v50 }
 0x519   : > { %v4285_v43 = vsub.f32 %v6887_v56, %v7045_v50  ;;  %v4286_v21 = vsub.f32 %v6876_v17, %v7045_v50  ;;  %v4287_v61 = vsub.f32 %v6885_v20, %v7045_v50  ;;  %v4288_v49 = vsub.f32 %v6906_v23, %v7045_v50 }
 0x51a   : > { %v4275_v7 = vmax.f32 %v4274_v47, 0.0  ;;  %v4289_v46 = vsub.f32 %v6915_v33, %v7045_v50  ;;  %v4290_v11 = vsub.f32 %v6904_v39, %v7045_v50  ;;  %v4291_v16 = vsub.f32 %v6913_v58, %v7045_v50 }
 0x51b   : > { %v4292_v56 = vsub.f32 %v6934_v62, %v7045_v50  ;;  %v4293_v17 = vsub.f32 %v6943_v10, %v7045_v50  ;;  %v4294_v20 = vsub.f32 %v6932_v63, %v7045_v50  ;;  %v4295_v23 = vsub.f32 %v6941_v36, %v7045_v50 }
 0x51c   : > { %v4296_v33 = vsub.f32 %v6962_v54, %v7045_v50  ;;  %v4297_v39 = vsub.f32 %v6971_v24, %v7045_v50  ;;  %v4298_v58 = vsub.f32 %v6960_v38, %v7045_v50  ;;  %v4299_v62 = vsub.f32 %v6969_v18, %v7045_v50 }
 0x51d   : > { %v4300_v10 = vsub.f32 %v6990_v42, %v7045_v50  ;;  %v4301_v63 = vsub.f32 %v6999_v59, %v7045_v50  ;;  %v4302_v36 = vsub.f32 %v6988_v28, %v7045_v50  ;;  %v4303_v54 = vsub.f32 %v6997_v13, %v7045_v50 }
 0x51e   : > { %v4304_v24 = vsub.f32 %v7018_v37, %v7045_v50  ;;  %v4305_v38 = vsub.f32 %v7027_v22, %v7045_v50  ;;  %v4306_v18 = vsub.f32 %v7016_v12, %v7045_v50  ;;  %v4307_v42 = vsub.f32 %v7025_v44, %v7045_v50 }
 0x51f   : > { %v4308_v35 = vadd.f32 1e-05, %v4275_v7 }
 0x521   : > { %5042 = vrsqrt.f32 %v4308_v35 }
 0x52b   : > { %v5043_v59 = vpop.eup %5042 }
 0x52c   : > { %v4310_v60 = vmul.f32 %v5043_v59, %v4276_v31  ;;  %v4311_v28 = vmul.f32 %v5043_v59, %v4277_v41  ;;  %v4312_v29 = vmul.f32 %v5043_v59, %v4278_v57  ;;  %v4313_v27 = vmul.f32 %v5043_v59, %v4279_v26 }
 0x52d   : > { %v4314_v13 = vmul.f32 %v5043_v59, %v4280_v15  ;;  %v4315_v51 = vmul.f32 %v5043_v59, %v4281_v14  ;;  %v4316_v25 = vmul.f32 %v5043_v59, %v4282_v53  ;;  %v4317_v37 = vmul.f32 %v5043_v59, %v4283_v32 }
 0x52e   : > { %v4318_v34 = vmul.f32 %v5043_v59, %v4284_v45  ;;  %v4319_v55 = vmul.f32 %v5043_v59, %v4285_v43  ;;  %v4320_v22 = vmul.f32 %v5043_v59, %v4286_v21  ;;  %v4321_v30 = vmul.f32 %v5043_v59, %v4287_v61 }
 0x52f   : > { %v4322_v40 = vmul.f32 %v5043_v59, %v4288_v49  ;;  %v4323_v12 = vmul.f32 %v5043_v59, %v4289_v46  ;;  %v4324_v52 = vmul.f32 %v5043_v59, %v4290_v11  ;;  %v4325_v44 = vmul.f32 %v5043_v59, %v4291_v16 }
 0x530   : > { %v4326_v50 = vmul.f32 %v5043_v59, %v4292_v56  ;;  %v4327_v19 = vmul.f32 %v5043_v59, %v4293_v17  ;;  %v4328_v48 = vmul.f32 %v5043_v59, %v4294_v20  ;;  %v4329_v31 = vmul.f32 %v5043_v59, %v4295_v23  ;;  %v7269_v23 = vld [vmem:[#allocation4_spill] sm:$0xff] }
 0x531   : > { %v4330_v41 = vmul.f32 %v5043_v59, %v4296_v33  ;;  %v4331_v57 = vmul.f32 %v5043_v59, %v4297_v39  ;;  %v4332_v26 = vmul.f32 %v5043_v59, %v4298_v58  ;;  %v4333_v15 = vmul.f32 %v5043_v59, %v4299_v62  ;;  %v7270_v33 = vld [vmem:[#allocation5_spill] sm:$0xff]  ;;  %v7271_v39 = vld [vmem:[#allocation6_spill] sm:$0xff] }
 0x532   : > { %v4334_v14 = vmul.f32 %v5043_v59, %v4300_v10  ;;  %v4335_v47 = vmul.f32 %v5043_v59, %v4301_v63  ;;  %v4336_v53 = vmul.f32 %v5043_v59, %v4302_v36  ;;  %v4337_v32 = vmul.f32 %v5043_v59, %v4303_v54  ;;  %v7275_v62 = vld [vmem:[#allocation10_spill] sm:$0xff]  ;;  %v7276_v63 = vld [vmem:[#allocation11_spill] sm:$0xff]  ;;  %v7277_v54 = vld [vmem:[#allocation12_spill] sm:$0xff] }
 0x533   : > { %v4338_v45 = vmul.f32 %v5043_v59, %v4304_v24  ;;  %v4339_v43 = vmul.f32 %v5043_v59, %v4305_v38  ;;  %v4340_v21 = vmul.f32 %v5043_v59, %v4306_v18  ;;  %v4341_v61 = vmul.f32 %v5043_v59, %v4307_v42  ;;  %v7278_v38 = vld [vmem:[#allocation13_spill] sm:$0xff]  ;;  %v7279_v42 = vld [vmem:[#allocation14_spill] sm:$0xff]  ;;  %v7280_v59 = vld [vmem:[#allocation15_spill] sm:$0xff] }
 0x534   : > { %v4342_v49 = vadd.f32 %v4310_v60, %v5113_v4  ;;  %v4343_v7 = vadd.f32 %v4311_v28, %v5116_v5  ;;  %v4344_v46 = vadd.f32 %v4312_v29, %v5099_v2  ;;  %v4345_v11 = vadd.f32 %v4313_v27, %v5106_v3  ;;  %v7281_v28 = vld [vmem:[#allocation16_spill] sm:$0xff]  ;;  %v7282_v27 = vld [vmem:[#allocation17_spill] sm:$0xff] }
 0x535   : > { %v4346_v16 = vadd.f32 %v4314_v13, %v5093_v0  ;;  %v4347_v56 = vadd.f32 %v4315_v51, %v5096_v1  ;;  %v4348_v17 = vadd.f32 %v4316_v25, %v5133_v8  ;;  %v4349_v20 = vadd.f32 %v4317_v37, %v5140_v9  ;;  %v7272_v0 = vld [vmem:[#allocation7_spill] sm:$0xff]  ;;  %v7274_v9 = vld [vmem:[#allocation9_spill] sm:$0xff]  ;;  %v7283_v51 = vld [vmem:[#allocation18_spill] sm:$0xff] }
 0x536   : > { %v4350_v4 = vadd.f32 %v4318_v34, %v5127_v6  ;;  %v4351_v5 = vadd.f32 %v4319_v55, %v7269_v23  ;;  %v4352_v2 = vadd.f32 %v4320_v22, %v7270_v33  ;;  %v4353_v3 = vadd.f32 %v4321_v30, %v7271_v39  ;;  %4374 = vst.msk [vmem:[%s7118_s7] sm:$0xff] %vm205_vm0, %v4342_v49  ;;  %v7273_v6 = vld [vmem:[#allocation8_spill] sm:$0xff]  ;;  %v7284_v37 = vld [vmem:[#allocation19_spill] sm:$0xff]  ;;  %v7286_v30 = vld [vmem:[#allocation21_spill] sm:$0xff] }
 0x537   : > { %4375 = vst.msk [vmem:[%s7118_s7 + $0x8] sm:$0xff] %vm205_vm0, %v4343_v7  ;;  %4376 = vst.msk [vmem:[%s7118_s7 + $0x10] sm:$0xff] %vm205_vm0, %v4344_v46  ;;  %v4354_v1 = vadd.f32 %v4322_v40, %v7272_v0  ;;  %v4355_v8 = vadd.f32 %v4323_v12, %v7273_v6  ;;  %v4356_v58 = vadd.f32 %v4324_v52, %v7274_v9  ;;  %v7285_v55 = vld [vmem:[#allocation20_spill] sm:$0xff]  ;;  %v7287_v12 = vld [vmem:[#allocation22_spill] sm:$0xff] }
 0x538   : > { %4377 = vst.msk [vmem:[%s7118_s7 + $0x18] sm:$0xff] %vm205_vm0, %v4345_v11  ;;  %v4357_v10 = vadd.f32 %v4325_v44, %v7275_v62  ;;  %4378 = vst.msk [vmem:[%s7118_s7 + $0x20] sm:$0xff] %vm205_vm0, %v4346_v16  ;;  %v4358_v36 = vadd.f32 %v4326_v50, %v7276_v63  ;;  %v4359_v24 = vadd.f32 %v4327_v19, %v7277_v54  ;;  %v7288_v44 = vld [vmem:[#allocation23_spill] sm:$0xff]  ;;  %v7289_v19 = vld [vmem:[#allocation24_spill] sm:$0xff] }
 0x539   : > { %4379 = vst.msk [vmem:[%s7118_s7 + $0x28] sm:$0xff] %vm205_vm0, %v4347_v56  ;;  %4380 = vst.msk [vmem:[%s7118_s7 + $0x30] sm:$0xff] %vm205_vm0, %v4348_v17  ;;  %v4360_v18 = vadd.f32 %v4328_v48, %v7278_v38  ;;  %v4361_v35 = vadd.f32 %v4329_v31, %v7279_v42  ;;  %v4362_v60 = vadd.f32 %v4330_v41, %v7280_v59  ;;  %v7290_v31 = vld [vmem:[#allocation25_spill] sm:$0xff] }
 0x53a   : > { %4381 = vst.msk [vmem:[%s7118_s7 + $0x38] sm:$0xff] %vm205_vm0, %v4349_v20  ;;  %4382 = vst.msk [vmem:[%s7118_s7 + $0x40] sm:$0xff] %vm205_vm0, %v4350_v4  ;;  %v4363_v29 = vadd.f32 %v4331_v57, %v7281_v28  ;;  %v4364_v13 = vadd.f32 %v4332_v26, %v7282_v27  ;;  %v4365_v25 = vadd.f32 %v4333_v15, %v7283_v51  ;;  %v7291_v57 = vld [vmem:[#allocation26_spill] sm:$0xff] }
 0x53b   : > { %4383 = vst.msk [vmem:[%s7118_s7 + $0x48] sm:$0xff] %vm205_vm0, %v4351_v5  ;;  %4384 = vst.msk [vmem:[%s7118_s7 + $0x50] sm:$0xff] %vm205_vm0, %v4352_v2  ;;  %v4366_v34 = vadd.f32 %v4334_v14, %v7284_v37  ;;  %v4367_v22 = vadd.f32 %v4335_v47, %v7285_v55  ;;  %v4368_v40 = vadd.f32 %v4336_v53, %v7286_v30 }
 0x53c   : > { %4385 = vst.msk [vmem:[%s7118_s7 + $0x58] sm:$0xff] %vm205_vm0, %v4353_v3  ;;  %4386 = vst.msk [vmem:[%s7118_s7 + $0x60] sm:$0xff] %vm205_vm0, %v4354_v1  ;;  %v4369_v52 = vadd.f32 %v4337_v32, %v7287_v12  ;;  %v4370_v50 = vadd.f32 %v4338_v45, %v7288_v44  ;;  %v4371_v48 = vadd.f32 %v4339_v43, %v7289_v19 }
 0x53d   : > { %4387 = vst.msk [vmem:[%s7118_s7 + $0x68] sm:$0xff] %vm205_vm0, %v4355_v8  ;;  %4388 = vst.msk [vmem:[%s7118_s7 + $0x70] sm:$0xff] %vm205_vm0, %v4356_v58  ;;  %v4372_v41 = vadd.f32 %v4340_v21, %v7290_v31  ;;  %v4373_v26 = vadd.f32 %v4341_v61, %v7291_v57 }
 0x53e   : > { %4389 = vst.msk [vmem:[%s7118_s7 + $0x78] sm:$0xff] %vm205_vm0, %v4357_v10  ;;  %4390 = vst.msk [vmem:[%s7118_s7 + $0x80] sm:$0xff] %vm205_vm0, %v4358_v36 }
 0x53f   : > { %4391 = vst.msk [vmem:[%s7118_s7 + $0x88] sm:$0xff] %vm205_vm0, %v4359_v24  ;;  %4392 = vst.msk [vmem:[%s7118_s7 + $0x90] sm:$0xff] %vm205_vm0, %v4360_v18 }
 0x540   : > { %4393 = vst.msk [vmem:[%s7118_s7 + $0x98] sm:$0xff] %vm205_vm0, %v4361_v35  ;;  %4394 = vst.msk [vmem:[%s7118_s7 + $0xa0] sm:$0xff] %vm205_vm0, %v4362_v60 }
 0x541   : > { %4395 = vst.msk [vmem:[%s7118_s7 + $0xa8] sm:$0xff] %vm205_vm0, %v4363_v29  ;;  %4396 = vst.msk [vmem:[%s7118_s7 + $0xb0] sm:$0xff] %vm205_vm0, %v4364_v13 }
 0x542   : > { %4397 = vst.msk [vmem:[%s7118_s7 + $0xb8] sm:$0xff] %vm205_vm0, %v4365_v25  ;;  %4398 = vst.msk [vmem:[%s7118_s7 + $0xc0] sm:$0xff] %vm205_vm0, %v4366_v34 }
 0x543   : > { %4399 = vst.msk [vmem:[%s7118_s7 + $0xc8] sm:$0xff] %vm205_vm0, %v4367_v22  ;;  %4400 = vst.msk [vmem:[%s7118_s7 + $0xd0] sm:$0xff] %vm205_vm0, %v4368_v40 }
 0x544   : > { %4401 = vst.msk [vmem:[%s7118_s7 + $0xd8] sm:$0xff] %vm205_vm0, %v4369_v52  ;;  %4402 = vst.msk [vmem:[%s7118_s7 + $0xe0] sm:$0xff] %vm205_vm0, %v4370_v50 }
 0x545   : > { %4403 = vst.msk [vmem:[%s7118_s7 + $0xe8] sm:$0xff] %vm205_vm0, %v4371_v48  ;;  %4404 = vst.msk [vmem:[%s7118_s7 + $0xf0] sm:$0xff] %vm205_vm0, %v4372_v41 }
 0x546   : > { %4405 = vst.msk [vmem:[%s7118_s7 + $0xf8] sm:$0xff] %vm205_vm0, %v4373_v26 }
 0x547 PF: > { %s13_s12 = sadd.s32 1, %s5050_s12  }
 0x548   : > { %p10_p4 = scmp.ge.s32.totalorder %s13_s12, 4  }
 0x54a   :  { %12 = sbr.rel (!%p10_p4) target bundleno = 1 (0x1), region = 69 }

</bundles_post_ra>
